<compile_context>
chip_gen: v6e
topology: v6e:2x2x1
jax: 0.10.0
libtpu: 0.0.40
codegen_flags: <defaults>
</compile_context>

<pallas_src>
import functools

import numpy as np
import jax
import jax.numpy as jnp
from jax import lax
from jax.experimental import pallas as pl
from jax.experimental.pallas import tpu as pltpu

EXPANSION = 4
CA_RATIO = 16
SA_KERNEL = 7
BN_EPS = 1e-5


# ----------------------------- fused Pallas kernel -----------------------------

def _bottleneck_kernel(x_ref, wsc_ref, bsc_ref, w1_ref, b1_ref, w2_ref, b2_ref,
                       w3_ref, b3_ref, wca1_ref, wca2_ref, ksat_ref, o_ref,
                       *, taps):
    """Whole BottleNeckBlock for a block of batch samples, entirely in VMEM.

    x_ref   : (B, S, Ho, Wo, cin) f32  space-to-depth input (S = stride^2)
    wsc/w1/w2/w3/wca1/wca2 : bf16 conv weights (BN scale folded in)
    bsc/b1/b2/b3 : (1, C) f32 BN betas
    ksat_ref: (2*HoWo, HoWo) bf16 pre-composed 7x7 spatial-attention conv
    o_ref   : (B, HoWo, cout) bf16
    taps    : static tuple of (sub_pixel_idx, block_dh, block_dw) for the 3x3 conv
    """
    f32, bf16 = jnp.float32, jnp.bfloat16
    B, S, Ho, Wo, cin = x_ref.shape
    cmid = w1_ref.shape[1]
    cout = w3_ref.shape[1]
    HoWo = Ho * Wo
    M = B * HoWo

    x = x_ref[...]                                          # (B,S,Ho,Wo,cin) f32

    # ---- shortcut: AvgPool2d(2,2) == mean over sub-pixel axis (VPU), 1x1 + BN
    xp = jnp.mean(x, axis=1)                                # (B,Ho,Wo,cin)
    shortcut = (jnp.dot(xp.reshape(M, cin).astype(bf16), wsc_ref[...],
                        preferred_element_type=f32) + bsc_ref[...])   # (M,cout)

    # ---- conv1: 1x1 + BN + ReLU (batch, sub-pixels, spatial folded into M)
    y1 = (jnp.dot(x.reshape(B * S * HoWo, cin).astype(bf16), w1_ref[...],
                  preferred_element_type=f32) + b1_ref[...])
    y1 = jnp.maximum(y1, 0.0).reshape(B, S, Ho, Wo, cmid)

    # ---- conv2: 3x3 / stride via static sub-pixel select + +-1 block shifts
    acc = jnp.zeros((M, cmid), f32)
    for t, (s_idx, bh, bw) in enumerate(taps):
        g = y1[:, s_idx]                                    # (B,Ho,Wo,cmid)
        if bh:                                              # shift along block rows
            zr = jnp.zeros((B, 1, Wo, cmid), f32)
            g = (jnp.concatenate([zr, g[:, :Ho - 1]], axis=1) if bh < 0
                 else jnp.concatenate([g[:, 1:], zr], axis=1))
        if bw:                                              # shift along block cols
            zc = jnp.zeros((B, Ho, 1, cmid), f32)
            g = (jnp.concatenate([zc, g[:, :, :Wo - 1]], axis=2) if bw < 0
                 else jnp.concatenate([g[:, :, 1:], zc], axis=2))
        acc = acc + jnp.dot(g.reshape(M, cmid).astype(bf16), w2_ref[t],
                            preferred_element_type=f32)
    y2 = jnp.maximum(acc + b2_ref[...], 0.0)                # (M,cmid) f32

    # ---- conv3: 1x1 + BN (no ReLU)
    y3 = (jnp.dot(y2.astype(bf16), w3_ref[...], preferred_element_type=f32)
          + b3_ref[...]).reshape(B, HoWo, cout)             # (B,HoWo,cout) f32

    # ---- channel attention: both pooled vectors through the MLP in one pass
    pooled = jnp.concatenate([jnp.mean(y3, axis=1), jnp.max(y3, axis=1)], axis=0)
    h = jnp.maximum(jnp.dot(pooled.astype(bf16), wca1_ref[...],
                            preferred_element_type=f32), 0.0)
    z = jnp.dot(h.astype(bf16), wca2_ref[...], preferred_element_type=f32)
    att_c = jax.nn.sigmoid(z[:B] + z[B:])                   # (B,cout)
    yca = y3 * att_c[:, None, :]

    # ---- spatial attention: single bf16 matmul vs pre-composed 7x7 conv
    cat = jnp.concatenate([jnp.mean(yca, axis=-1), jnp.max(yca, axis=-1)],
                          axis=-1)                          # (B, 2*HoWo)
    att_s = jax.nn.sigmoid(jnp.dot(cat.astype(bf16), ksat_ref[...],
                                   preferred_element_type=f32))   # (B,HoWo)

    # ---- residual add + ReLU
    out = jnp.maximum(shortcut.reshape(B, HoWo, cout) + yca * att_s[:, :, None],
                      0.0)
    o_ref[...] = out.astype(o_ref.dtype)


# ----------------------- static helpers (fold-time, numpy) ---------------------

def _conv2_tap_table(stride):
    """(sub_pixel_idx, block_dh, block_dw) for each of the 9 taps of a 3x3 conv
    with padding=1 and the given stride, in space-to-depth block coordinates."""
    taps = []
    for kh in range(3):
        for kw in range(3):
            r, c = kh - 1, kw - 1
            sh, sw = r % stride, c % stride
            bh, bw = (r - sh) // stride, (c - sw) // stride
            taps.append((sh * stride + sw, bh, bw))
    return tuple(taps)


def _build_sa_matrix(Ho, Wo, wsa):
    """Pre-compose the 7x7 spatial-attention conv (2 in channels -> 1 out) into
    a single (2*HoWo, HoWo) matrix:  sa = [mean | max] @ ksaT."""
    k, pad = SA_KERNEL, SA_KERNEL // 2
    HoWo = Ho * Wo
    km = np.zeros((HoWo, HoWo, 2), np.float32)
    for oh in range(Ho):
        for ow in range(Wo):
            o = oh * Wo + ow
            for kh in range(k):
                for kw in range(k):
                    h, w = oh + kh - pad, ow + kw - pad
                    if 0 <= h < Ho and 0 <= w < Wo:
                        km[o, h * Wo + w, :] += wsa[kh, kw, :]
    return np.concatenate([km[:, :, 0].T, km[:, :, 1].T], axis=0)   # (2*HoWo, HoWo)


# ------------------------------ parameters -------------------------------------

def _init_bn(key, c):
    k1, k2 = jax.random.split(key)
    gamma = 1.0 + 0.1 * jax.random.normal(k1, (c,), jnp.float32)
    beta = 0.1 * jax.random.normal(k2, (c,), jnp.float32)
    # eval-mode BN: running_mean = 0, running_var = 1
    scale = gamma / jnp.sqrt(1.0 + BN_EPS)
    return scale, beta


def _init_conv(key, shape):
    fan_in = int(np.prod(shape[:-1]))
    return jax.random.normal(key, shape, jnp.float32) / np.sqrt(float(fan_in))


def make_block_params(key, cin, cmid):
    cout = cmid * EXPANSION
    ks = jax.random.split(key, 11)
    p = {}
    p['wd'] = _init_conv(ks[0], (cin, cout))             # DownSample 1x1
    p['sd'], p['bd'] = _init_bn(ks[1], cout)
    p['w1'] = _init_conv(ks[2], (cin, cmid))             # conv1 1x1
    p['s1'], p['b1'] = _init_bn(ks[3], cmid)
    p['w2'] = _init_conv(ks[4], (3, 3, cmid, cmid))      # conv2 3x3 (kh,kw,ci,co)
    p['s2'], p['b2'] = _init_bn(ks[5], cmid)
    p['w3'] = _init_conv(ks[6], (cmid, cout))            # conv3 1x1
    p['s3'], p['b3'] = _init_bn(ks[7], cout)
    p['wca1'] = _init_conv(ks[8], (cout, cout // CA_RATIO))
    p['wca2'] = _init_conv(ks[9], (cout // CA_RATIO, cout))
    p['wsa'] = _init_conv(ks[10], (SA_KERNEL, SA_KERNEL, 2))   # (kh,kw,[mean,max])
    return p


def prepare_block(p, H, W, stride):
    """Fold eval-mode BN scales into the conv weights, pre-compose the 7x7
    spatial-attention conv, cast MXU operands to bf16."""
    cin, cmid = p['w1'].shape
    cout = cmid * EXPANSION
    assert H % stride == 0 and W % stride == 0
    Ho, Wo = H // stride, W // stride
    assert Wo % 8 == 0, "Wo must be a multiple of 8 for clean sublane tiling"

    ksat = _build_sa_matrix(Ho, Wo, np.asarray(p['wsa'], np.float32))

    bf16, f32 = jnp.bfloat16, jnp.float32
    prep = dict(
        wsc=(p['wd'] * p['sd'][None, :]).astype(bf16),
        bsc=p['bd'].reshape(1, cout).astype(f32),
        w1=(p['w1'] * p['s1'][None, :]).astype(bf16),
        b1=p['b1'].reshape(1, cmid).astype(f32),
        w2=(p['w2'] * p['s2'][None, None, None, :]
            ).reshape(9, cmid, cmid).astype(bf16),
        b2=p['b2'].reshape(1, cmid).astype(f32),
        w3=(p['w3'] * p['s3'][None, :]).astype(bf16),
        b3=p['b3'].reshape(1, cout).astype(f32),
        wca1=p['wca1'].astype(bf16),
        wca2=p['wca2'].astype(bf16),
        ksat=jnp.asarray(ksat, bf16),
    )
    meta = dict(H=H, W=W, Ho=Ho, Wo=Wo, stride=stride,
                cin=cin, cmid=cmid, cout=cout)
    return prep, meta


# ------------------------------ forward wrapper ---------------------------------

def bottleneck_forward(x, prep, *, meta, batch_block=None):
    """x: (N, H, W, Cin) float32 NHWC -> (N, Ho, Wo, Cout) bfloat16."""
    N, H, W, cin = x.shape
    stride, Ho, Wo = meta['stride'], meta['Ho'], meta['Wo']
    cmid, cout = meta['cmid'], meta['cout']
    S = stride * stride
    HoWo = Ho * Wo

    if batch_block is None:
        batch_block = min(N, 8)
    assert N % batch_block == 0
    B = batch_block

    # Space-to-depth so the stride-2 conv / 2x2 avg-pool become static
    # sub-pixel ops inside the kernel (no gather matmuls, no strided slicing).
    # TODO(synk): when chaining blocks, feed this layout (and bf16 activations)
    # directly from the previous block's output instead of re-packing here.
    x_sd = x.reshape(N, Ho, stride, Wo, stride, cin)
    x_sd = x_sd.transpose(0, 2, 4, 1, 3, 5).reshape(N, S, Ho, Wo, cin)

    taps = _conv2_tap_table(stride)
    kernel = functools.partial(_bottleneck_kernel, taps=taps)

    args = (x_sd, prep['wsc'], prep['bsc'], prep['w1'], prep['b1'],
            prep['w2'], prep['b2'], prep['w3'], prep['b3'],
            prep['wca1'], prep['wca2'], prep['ksat'])

    def const_spec(a):
        s = a.shape
        return pl.BlockSpec(s, lambda n: (0,) * len(s))

    in_specs = [pl.BlockSpec((B, S, Ho, Wo, cin), lambda n: (n, 0, 0, 0, 0))]
    in_specs += [const_spec(a) for a in args[1:]]
    out_spec = pl.BlockSpec((B, HoWo, cout), lambda n: (n, 0, 0))

    cr = cout // CA_RATIO
    flops = N * (2 * HoWo * cin * cout                      # shortcut 1x1
                 + 2 * H * W * cin * cmid                   # conv1
                 + 9 * 2 * HoWo * cmid * cmid               # conv2
                 + 2 * HoWo * cmid * cout                   # conv3
                 + 8 * cout * cr                            # CA MLP
                 + 2 * HoWo * 2 * HoWo)                     # SA conv matmul
    bytes_accessed = (int(np.prod(x_sd.shape)) * 4          # input activations
                      + sum(int(np.prod(a.shape)) * np.dtype(a.dtype).itemsize
                            for a in args[1:])              # weights
                      + N * HoWo * cout * 2)                # bf16 output
    cost = pl.CostEstimate(flops=int(flops),
                           transcendentals=int(N * (cout + HoWo)),
                           bytes_accessed=int(bytes_accessed))

    out = pl.pallas_call(
        kernel,
        out_shape=jax.ShapeDtypeStruct((N, HoWo, cout), jnp.bfloat16),
        grid=(N // B,),
        in_specs=in_specs,
        out_specs=out_spec,
        compiler_params=pltpu.CompilerParams(
            dimension_semantics=("parallel",)),
        cost_estimate=cost,
    )(*args)

    return out.reshape(N, Ho, Wo, cout)


# ------------------------- pure-JAX reference (f32) -----------------------------

def _reference_forward(x, p, stride):
    cin, cmid = p['w1'].shape
    N = x.shape[0]
    if stride == 2:
        _, H, W_, _ = x.shape
        xs = x.reshape(N, H // 2, 2, W_ // 2, 2, cin).mean(axis=(2, 4))
    else:
        xs = x
    shortcut = jnp.dot(xs, p['wd'] * p['sd'][None, :]) + p['bd']

    y1 = jnp.maximum(jnp.dot(x, p['w1'] * p['s1'][None, :]) + p['b1'], 0.0)
    w2f = p['w2'] * p['s2'][None, None, None, :]
    y2 = lax.conv_general_dilated(
        y1, w2f, window_strides=(stride, stride), padding=((1, 1), (1, 1)),
        dimension_numbers=('NHWC', 'HWIO', 'NHWC'))
    y2 = jnp.maximum(y2 + p['b2'], 0.0)
    y3 = jnp.dot(y2, p['w3'] * p['s3'][None, :]) + p['b3']

    avg, mx = y3.mean(axis=(1, 2)), y3.max(axis=(1, 2))

    def fc(v):
        return jnp.dot(jnp.maximum(jnp.dot(v, p['wca1']), 0.0), p['wca2'])

    att_c = jax.nn.sigmoid(fc(avg) + fc(mx))
    yca = y3 * att_c[:, None, None, :]

    sa_in = jnp.concatenate([yca.mean(axis=-1, keepdims=True),
                             yca.max(axis=-1, keepdims=True)], axis=-1)
    sa = lax.conv_general_dilated(
        sa_in, p['wsa'][:, :, :, None], window_strides=(1, 1),
        padding=((3, 3), (3, 3)), dimension_numbers=('NHWC', 'HWIO', 'NHWC'))
    att_s = jax.nn.sigmoid(sa)
    return jnp.maximum(shortcut + yca * att_s, 0.0)


# ----------------------------------- main ---------------------------------------

if __name__ == "__main__":
    key = jax.random.PRNGKey(0)

    # BottleNeckBlock(channel_input=16, channel_intermediate=8, stride=2)
    N, H, W = 4, 16, 16
    channel_input = 16
    channel_intermediate = 8
    stride = 2

    kx, kp = jax.random.split(key)
    x = jax.random.normal(kx, (N, H, W, channel_input), jnp.float32)   # NHWC

    params = make_block_params(kp, channel_input, channel_intermediate)
    prep, meta = prepare_block(params, H, W, stride)

    fwd = jax.jit(functools.partial(bottleneck_forward, meta=meta, batch_block=2))
    out = jax.block_until_ready(fwd(x, prep))

    expected = (N, H // stride, W // stride, channel_intermediate * EXPANSION)
    assert out.shape == expected, (out.shape, expected)
    assert bool(jnp.all(jnp.isfinite(out.astype(jnp.float32))))

    # Loose check vs a pure-JAX f32 reference (bf16 matmul operands in the
    # kernel introduce ~1% numeric differences).
    ref = _reference_forward(x, params, stride)
    err = float(jnp.max(jnp.abs(out.astype(jnp.float32) - ref)))
    assert err < 0.2, f"max abs error vs reference: {err}"

    print("KERNEL_OK")
</pallas_src>

<mosaic_0001>
module attributes {stable_mosaic.version = 11 : i64} {
  func.func @_bottleneck_kernel(%arg0: i32, %arg1: memref<2x4x8x8x16xf32, #tpu.memory_space<vmem>>, %arg2: memref<16x32xbf16, #tpu.memory_space<vmem>>, %arg3: memref<1x32xf32, #tpu.memory_space<vmem>>, %arg4: memref<16x8xbf16, #tpu.memory_space<vmem>>, %arg5: memref<1x8xf32, #tpu.memory_space<vmem>>, %arg6: memref<9x8x8xbf16, #tpu.memory_space<vmem>>, %arg7: memref<1x8xf32, #tpu.memory_space<vmem>>, %arg8: memref<8x32xbf16, #tpu.memory_space<vmem>>, %arg9: memref<1x32xf32, #tpu.memory_space<vmem>>, %arg10: memref<32x2xbf16, #tpu.memory_space<vmem>>, %arg11: memref<2x32xbf16, #tpu.memory_space<vmem>>, %arg12: memref<128x64xbf16, #tpu.memory_space<vmem>>, %arg13: memref<2x64x32xbf16, #tpu.memory_space<vmem>>) attributes {dimension_semantics = [#tpu.dimension_semantics<parallel>], iteration_bounds = array<i64: 2>, scalar_prefetch = 0 : i64, scratch_operands = 0 : i64, tpu.core_type = #tpu.core_type<tc>, window_params = [{transform_indices = @transform_0, window_bounds = array<i64: 2, 4, 8, 8, 16>}, {pipeline_mode = #tpu.pipeline_mode<synchronous>, transform_indices = @transform_1, window_bounds = array<i64: 16, 32>}, {pipeline_mode = #tpu.pipeline_mode<synchronous>, transform_indices = @transform_2, window_bounds = array<i64: 1, 32>}, {pipeline_mode = #tpu.pipeline_mode<synchronous>, transform_indices = @transform_3, window_bounds = array<i64: 16, 8>}, {pipeline_mode = #tpu.pipeline_mode<synchronous>, transform_indices = @transform_4, window_bounds = array<i64: 1, 8>}, {pipeline_mode = #tpu.pipeline_mode<synchronous>, transform_indices = @transform_5, window_bounds = array<i64: 9, 8, 8>}, {pipeline_mode = #tpu.pipeline_mode<synchronous>, transform_indices = @transform_6, window_bounds = array<i64: 1, 8>}, {pipeline_mode = #tpu.pipeline_mode<synchronous>, transform_indices = @transform_7, window_bounds = array<i64: 8, 32>}, {pipeline_mode = #tpu.pipeline_mode<synchronous>, transform_indices = @transform_8, window_bounds = array<i64: 1, 32>}, {pipeline_mode = #tpu.pipeline_mode<synchronous>, transform_indices = @transform_9, window_bounds = array<i64: 32, 2>}, {pipeline_mode = #tpu.pipeline_mode<synchronous>, transform_indices = @transform_10, window_bounds = array<i64: 2, 32>}, {pipeline_mode = #tpu.pipeline_mode<synchronous>, transform_indices = @transform_11, window_bounds = array<i64: 128, 64>}, {transform_indices = @transform_12, window_bounds = array<i64: 2, 64, 32>}]} {
    %c0 = arith.constant 0 : index
    %c0_0 = arith.constant 0 : index
    %c0_1 = arith.constant 0 : index
    %c0_2 = arith.constant 0 : index
    %c0_3 = arith.constant 0 : index
    %0 = vector.load %arg1[%c0, %c0_0, %c0_1, %c0_2, %c0_3] : memref<2x4x8x8x16xf32, #tpu.memory_space<vmem>>, vector<2x4x8x8x16xf32>
    %cst = arith.constant dense<0.000000e+00> : vector<2x8x8x16xf32>
    %1 = vector.multi_reduction <add>, %0, %cst [1] : vector<2x4x8x8x16xf32> to vector<2x8x8x16xf32>
    %cst_4 = arith.constant 4.000000e+00 : f32
    %2 = vector.broadcast %cst_4 : f32 to vector<2x8x8x16xf32>
    %3 = arith.divf %1, %2 : vector<2x8x8x16xf32>
    %4 = vector.shape_cast %3 : vector<2x8x8x16xf32> to vector<128x16xf32>
    %5 = arith.truncf %4 : vector<128x16xf32> to vector<128x16xbf16>
    %c0_5 = arith.constant 0 : index
    %c0_6 = arith.constant 0 : index
    %6 = vector.load %arg2[%c0_5, %c0_6] : memref<16x32xbf16, #tpu.memory_space<vmem>>, vector<16x32xbf16>
    %cst_7 = arith.constant dense<0.000000e+00> : vector<128x32xf32>
    %7 = tpu.matmul %5, %6, %cst_7 {dimension_numbers = #tpu.dot_dimension_numbers<[1], [0], [0], [1], [0, 0, 1, 1], [], []>} : vector<128x16xbf16>, vector<16x32xbf16>, vector<128x32xf32> -> vector<128x32xf32>
    %c0_8 = arith.constant 0 : index
    %c0_9 = arith.constant 0 : index
    %8 = vector.load %arg3[%c0_8, %c0_9] : memref<1x32xf32, #tpu.memory_space<vmem>>, vector<1x32xf32>
    %9 = vector.broadcast %8 : vector<1x32xf32> to vector<128x32xf32>
    %10 = arith.addf %7, %9 : vector<128x32xf32>
    %11 = vector.shape_cast %0 : vector<2x4x8x8x16xf32> to vector<512x16xf32>
    %12 = arith.truncf %11 : vector<512x16xf32> to vector<512x16xbf16>
    %c0_10 = arith.constant 0 : index
    %c0_11 = arith.constant 0 : index
    %13 = vector.load %arg4[%c0_10, %c0_11] : memref<16x8xbf16, #tpu.memory_space<vmem>>, vector<16x8xbf16>
    %cst_12 = arith.constant dense<0.000000e+00> : vector<512x8xf32>
    %14 = tpu.matmul %12, %13, %cst_12 {dimension_numbers = #tpu.dot_dimension_numbers<[1], [0], [0], [1], [0, 0, 1, 1], [], []>} : vector<512x16xbf16>, vector<16x8xbf16>, vector<512x8xf32> -> vector<512x8xf32>
    %c0_13 = arith.constant 0 : index
    %c0_14 = arith.constant 0 : index
    %15 = vector.load %arg5[%c0_13, %c0_14] : memref<1x8xf32, #tpu.memory_space<vmem>>, vector<1x8xf32>
    %16 = vector.broadcast %15 : vector<1x8xf32> to vector<512x8xf32>
    %17 = arith.addf %14, %16 : vector<512x8xf32>
    %cst_15 = arith.constant 0.000000e+00 : f32
    %18 = vector.broadcast %cst_15 : f32 to vector<512x8xf32>
    %19 = arith.maximumf %17, %18 : vector<512x8xf32>
    %20 = vector.shape_cast %19 : vector<512x8xf32> to vector<2x4x8x8x8xf32>
    %cst_16 = arith.constant 0.000000e+00 : f32
    %21 = vector.broadcast %cst_16 : f32 to vector<128x8xf32>
    %22 = vector.extract_strided_slice %20 {offsets = [0, 3, 0, 0, 0], sizes = [2, 1, 8, 8, 8], strides = [1, 1, 1, 1, 1]} : vector<2x4x8x8x8xf32> to vector<2x1x8x8x8xf32>
    %23 = vector.shape_cast %22 : vector<2x1x8x8x8xf32> to vector<2x8x8x8xf32>
    %cst_17 = arith.constant 0.000000e+00 : f32
    %24 = vector.broadcast %cst_17 : f32 to vector<2x1x8x8xf32>
    %25 = vector.extract_strided_slice %23 {offsets = [0, 0, 0, 0], sizes = [2, 7, 8, 8], strides = [1, 1, 1, 1]} : vector<2x8x8x8xf32> to vector<2x7x8x8xf32>
    %26 = tpu.concatenate %24, %25 in 1 : vector<2x1x8x8xf32>, vector<2x7x8x8xf32> -> vector<2x8x8x8xf32>
    %cst_18 = arith.constant 0.000000e+00 : f32
    %27 = vector.broadcast %cst_18 : f32 to vector<2x8x1x8xf32>
    %28 = vector.extract_strided_slice %26 {offsets = [0, 0, 0, 0], sizes = [2, 8, 7, 8], strides = [1, 1, 1, 1]} : vector<2x8x8x8xf32> to vector<2x8x7x8xf32>
    %29 = tpu.concatenate %27, %28 in 2 : vector<2x8x1x8xf32>, vector<2x8x7x8xf32> -> vector<2x8x8x8xf32>
    %30 = vector.shape_cast %29 : vector<2x8x8x8xf32> to vector<128x8xf32>
    %31 = arith.truncf %30 : vector<128x8xf32> to vector<128x8xbf16>
    %c0_19 = arith.constant 0 : index
    %c0_20 = arith.constant 0 : index
    %c0_21 = arith.constant 0 : index
    %32 = vector.load %arg6[%c0_19, %c0_20, %c0_21] : memref<9x8x8xbf16, #tpu.memory_space<vmem>>, vector<1x8x8xbf16>
    %33 = vector.shape_cast %32 : vector<1x8x8xbf16> to vector<8x8xbf16>
    %cst_22 = arith.constant dense<0.000000e+00> : vector<128x8xf32>
    %34 = tpu.matmul %31, %33, %cst_22 {dimension_numbers = #tpu.dot_dimension_numbers<[1], [0], [0], [1], [0, 0, 1, 1], [], []>} : vector<128x8xbf16>, vector<8x8xbf16>, vector<128x8xf32> -> vector<128x8xf32>
    %35 = arith.addf %21, %34 : vector<128x8xf32>
    %36 = vector.extract_strided_slice %20 {offsets = [0, 2, 0, 0, 0], sizes = [2, 1, 8, 8, 8], strides = [1, 1, 1, 1, 1]} : vector<2x4x8x8x8xf32> to vector<2x1x8x8x8xf32>
    %37 = vector.shape_cast %36 : vector<2x1x8x8x8xf32> to vector<2x8x8x8xf32>
    %cst_23 = arith.constant 0.000000e+00 : f32
    %38 = vector.broadcast %cst_23 : f32 to vector<2x1x8x8xf32>
    %39 = vector.extract_strided_slice %37 {offsets = [0, 0, 0, 0], sizes = [2, 7, 8, 8], strides = [1, 1, 1, 1]} : vector<2x8x8x8xf32> to vector<2x7x8x8xf32>
    %40 = tpu.concatenate %38, %39 in 1 : vector<2x1x8x8xf32>, vector<2x7x8x8xf32> -> vector<2x8x8x8xf32>
    %41 = vector.shape_cast %40 : vector<2x8x8x8xf32> to vector<128x8xf32>
    %42 = arith.truncf %41 : vector<128x8xf32> to vector<128x8xbf16>
    %c1 = arith.constant 1 : index
    %c0_24 = arith.constant 0 : index
    %c0_25 = arith.constant 0 : index
    %43 = vector.load %arg6[%c1, %c0_24, %c0_25] : memref<9x8x8xbf16, #tpu.memory_space<vmem>>, vector<1x8x8xbf16>
    %44 = vector.shape_cast %43 : vector<1x8x8xbf16> to vector<8x8xbf16>
    %cst_26 = arith.constant dense<0.000000e+00> : vector<128x8xf32>
    %45 = tpu.matmul %42, %44, %cst_26 {dimension_numbers = #tpu.dot_dimension_numbers<[1], [0], [0], [1], [0, 0, 1, 1], [], []>} : vector<128x8xbf16>, vector<8x8xbf16>, vector<128x8xf32> -> vector<128x8xf32>
    %46 = arith.addf %35, %45 : vector<128x8xf32>
    %47 = vector.extract_strided_slice %20 {offsets = [0, 3, 0, 0, 0], sizes = [2, 1, 8, 8, 8], strides = [1, 1, 1, 1, 1]} : vector<2x4x8x8x8xf32> to vector<2x1x8x8x8xf32>
    %48 = vector.shape_cast %47 : vector<2x1x8x8x8xf32> to vector<2x8x8x8xf32>
    %cst_27 = arith.constant 0.000000e+00 : f32
    %49 = vector.broadcast %cst_27 : f32 to vector<2x1x8x8xf32>
    %50 = vector.extract_strided_slice %48 {offsets = [0, 0, 0, 0], sizes = [2, 7, 8, 8], strides = [1, 1, 1, 1]} : vector<2x8x8x8xf32> to vector<2x7x8x8xf32>
    %51 = tpu.concatenate %49, %50 in 1 : vector<2x1x8x8xf32>, vector<2x7x8x8xf32> -> vector<2x8x8x8xf32>
    %52 = vector.shape_cast %51 : vector<2x8x8x8xf32> to vector<128x8xf32>
    %53 = arith.truncf %52 : vector<128x8xf32> to vector<128x8xbf16>
    %c2 = arith.constant 2 : index
    %c0_28 = arith.constant 0 : index
    %c0_29 = arith.constant 0 : index
    %54 = vector.load %arg6[%c2, %c0_28, %c0_29] : memref<9x8x8xbf16, #tpu.memory_space<vmem>>, vector<1x8x8xbf16>
    %55 = vector.shape_cast %54 : vector<1x8x8xbf16> to vector<8x8xbf16>
    %cst_30 = arith.constant dense<0.000000e+00> : vector<128x8xf32>
    %56 = tpu.matmul %53, %55, %cst_30 {dimension_numbers = #tpu.dot_dimension_numbers<[1], [0], [0], [1], [0, 0, 1, 1], [], []>} : vector<128x8xbf16>, vector<8x8xbf16>, vector<128x8xf32> -> vector<128x8xf32>
    %57 = arith.addf %46, %56 : vector<128x8xf32>
    %58 = vector.extract_strided_slice %20 {offsets = [0, 1, 0, 0, 0], sizes = [2, 1, 8, 8, 8], strides = [1, 1, 1, 1, 1]} : vector<2x4x8x8x8xf32> to vector<2x1x8x8x8xf32>
    %59 = vector.shape_cast %58 : vector<2x1x8x8x8xf32> to vector<2x8x8x8xf32>
    %cst_31 = arith.constant 0.000000e+00 : f32
    %60 = vector.broadcast %cst_31 : f32 to vector<2x8x1x8xf32>
    %61 = vector.extract_strided_slice %59 {offsets = [0, 0, 0, 0], sizes = [2, 8, 7, 8], strides = [1, 1, 1, 1]} : vector<2x8x8x8xf32> to vector<2x8x7x8xf32>
    %62 = tpu.concatenate %60, %61 in 2 : vector<2x8x1x8xf32>, vector<2x8x7x8xf32> -> vector<2x8x8x8xf32>
    %63 = vector.shape_cast %62 : vector<2x8x8x8xf32> to vector<128x8xf32>
    %64 = arith.truncf %63 : vector<128x8xf32> to vector<128x8xbf16>
    %c3 = arith.constant 3 : index
    %c0_32 = arith.constant 0 : index
    %c0_33 = arith.constant 0 : index
    %65 = vector.load %arg6[%c3, %c0_32, %c0_33] : memref<9x8x8xbf16, #tpu.memory_space<vmem>>, vector<1x8x8xbf16>
    %66 = vector.shape_cast %65 : vector<1x8x8xbf16> to vector<8x8xbf16>
    %cst_34 = arith.constant dense<0.000000e+00> : vector<128x8xf32>
    %67 = tpu.matmul %64, %66, %cst_34 {dimension_numbers = #tpu.dot_dimension_numbers<[1], [0], [0], [1], [0, 0, 1, 1], [], []>} : vector<128x8xbf16>, vector<8x8xbf16>, vector<128x8xf32> -> vector<128x8xf32>
    %68 = arith.addf %57, %67 : vector<128x8xf32>
    %69 = vector.extract_strided_slice %20 {offsets = [0, 0, 0, 0, 0], sizes = [2, 1, 8, 8, 8], strides = [1, 1, 1, 1, 1]} : vector<2x4x8x8x8xf32> to vector<2x1x8x8x8xf32>
    %70 = vector.shape_cast %69 : vector<2x1x8x8x8xf32> to vector<2x8x8x8xf32>
    %71 = vector.shape_cast %70 : vector<2x8x8x8xf32> to vector<128x8xf32>
    %72 = arith.truncf %71 : vector<128x8xf32> to vector<128x8xbf16>
    %c4 = arith.constant 4 : index
    %c0_35 = arith.constant 0 : index
    %c0_36 = arith.constant 0 : index
    %73 = vector.load %arg6[%c4, %c0_35, %c0_36] : memref<9x8x8xbf16, #tpu.memory_space<vmem>>, vector<1x8x8xbf16>
    %74 = vector.shape_cast %73 : vector<1x8x8xbf16> to vector<8x8xbf16>
    %cst_37 = arith.constant dense<0.000000e+00> : vector<128x8xf32>
    %75 = tpu.matmul %72, %74, %cst_37 {dimension_numbers = #tpu.dot_dimension_numbers<[1], [0], [0], [1], [0, 0, 1, 1], [], []>} : vector<128x8xbf16>, vector<8x8xbf16>, vector<128x8xf32> -> vector<128x8xf32>
    %76 = arith.addf %68, %75 : vector<128x8xf32>
    %77 = vector.extract_strided_slice %20 {offsets = [0, 1, 0, 0, 0], sizes = [2, 1, 8, 8, 8], strides = [1, 1, 1, 1, 1]} : vector<2x4x8x8x8xf32> to vector<2x1x8x8x8xf32>
    %78 = vector.shape_cast %77 : vector<2x1x8x8x8xf32> to vector<2x8x8x8xf32>
    %79 = vector.shape_cast %78 : vector<2x8x8x8xf32> to vector<128x8xf32>
    %80 = arith.truncf %79 : vector<128x8xf32> to vector<128x8xbf16>
    %c5 = arith.constant 5 : index
    %c0_38 = arith.constant 0 : index
    %c0_39 = arith.constant 0 : index
    %81 = vector.load %arg6[%c5, %c0_38, %c0_39] : memref<9x8x8xbf16, #tpu.memory_space<vmem>>, vector<1x8x8xbf16>
    %82 = vector.shape_cast %81 : vector<1x8x8xbf16> to vector<8x8xbf16>
    %cst_40 = arith.constant dense<0.000000e+00> : vector<128x8xf32>
    %83 = tpu.matmul %80, %82, %cst_40 {dimension_numbers = #tpu.dot_dimension_numbers<[1], [0], [0], [1], [0, 0, 1, 1], [], []>} : vector<128x8xbf16>, vector<8x8xbf16>, vector<128x8xf32> -> vector<128x8xf32>
    %84 = arith.addf %76, %83 : vector<128x8xf32>
    %85 = vector.extract_strided_slice %20 {offsets = [0, 3, 0, 0, 0], sizes = [2, 1, 8, 8, 8], strides = [1, 1, 1, 1, 1]} : vector<2x4x8x8x8xf32> to vector<2x1x8x8x8xf32>
    %86 = vector.shape_cast %85 : vector<2x1x8x8x8xf32> to vector<2x8x8x8xf32>
    %cst_41 = arith.constant 0.000000e+00 : f32
    %87 = vector.broadcast %cst_41 : f32 to vector<2x8x1x8xf32>
    %88 = vector.extract_strided_slice %86 {offsets = [0, 0, 0, 0], sizes = [2, 8, 7, 8], strides = [1, 1, 1, 1]} : vector<2x8x8x8xf32> to vector<2x8x7x8xf32>
    %89 = tpu.concatenate %87, %88 in 2 : vector<2x8x1x8xf32>, vector<2x8x7x8xf32> -> vector<2x8x8x8xf32>
    %90 = vector.shape_cast %89 : vector<2x8x8x8xf32> to vector<128x8xf32>
    %91 = arith.truncf %90 : vector<128x8xf32> to vector<128x8xbf16>
    %c6 = arith.constant 6 : index
    %c0_42 = arith.constant 0 : index
    %c0_43 = arith.constant 0 : index
    %92 = vector.load %arg6[%c6, %c0_42, %c0_43] : memref<9x8x8xbf16, #tpu.memory_space<vmem>>, vector<1x8x8xbf16>
    %93 = vector.shape_cast %92 : vector<1x8x8xbf16> to vector<8x8xbf16>
    %cst_44 = arith.constant dense<0.000000e+00> : vector<128x8xf32>
    %94 = tpu.matmul %91, %93, %cst_44 {dimension_numbers = #tpu.dot_dimension_numbers<[1], [0], [0], [1], [0, 0, 1, 1], [], []>} : vector<128x8xbf16>, vector<8x8xbf16>, vector<128x8xf32> -> vector<128x8xf32>
    %95 = arith.addf %84, %94 : vector<128x8xf32>
    %96 = vector.extract_strided_slice %20 {offsets = [0, 2, 0, 0, 0], sizes = [2, 1, 8, 8, 8], strides = [1, 1, 1, 1, 1]} : vector<2x4x8x8x8xf32> to vector<2x1x8x8x8xf32>
    %97 = vector.shape_cast %96 : vector<2x1x8x8x8xf32> to vector<2x8x8x8xf32>
    %98 = vector.shape_cast %97 : vector<2x8x8x8xf32> to vector<128x8xf32>
    %99 = arith.truncf %98 : vector<128x8xf32> to vector<128x8xbf16>
    %c7 = arith.constant 7 : index
    %c0_45 = arith.constant 0 : index
    %c0_46 = arith.constant 0 : index
    %100 = vector.load %arg6[%c7, %c0_45, %c0_46] : memref<9x8x8xbf16, #tpu.memory_space<vmem>>, vector<1x8x8xbf16>
    %101 = vector.shape_cast %100 : vector<1x8x8xbf16> to vector<8x8xbf16>
    %cst_47 = arith.constant dense<0.000000e+00> : vector<128x8xf32>
    %102 = tpu.matmul %99, %101, %cst_47 {dimension_numbers = #tpu.dot_dimension_numbers<[1], [0], [0], [1], [0, 0, 1, 1], [], []>} : vector<128x8xbf16>, vector<8x8xbf16>, vector<128x8xf32> -> vector<128x8xf32>
    %103 = arith.addf %95, %102 : vector<128x8xf32>
    %104 = vector.extract_strided_slice %20 {offsets = [0, 3, 0, 0, 0], sizes = [2, 1, 8, 8, 8], strides = [1, 1, 1, 1, 1]} : vector<2x4x8x8x8xf32> to vector<2x1x8x8x8xf32>
    %105 = vector.shape_cast %104 : vector<2x1x8x8x8xf32> to vector<2x8x8x8xf32>
    %106 = vector.shape_cast %105 : vector<2x8x8x8xf32> to vector<128x8xf32>
    %107 = arith.truncf %106 : vector<128x8xf32> to vector<128x8xbf16>
    %c8 = arith.constant 8 : index
    %c0_48 = arith.constant 0 : index
    %c0_49 = arith.constant 0 : index
    %108 = vector.load %arg6[%c8, %c0_48, %c0_49] : memref<9x8x8xbf16, #tpu.memory_space<vmem>>, vector<1x8x8xbf16>
    %109 = vector.shape_cast %108 : vector<1x8x8xbf16> to vector<8x8xbf16>
    %cst_50 = arith.constant dense<0.000000e+00> : vector<128x8xf32>
    %110 = tpu.matmul %107, %109, %cst_50 {dimension_numbers = #tpu.dot_dimension_numbers<[1], [0], [0], [1], [0, 0, 1, 1], [], []>} : vector<128x8xbf16>, vector<8x8xbf16>, vector<128x8xf32> -> vector<128x8xf32>
    %111 = arith.addf %103, %110 : vector<128x8xf32>
    %c0_51 = arith.constant 0 : index
    %c0_52 = arith.constant 0 : index
    %112 = vector.load %arg7[%c0_51, %c0_52] : memref<1x8xf32, #tpu.memory_space<vmem>>, vector<1x8xf32>
    %113 = vector.broadcast %112 : vector<1x8xf32> to vector<128x8xf32>
    %114 = arith.addf %111, %113 : vector<128x8xf32>
    %cst_53 = arith.constant 0.000000e+00 : f32
    %115 = vector.broadcast %cst_53 : f32 to vector<128x8xf32>
    %116 = arith.maximumf %114, %115 : vector<128x8xf32>
    %117 = arith.truncf %116 : vector<128x8xf32> to vector<128x8xbf16>
    %c0_54 = arith.constant 0 : index
    %c0_55 = arith.constant 0 : index
    %118 = vector.load %arg8[%c0_54, %c0_55] : memref<8x32xbf16, #tpu.memory_space<vmem>>, vector<8x32xbf16>
    %cst_56 = arith.constant dense<0.000000e+00> : vector<128x32xf32>
    %119 = tpu.matmul %117, %118, %cst_56 {dimension_numbers = #tpu.dot_dimension_numbers<[1], [0], [0], [1], [0, 0, 1, 1], [], []>} : vector<128x8xbf16>, vector<8x32xbf16>, vector<128x32xf32> -> vector<128x32xf32>
    %c0_57 = arith.constant 0 : index
    %c0_58 = arith.constant 0 : index
    %120 = vector.load %arg9[%c0_57, %c0_58] : memref<1x32xf32, #tpu.memory_space<vmem>>, vector<1x32xf32>
    %121 = vector.broadcast %120 : vector<1x32xf32> to vector<128x32xf32>
    %122 = arith.addf %119, %121 : vector<128x32xf32>
    %123 = vector.shape_cast %122 : vector<128x32xf32> to vector<2x64x32xf32>
    %cst_59 = arith.constant dense<0.000000e+00> : vector<2x32xf32>
    %124 = vector.multi_reduction <add>, %123, %cst_59 [1] : vector<2x64x32xf32> to vector<2x32xf32>
    %cst_60 = arith.constant 6.400000e+01 : f32
    %125 = vector.broadcast %cst_60 : f32 to vector<2x32xf32>
    %126 = arith.divf %124, %125 : vector<2x32xf32>
    %cst_61 = arith.constant dense<0xFF800000> : vector<2x32xf32>
    %127 = vector.multi_reduction <maximumf>, %123, %cst_61 [1] : vector<2x64x32xf32> to vector<2x32xf32>
    %128 = tpu.concatenate %126, %127 in 0 : vector<2x32xf32>, vector<2x32xf32> -> vector<4x32xf32>
    %129 = arith.truncf %128 : vector<4x32xf32> to vector<4x32xbf16>
    %c0_62 = arith.constant 0 : index
    %c0_63 = arith.constant 0 : index
    %130 = vector.load %arg10[%c0_62, %c0_63] : memref<32x2xbf16, #tpu.memory_space<vmem>>, vector<32x2xbf16>
    %cst_64 = arith.constant dense<0.000000e+00> : vector<4x2xf32>
    %131 = tpu.matmul %129, %130, %cst_64 {dimension_numbers = #tpu.dot_dimension_numbers<[1], [0], [0], [1], [0, 0, 1, 1], [], []>} : vector<4x32xbf16>, vector<32x2xbf16>, vector<4x2xf32> -> vector<4x2xf32>
    %cst_65 = arith.constant 0.000000e+00 : f32
    %132 = vector.broadcast %cst_65 : f32 to vector<4x2xf32>
    %133 = arith.maximumf %131, %132 : vector<4x2xf32>
    %134 = arith.truncf %133 : vector<4x2xf32> to vector<4x2xbf16>
    %c0_66 = arith.constant 0 : index
    %c0_67 = arith.constant 0 : index
    %135 = vector.load %arg11[%c0_66, %c0_67] : memref<2x32xbf16, #tpu.memory_space<vmem>>, vector<2x32xbf16>
    %cst_68 = arith.constant dense<0.000000e+00> : vector<4x32xf32>
    %136 = tpu.matmul %134, %135, %cst_68 {dimension_numbers = #tpu.dot_dimension_numbers<[1], [0], [0], [1], [0, 0, 1, 1], [], []>} : vector<4x2xbf16>, vector<2x32xbf16>, vector<4x32xf32> -> vector<4x32xf32>
    %137 = vector.extract_strided_slice %136 {offsets = [0, 0], sizes = [2, 32], strides = [1, 1]} : vector<4x32xf32> to vector<2x32xf32>
    %138 = vector.extract_strided_slice %136 {offsets = [2, 0], sizes = [2, 32], strides = [1, 1]} : vector<4x32xf32> to vector<2x32xf32>
    %139 = arith.addf %137, %138 : vector<2x32xf32>
    %140 = arith.negf %139 : vector<2x32xf32>
    %141 = math.exp %140 : vector<2x32xf32>
    %cst_69 = arith.constant 1.000000e+00 : f32
    %142 = vector.broadcast %cst_69 : f32 to vector<2x32xf32>
    %143 = arith.addf %142, %141 : vector<2x32xf32>
    %144 = arith.divf %142, %143 : vector<2x32xf32>
    %145 = vector.shape_cast %144 : vector<2x32xf32> to vector<2x1x32xf32>
    %146 = vector.broadcast %145 : vector<2x1x32xf32> to vector<2x64x32xf32>
    %147 = arith.mulf %123, %146 : vector<2x64x32xf32>
    %cst_70 = arith.constant dense<0.000000e+00> : vector<2x64xf32>
    %148 = vector.multi_reduction <add>, %147, %cst_70 [2] : vector<2x64x32xf32> to vector<2x64xf32>
    %cst_71 = arith.constant 3.200000e+01 : f32
    %149 = vector.broadcast %cst_71 : f32 to vector<2x64xf32>
    %150 = arith.divf %148, %149 : vector<2x64xf32>
    %cst_72 = arith.constant dense<0xFF800000> : vector<2x64xf32>
    %151 = vector.multi_reduction <maximumf>, %147, %cst_72 [2] : vector<2x64x32xf32> to vector<2x64xf32>
    %152 = tpu.concatenate %150, %151 in 1 : vector<2x64xf32>, vector<2x64xf32> -> vector<2x128xf32>
    %153 = arith.truncf %152 : vector<2x128xf32> to vector<2x128xbf16>
    %c0_73 = arith.constant 0 : index
    %c0_74 = arith.constant 0 : index
    %154 = vector.load %arg12[%c0_73, %c0_74] : memref<128x64xbf16, #tpu.memory_space<vmem>>, vector<128x64xbf16>
    %cst_75 = arith.constant dense<0.000000e+00> : vector<2x64xf32>
    %155 = tpu.matmul %153, %154, %cst_75 {dimension_numbers = #tpu.dot_dimension_numbers<[1], [0], [0], [1], [0, 0, 1, 1], [], []>} : vector<2x128xbf16>, vector<128x64xbf16>, vector<2x64xf32> -> vector<2x64xf32>
    %156 = arith.negf %155 : vector<2x64xf32>
    %157 = math.exp %156 : vector<2x64xf32>
    %cst_76 = arith.constant 1.000000e+00 : f32
    %158 = vector.broadcast %cst_76 : f32 to vector<2x64xf32>
    %159 = arith.addf %158, %157 : vector<2x64xf32>
    %160 = arith.divf %158, %159 : vector<2x64xf32>
    %161 = vector.shape_cast %10 : vector<128x32xf32> to vector<2x64x32xf32>
    %162 = vector.shape_cast %160 : vector<2x64xf32> to vector<2x64x1xf32>
    %163 = vector.broadcast %162 : vector<2x64x1xf32> to vector<2x64x32xf32>
    %164 = arith.mulf %147, %163 : vector<2x64x32xf32>
    %165 = arith.addf %161, %164 : vector<2x64x32xf32>
    %cst_77 = arith.constant 0.000000e+00 : f32
    %166 = vector.broadcast %cst_77 : f32 to vector<2x64x32xf32>
    %167 = arith.maximumf %165, %166 : vector<2x64x32xf32>
    %168 = arith.truncf %167 : vector<2x64x32xf32> to vector<2x64x32xbf16>
    %c0_78 = arith.constant 0 : index
    %c0_79 = arith.constant 0 : index
    %c0_80 = arith.constant 0 : index
    %169 = vector.load %arg13[%c0_78, %c0_79, %c0_80] : memref<2x64x32xbf16, #tpu.memory_space<vmem>>, vector<2x64x32xbf16>
    tpu.vector_store %arg13[%c0_78, %c0_79, %c0_80], %168 {strides = array<i32>} : memref<2x64x32xbf16, #tpu.memory_space<vmem>>, vector<2x64x32xbf16>,
    return
  }
  func.func @transform_0(%arg0: i32) -> (i32, i32, i32, i32, i32) {
    %c0_i32 = arith.constant 0 : i32
    %c0_i32_0 = arith.constant 0 : i32
    %c0_i32_1 = arith.constant 0 : i32
    %c0_i32_2 = arith.constant 0 : i32
    %c0_i32_3 = arith.constant 0 : i32
    return %arg0, %c0_i32, %c0_i32_0, %c0_i32_1, %c0_i32_2 : i32, i32, i32, i32, i32
  }
  func.func @transform_1(%arg0: i32) -> (i32, i32) {
    %c0_i32 = arith.constant 0 : i32
    %c0_i32_0 = arith.constant 0 : i32
    %c0_i32_1 = arith.constant 0 : i32
    return %c0_i32, %c0_i32_0 : i32, i32
  }
  func.func @transform_2(%arg0: i32) -> (i32, i32) {
    %c0_i32 = arith.constant 0 : i32
    %c0_i32_0 = arith.constant 0 : i32
    %c0_i32_1 = arith.constant 0 : i32
    return %c0_i32, %c0_i32_0 : i32, i32
  }
  func.func @transform_3(%arg0: i32) -> (i32, i32) {
    %c0_i32 = arith.constant 0 : i32
    %c0_i32_0 = arith.constant 0 : i32
    %c0_i32_1 = arith.constant 0 : i32
    return %c0_i32, %c0_i32_0 : i32, i32
  }
  func.func @transform_4(%arg0: i32) -> (i32, i32) {
    %c0_i32 = arith.constant 0 : i32
    %c0_i32_0 = arith.constant 0 : i32
    %c0_i32_1 = arith.constant 0 : i32
    return %c0_i32, %c0_i32_0 : i32, i32
  }
  func.func @transform_5(%arg0: i32) -> (i32, i32, i32) {
    %c0_i32 = arith.constant 0 : i32
    %c0_i32_0 = arith.constant 0 : i32
    %c0_i32_1 = arith.constant 0 : i32
    %c0_i32_2 = arith.constant 0 : i32
    return %c0_i32, %c0_i32_0, %c0_i32_1 : i32, i32, i32
  }
  func.func @transform_6(%arg0: i32) -> (i32, i32) {
    %c0_i32 = arith.constant 0 : i32
    %c0_i32_0 = arith.constant 0 : i32
    %c0_i32_1 = arith.constant 0 : i32
    return %c0_i32, %c0_i32_0 : i32, i32
  }
  func.func @transform_7(%arg0: i32) -> (i32, i32) {
    %c0_i32 = arith.constant 0 : i32
    %c0_i32_0 = arith.constant 0 : i32
    %c0_i32_1 = arith.constant 0 : i32
    return %c0_i32, %c0_i32_0 : i32, i32
  }
  func.func @transform_8(%arg0: i32) -> (i32, i32) {
    %c0_i32 = arith.constant 0 : i32
    %c0_i32_0 = arith.constant 0 : i32
    %c0_i32_1 = arith.constant 0 : i32
    return %c0_i32, %c0_i32_0 : i32, i32
  }
  func.func @transform_9(%arg0: i32) -> (i32, i32) {
    %c0_i32 = arith.constant 0 : i32
    %c0_i32_0 = arith.constant 0 : i32
    %c0_i32_1 = arith.constant 0 : i32
    return %c0_i32, %c0_i32_0 : i32, i32
  }
  func.func @transform_10(%arg0: i32) -> (i32, i32) {
    %c0_i32 = arith.constant 0 : i32
    %c0_i32_0 = arith.constant 0 : i32
    %c0_i32_1 = arith.constant 0 : i32
    return %c0_i32, %c0_i32_0 : i32, i32
  }
  func.func @transform_11(%arg0: i32) -> (i32, i32) {
    %c0_i32 = arith.constant 0 : i32
    %c0_i32_0 = arith.constant 0 : i32
    %c0_i32_1 = arith.constant 0 : i32
    return %c0_i32, %c0_i32_0 : i32, i32
  }
  func.func @transform_12(%arg0: i32) -> (i32, i32, i32) {
    %c0_i32 = arith.constant 0 : i32
    %c0_i32_0 = arith.constant 0 : i32
    %c0_i32_1 = arith.constant 0 : i32
    return %arg0, %c0_i32, %c0_i32_0 : i32, i32, i32
  }
}

</mosaic_0001>

<bundles_post_ra>
// kernel: bottleneck_forward.1
= control target key start
LH: loop header
LB: loop body
LE: loop exit
PB: predicated region body
PF: predicated region fallthrough
CT: control target
= control target key end

     0   :  { %s6480_s0 = inlined_call_operand.vmem [shape: f32[4,4,8,8,16], index: 0, kind: input, shape index: {}]   ;;  %s6481_s1 = inlined_call_operand.vmem [shape: bf16[16,32], index: 1, kind: input, shape index: {}]   ;;  %s6482_s2 = inlined_call_operand.vmem [shape: f32[1,32], index: 2, kind: input, shape index: {}]   ;;  %s6483_s3 = inlined_call_operand.vmem [shape: bf16[16,8], index: 3, kind: input, shape index: {}]   ;;  %s6484_s4 = inlined_call_operand.vmem [shape: f32[1,8], index: 4, kind: input, shape index: {}]   ;;  %s6485_s5 = inlined_call_operand.vmem [shape: bf16[9,8,8], index: 5, kind: input, shape index: {}]   ;;  %s6486_s6 = inlined_call_operand.vmem [shape: f32[1,8], index: 6, kind: input, shape index: {}]   ;;  %s6487_s7 = inlined_call_operand.vmem [shape: bf16[8,32], index: 7, kind: input, shape index: {}]   ;;  %s6488_s8 = inlined_call_operand.vmem [shape: f32[1,32], index: 8, kind: input, shape index: {}]   ;;  %s6489_s9 = inlined_call_operand.vmem [shape: bf16[32,2], index: 9, kind: input, shape index: {}]   ;;  %s6490_s10 = inlined_call_operand.vmem [shape: bf16[2,32], index: 10, kind: input, shape index: {}]   ;;  %s6491_s11 = inlined_call_operand.vmem [shape: bf16[128,64], index: 11, kind: input, shape index: {}]   ;;  %s6492_s12 = inlined_call_operand.hbm [shape: bf16[4,64,32], index: 12, kind: output, shape index: {}]  }
   0x1   :  { %6502 = sst [smem:[#allocation45_spill]] %s6480_s0 }
   0x2   :  { %6503 = sst [smem:[#allocation46_spill]] %s6481_s1 }
   0x3   :  { %17 = vsyncpa [#allocation3], 0 }
   0x4   :  { %19 = vsyncpa [#allocation3 + $0x1], 0  ;;  %s4728_s21 = smov 0   ;;  %s4730_s22 = smov 0  }
   0x5   :  { %s4732_s23 = smov 0   ;;  %s4734_s24 = smov 0  }
   0x6 LB: > { %s4749_s25 = sadd.s32 4294967295, %s4655_s24   ;;  %s3878_s26 = sadd.s32 4294967294, %s4655_s24   ;;  %s4655_s24 = sphi %s4734_s24, %s6632_s24   ;;  %s4651_s23 = sphi %s4732_s23, %s6631_s23   ;;  %s4647_s22 = sphi %s4730_s22, %s6630_s22   ;;  %s4643_s21 = sphi %s4728_s21, %s6629_s21  }
   0x7   : > { %s4753_s27 = sadd.s32 1, %s4655_s24   ;;  %s289_s28 = sadd.s32 1, %s4651_s23 }
   0x8   : > { %s286_s29 = ssub.s32 %s4655_s24, %s4753_s27  ;;  %p299_p0 = scmp.ne.s32.totalorder %s4651_s23, %s4647_s22 }
   0x9   : > { %p287_p1 = scmp.eq.s32.totalorder %s286_s29, 0  ;;  %p300_p2 = scmp.eq.s32.totalorder %s4749_s25, 1 }
   0xa   : > { %p305_p3 = scmp.ne.s32.totalorder %s4647_s22, %s4643_s21  ;;  %p306_p4 = scmp.eq.s32.totalorder %s3878_s26, 1 }
   0xb   : > { %s4764_s30 = scalar_select %p287_p1, %s4651_s23, %s289_s28  }
   0xc   : > { %p4766_p5 = por %p300_p2, %p299_p0  ;;  %p4770_p6 = por %p306_p4, %p305_p3 }
   0xd   : > { %p3881_p7 = scmp.ge.s32.totalorder %s4655_s24, 1  ;;  %p367_p8 = scmp.lt.s32.totalorder %s4655_s24, 3 }
   0xf   : > { %p368_p9 = pnand %p3881_p7, %p367_p8 }
  0x11   : > { %371 = sbr.rel (%p368_p9) target bundleno = 1995 (0x7cb), region = 68 }
  0x16   : > { %s6506_s1 = sld [smem:[#allocation46_spill]]  ;;  %s3883_s17 = sshll.u32 %s4749_s25, 1  ;;  %v4783_v1 = vld [vmem:[%s6483_s3] sm:$0xff]   ;;  %vm483_vm0 = vcmask 130048   ;;  %vm1358_vm1 = vcmask 1043456   ;;  %vm1333_vm2 = vcmask 64512  }
  0x17   : > { %p411_p10 = scmp.lt.s32.totalorder %s3883_s17, 3  ;;  %s6507_s0 = sld [smem:[#allocation45_spill]]  ;;  %vm1298_vm3 = vcmask 1040384   ;;  %vm4658_vm4 = vmmov 0   ;;  %vm2884_vm5 = vcmask 261120   ;;  %vm2974_vm6 = vcmask 1041409  }
  0x18   : > { %vm2979_vm7 = vcmask 1043459   ;;  %vm2982_vm8 = vcmask 1041408   ;;  %vm3047_vm9 = vcmask 15360   ;;  %vm3293_vm10 = vcmask 130112  }
  0x19   : > { %s6634_s17 = smov (!%p411_p10, %s3883_s17), 3  ;;  %vm3300_vm11 = vcmask 195712   ;;  %vm3307_vm12 = vcmask 261312   ;;  %vm3404_vm13 = vcmask 654912   ;;  %vm3314_vm14 = vcmask 326912  }
  0x1a   : > { %s4056_s20 = sshll.u32 %s6634_s17, 8  ;;  %vm3411_vm15 = vcmask 720512  }
  0x1c   : > { %v4575_v0 = vld [vmem:[%s6506_s1] sm:$0xff]  }
  0x1d   : > { %4519 = vmatprep.subr.bf16.mxu1 %v4575_v0  ;;  %4221 = vmatprep.subr.bf16.mxu0 %v4575_v0  ;;  %s4789_s29 = scalar_lea.vmem %s6507_s0, %s4056_s20  ;;  %s407_s20 = sand.u32 1, %s4647_s22  }
  0x1e   : > { %4520 = vmatpush3.bf16.msra.mxu1 %v4575_v0  ;;  %4222 = vmatpush3.bf16.msra.mxu0 %v4575_v0  ;;  %v4792_v2 = vld [vmem:[%s4789_s29 + $0x120] sm:$0xff]  ;;  %v4795_v3 = vld [vmem:[%s4789_s29 + $0x128] sm:$0xff]  ;;  %v4830_v18 = vld [vmem:[%s4789_s29 + $0x130] sm:$0xff]  ;;  %s3882_s26 = sshll.u32 %s407_s20, 6  ;;  %s6440_s19 = scalar_lea.sflag [#allocation3], %s407_s20 }
  0x1f   : > { %4239 = vmatprep.subr.bf16.mxu1 %v4783_v1  ;;  %v4798_v4 = vld [vmem:[%s4789_s29 + $0x160] sm:$0xff]  ;;  %v4801_v5 = vld [vmem:[%s4789_s29 + $0x168] sm:$0xff]  ;;  %v568_v8 = vsel %vm483_vm0, %v4792_v2, 0.0  ;;  %v575_v10 = vsel %vm483_vm0, %v4795_v3, 0.0  ;;  %v775_v11 = vpack.c.bf16 %v4795_v3, %v4792_v2  ;;  %v4839_v23 = vld [vmem:[%s4789_s29 + $0x138] sm:$0xff]  ;;  %v582_v30 = vsel %vm483_vm0, %v4830_v18, 0.0 }
  0x20   : > { %v4804_v6 = vld [vmem:[%s4789_s29 + $0x1a0] sm:$0xff]  ;;  %v4807_v7 = vld [vmem:[%s4789_s29 + $0x1a8] sm:$0xff]  ;;  %v569_v9 = vsel %vm483_vm0, %v4798_v4, 0.0  ;;  %v576_v16 = vsel %vm483_vm0, %v4801_v5, 0.0  ;;  %v4842_v24 = vld [vmem:[%s4789_s29 + $0x170] sm:$0xff]  ;;  %v589_v32 = vsel %vm483_vm0, %v4839_v23, 0.0 }
  0x21   : > { %v4818_v12 = vld [vmem:[%s4789_s29 + $0x1e0] sm:$0xff]  ;;  %v4821_v13 = vld [vmem:[%s4789_s29 + $0x1e8] sm:$0xff]  ;;  %v570_v14 = vadd.f32 %v569_v9, %v568_v8  ;;  %v571_v15 = vsel %vm483_vm0, %v4804_v6, 0.0  ;;  %v578_v17 = vsel %vm483_vm0, %v4807_v7, 0.0  ;;  %v577_v20 = vadd.f32 %v576_v16, %v575_v10  ;;  %v4845_v25 = vld [vmem:[%s4789_s29 + $0x178] sm:$0xff]  ;;  %s6363_s28 = scalar_lea.vmem [#allocation2], %s3882_s26 }
  0x22   : > { %v573_v19 = vsel %vm483_vm0, %v4818_v12, 0.0  ;;  %v580_v21 = vsel %vm483_vm0, %v4821_v13, 0.0  ;;  %v4848_v27 = vld [vmem:[%s4789_s29 + $0x1b0] sm:$0xff]  ;;  %v4851_v28 = vld [vmem:[%s4789_s29 + $0x1b8] sm:$0xff]  ;;  %v583_v31 = vsel %vm483_vm0, %v4842_v24, 0.0  ;;  %v590_v39 = vsel %vm483_vm0, %v4845_v25, 0.0 }
  0x23   : > { %v572_v26 = vadd.f32 %v571_v15, %v570_v14  ;;  %v4854_v29 = vld [vmem:[%s4789_s29 + $0x1f0] sm:$0xff]  ;;  %v579_v33 = vadd.f32 %v578_v17, %v577_v20  ;;  %v4863_v34 = vld [vmem:[%s4789_s29 + $0x1f8] sm:$0xff]  ;;  %v584_v35 = vadd.f32 %v583_v31, %v582_v30  ;;  %v585_v36 = vsel %vm483_vm0, %v4848_v27, 0.0  ;;  %v423_v49 = vld [vmem:[%s4789_s29 + $0x20] sm:$0xff]  ;;  %s3816_s15 = sshll.u32 %s6363_s28, 4  ;;  %s4660_s26 = smov [#allocation2]   ;;  %s6434_s15 = int_to_ptr.vmem [resolvable:$true] %s3816_s15 }
  0x24   : > { %v587_v38 = vsel %vm483_vm0, %v4854_v29, 0.0  ;;  %v592_v40 = vsel %vm483_vm0, %v4851_v28, 0.0  ;;  %v591_v43 = vadd.f32 %v590_v39, %v589_v32  ;;  %v594_v45 = vsel %vm483_vm0, %v4863_v34, 0.0  ;;  %v4877_v53 = vld [vmem:[%s4789_s29] sm:$0xff]  ;;  %v4880_v54 = vld [vmem:[%s4789_s29 + $0x8] sm:$0xff]  ;;  %v4900_v10 = vld [vmem:[%s4789_s29 + $0x10] sm:$0xff] }
  0x25   : > { %v574_v37 = vadd.f32 %v573_v19, %v572_v26  ;;  %v581_v41 = vadd.f32 %v580_v21, %v579_v33  ;;  %v586_v42 = vadd.f32 %v585_v36, %v584_v35  ;;  %v424_v55 = vld [vmem:[%s4789_s29 + $0x28] sm:$0xff]  ;;  %v512_v56 = vsel %vm483_vm0, %v423_v49, 0.0  ;;  %v431_v58 = vld [vmem:[%s4789_s29 + $0x60] sm:$0xff]  ;;  %v4903_v14 = vld [vmem:[%s4789_s29 + $0x18] sm:$0xff]  ;;  %s4599_s16 = sshll.u32 %s4660_s26, 4  ;;  %s4600_s16 = int_to_ptr.vmem [resolvable:$false] %s4599_s16 }
  0x26   : > { %v593_v48 = vadd.f32 %v592_v40, %v591_v43  ;;  %v519_v57 = vsel %vm483_vm0, %v424_v55, 0.0  ;;  %v432_v60 = vld [vmem:[%s4789_s29 + $0x68] sm:$0xff]  ;;  %v513_v61 = vsel %vm483_vm0, %v431_v58, 0.0  ;;  %v757_v62 = vpack.c.bf16 %v4880_v54, %v4877_v53  ;;  %v4915_v19 = vld [vmem:[%s4789_s29 + $0x38] sm:$0xff]  ;;  %v4918_v20 = vld [vmem:[%s4789_s29 + $0x40] sm:$0xff]  ;;  %p4602_p0 = scmp.lt.s32.totalorder %s6434_s15, %s4600_s16 }
  0x27   : > { %v609_v44 = vmul.f32 0.25, %v574_v37  ;;  %v610_v46 = vmul.f32 0.25, %v581_v41  ;;  %v588_v47 = vadd.f32 %v587_v38, %v586_v42  ;;  %v4891_v63 = vadd.f32 %v513_v61, %v512_v56  ;;  %v4921_v21 = vld [vmem:[%s4789_s29 + $0x48] sm:$0xff]  ;;  %v429_v37 = vld [vmem:[%s4789_s29 + $0x50] sm:$0xff]  ;;  %v430_v38 = vld [vmem:[%s4789_s29 + $0x58] sm:$0xff] }
  0x28   : > { %v595_v51 = vadd.f32 %v594_v45, %v593_v48  ;;  %v520_v0 = vsel %vm483_vm0, %v432_v60, 0.0  ;;  %v758_v15 = vpack.c.bf16 %v4903_v14, %v4900_v10  ;;  %v759_v16 = vpack.c.bf16 %v424_v55, %v423_v49  ;;  %v433_v41 = vld [vmem:[%s4789_s29 + $0x70] sm:$0xff]  ;;  %v434_v42 = vld [vmem:[%s4789_s29 + $0x78] sm:$0xff]  ;;  %v4946_v43 = vld [vmem:[%s4789_s29 + $0x80] sm:$0xff] }
  0x29   : > { %v619_v50 = vpack.c.bf16 %v610_v46, %v609_v44  ;;  %v611_v52 = vmul.f32 0.25, %v588_v47  ;;  %v4894_v9 = vadd.f32 %v520_v0, %v519_v57  ;;  %v776_v17 = vpack.c.bf16 %v4839_v23, %v4830_v18  ;;  %v4949_v44 = vld [vmem:[%s4789_s29 + $0x88] sm:$0xff]  ;;  %v437_v47 = vld [vmem:[%s4789_s29 + $0x90] sm:$0xff]  ;;  %v438_v48 = vld [vmem:[%s4789_s29 + $0x98] sm:$0xff] }
  0x2a   : > { %v612_v59 = vmul.f32 0.25, %v595_v51  ;;  %v779_v26 = vpack.c.bf16 %v4801_v5, %v4798_v4  ;;  %v761_v32 = vpack.c.bf16 %v4921_v21, %v4918_v20  ;;  %v762_v39 = vpack.c.bf16 %v430_v38, %v429_v37  ;;  %v439_v49 = vld [vmem:[%s4789_s29 + $0xa0] sm:$0xff]  ;;  %v4965_v55 = vld [vmem:[%s4789_s29 + $0xb0] sm:$0xff]  ;;  %v4968_v56 = vld [vmem:[%s4789_s29 + $0xb8] sm:$0xff] }
  0x2b   : > { %4235 = vmatprep.mubr.msk.bf16.mxu1 %vm483_vm0, %v619_v50  ;;  %v763_v40 = vpack.c.bf16 %v432_v60, %v431_v58  ;;  %v764_v45 = vpack.c.bf16 %v434_v42, %v433_v41  ;;  %v765_v46 = vpack.c.bf16 %v4949_v44, %v4946_v43  ;;  %v4959_v50 = vld [vmem:[%s4789_s29 + $0xa8] sm:$0xff]  ;;  %v766_v51 = vpack.c.bf16 %v438_v48, %v437_v47  ;;  %v4971_v57 = vld [vmem:[%s4789_s29 + $0xc0] sm:$0xff]  ;;  %v445_v61 = vld [vmem:[%s4789_s29 + $0xd0] sm:$0xff] }
  0x2c   : > { %v620_v8 = vpack.c.bf16 %v612_v59, %v611_v52  ;;  %v767_v52 = vpack.c.bf16 %v4959_v50, %v439_v49  ;;  %v4974_v58 = vld [vmem:[%s4789_s29 + $0xc8] sm:$0xff]  ;;  %v768_v59 = vpack.c.bf16 %v4968_v56, %v4965_v55  ;;  %v4985_v0 = vld [vmem:[%s4789_s29 + $0xe0] sm:$0xff]  ;;  %v506_v36 = vsel %vm483_vm0, %v430_v38, 0.0 }
  0x2d   : > { %v769_v60 = vpack.c.bf16 %v4974_v58, %v4971_v57  ;;  %v527_v2 = vsel %vm483_vm0, %v433_v41, 0.0  ;;  %v534_v3 = vsel %vm483_vm0, %v434_v42, 0.0  ;;  %v508_v35 = vsel %vm483_vm0, %v438_v48, 0.0  ;;  %v462_v41 = vld [vmem:[%s4789_s29 + $0x158] sm:$0xff] }
  0x2e   : > { %4236 = vmatmul.mubr.msk.bf16.vlgmr.msra.gmra.mxu1 %vm483_vm0, %v620_v8  ;;  %v4988_v8 = vld [vmem:[%s4789_s29 + $0xe8] sm:$0xff]  ;;  %v484_v42 = vsel %vm483_vm0, %v4877_v53, 0.0  ;;  %v491_v18 = vsel %vm483_vm0, %v4880_v54, 0.0  ;;  %v492_v48 = vsel %vm483_vm0, %v4921_v21, 0.0  ;;  %v487_v53 = vsel %vm483_vm0, %v4946_v43, 0.0 }
  0x2f   : > { %4240 = vmatpush3.bf16.msra.mxu1 %v4783_v1  ;;  %4241 = vmatprep.mubr.msk.bf16.mxu1 %vm483_vm0, %v757_v62  ;;  %v4912_v1 = vld [vmem:[%s4789_s29 + $0x30] sm:$0xff]  ;;  %v446_v62 = vld [vmem:[%s4789_s29 + $0xd8] sm:$0xff]  ;;  %v494_v54 = vsel %vm483_vm0, %v4949_v44, 0.0  ;;  %v529_v21 = vsel %vm483_vm0, %v4965_v55, 0.0  ;;  %v496_v43 = vsel %vm483_vm0, %v4974_v58, 0.0 }
  0x30   : > { %v760_v31 = vpack.c.bf16 %v4915_v19, %v4912_v1 }
  0x36   : > { %4242 = vmatmul.mubr.msk.bf16.vlgmr.msra.gmra.mxu1 %vm483_vm0, %v758_v15  ;;  %v770_v15 = vpack.c.bf16 %v446_v62, %v445_v61 }
  0x37   : > { %4245 = vmatprep.mubr.msk.bf16.mxu1 %vm483_vm0, %v759_v16  ;;  %v771_v16 = vpack.c.bf16 %v4988_v8, %v4985_v0 }
  0x3e   : > { %4246 = vmatmul.mubr.msk.bf16.gmra.mxu1 %vm483_vm0, %v760_v31  ;;  %v4995_v31 = vld [vmem:[%s4789_s29 + $0xf0] sm:$0xff] }
  0x3f   : > { %4249 = vmatprep.mubr.msk.bf16.mxu1 %vm483_vm0, %v761_v32  ;;  %v4998_v32 = vld [vmem:[%s4789_s29 + $0xf8] sm:$0xff] }
  0x46   : > { %4250 = vmatmul.mubr.msk.bf16.gmra.mxu1 %vm483_vm0, %v762_v39  ;;  %v5001_v39 = vld [vmem:[%s4789_s29 + $0x100] sm:$0xff] }
  0x47   : > { %4253 = vmatprep.mubr.msk.bf16.mxu1 %vm483_vm0, %v763_v40  ;;  %v5004_v40 = vld [vmem:[%s4789_s29 + $0x108] sm:$0xff] }
  0x4e   : > { %4254 = vmatmul.mubr.msk.bf16.gmra.mxu1 %vm483_vm0, %v764_v45  ;;  %v772_v45 = vpack.c.bf16 %v4998_v32, %v4995_v31 }
  0x4f   : > { %4257 = vmatprep.mubr.msk.bf16.mxu1 %vm483_vm0, %v765_v46  ;;  %v773_v46 = vpack.c.bf16 %v5004_v40, %v5001_v39 }
  0x56   : > { %4258 = vmatmul.mubr.msk.bf16.gmra.mxu1 %vm483_vm0, %v766_v51  ;;  %v5013_v51 = vld [vmem:[%s4789_s29 + $0x110] sm:$0xff] }
  0x57   : > { %4261 = vmatprep.mubr.msk.bf16.mxu1 %vm483_vm0, %v767_v52  ;;  %v5016_v52 = vld [vmem:[%s4789_s29 + $0x118] sm:$0xff] }
  0x5e   : > { %4262 = vmatmul.mubr.msk.bf16.gmra.mxu1 %vm483_vm0, %v768_v59  ;;  %v774_v59 = vpack.c.bf16 %v5016_v52, %v5013_v51 }
  0x5f   : > { %4265 = vmatprep.mubr.msk.bf16.mxu1 %vm483_vm0, %v769_v60  ;;  %v498_v60 = vsel %vm483_vm0, %v4900_v10, 0.0  ;;  %v526_v10 = vsel %vm483_vm0, %v4912_v1, 0.0  ;;  %v515_v1 = vsel %vm483_vm0, %v439_v49, 0.0  ;;  %v522_v49 = vsel %vm483_vm0, %v4959_v50, 0.0 }
  0x60   : > { %v528_v38 = vadd.f32 %v527_v2, %v526_v10  ;;  %v489_v50 = vsel %vm483_vm0, %v4971_v57, 0.0  ;;  %v516_v2 = vadd.f32 %v515_v1, %v4891_v63  ;;  %v523_v55 = vadd.f32 %v522_v49, %v4894_v9  ;;  %v468_v1 = vld [vmem:[%s4789_s29 + $0x188] sm:$0xff] }
  0x61   : > { %v547_v63 = vsel %vm483_vm0, %v5004_v40, 0.0  ;;  %v554_v9 = vsel %vm483_vm0, %v5013_v51, 0.0  ;;  %v524_v40 = vsel %vm483_vm0, %v4988_v8, 0.0  ;;  %v561_v51 = vsel %vm483_vm0, %v5016_v52, 0.0 }
  0x66   : > { %4266 = vmatmul.mubr.msk.bf16.gmra.mxu1 %vm483_vm0, %v770_v15  ;;  %v499_v15 = vsel %vm483_vm0, %v429_v37, 0.0  ;;  %v533_v37 = vsel %vm483_vm0, %v4915_v19, 0.0  ;;  %v461_v19 = vld [vmem:[%s4789_s29 + $0x150] sm:$0xff] }
  0x67   : > { %4269 = vmatprep.mubr.msk.bf16.mxu1 %vm483_vm0, %v771_v16  ;;  %v459_v16 = vld [vmem:[%s4789_s29 + $0x140] sm:$0xff]  ;;  %v535_v33 = vadd.f32 %v534_v3, %v533_v37  ;;  %v536_v37 = vsel %vm483_vm0, %v4968_v56, 0.0  ;;  %v530_v3 = vadd.f32 %v529_v21, %v528_v38  ;;  %v555_v5 = vsel %vm483_vm0, %v461_v19, 0.0 }
  0x68   : > { %v541_v38 = vsel %vm483_vm0, %v459_v16, 0.0 }
  0x6e   : > { %4270 = vmatmul.mubr.msk.bf16.gmra.mxu1 %vm483_vm0, %v772_v45  ;;  %v5030_v45 = vld [vmem:[%s4789_s29 + $0x148] sm:$0xff] }
  0x6f   : > { %4273 = vmatprep.mubr.msk.bf16.mxu1 %vm483_vm0, %v773_v46  ;;  %v505_v46 = vsel %vm483_vm0, %v4903_v14, 0.0  ;;  %v777_v22 = vpack.c.bf16 %v5030_v45, %v459_v16  ;;  %v548_v4 = vsel %vm483_vm0, %v5030_v45, 0.0  ;;  %v562_v16 = vsel %vm483_vm0, %v462_v41, 0.0 }
  0x70   : > { %v507_v14 = vadd.f32 %v506_v36, %v505_v46  ;;  %v3965_v36 = vld [vmem:[%s6485_s5 + $0x10] sm:$0xf]  ;;  %v531_v45 = vsel %vm483_vm0, %v4995_v31, 0.0  ;;  %v563_v8 = vadd.f32 %v562_v16, %v561_v51  ;;  %v6508_v31 = vpack.c.bf16 %v4845_v25, %v4842_v24  ;;  %v5182_v16 = vld [vmem:[%s6484_s4] ss:$0 sm:$0xff] }
  0x71   : > { %4525 = vmatprep.subr.msk.bf16.mxu1 %vm1358_vm1, %v3965_v36  ;;  %v532_v49 = vadd.f32 %v531_v45, %v530_v3 }
  0x72   : > { %v509_v23 = vadd.f32 %v508_v35, %v507_v14  ;;  %v503_v35 = vsel %vm483_vm0, %v445_v61, 0.0  ;;  %v540_v14 = vsel %vm483_vm0, %v5001_v39, 0.0  ;;  %v517_v39 = vsel %vm483_vm0, %v4985_v0, 0.0 }
  0x73   : > { %v549_v0 = vadd.f32 %v548_v4, %v547_v63  ;;  %v603_v25 = vmul.f32 0.25, %v532_v49 }
  0x76   : > { %4274 = vmatmul.mubr.msk.bf16.gmra.mxu1 %vm483_vm0, %v774_v59  ;;  %v500_v59 = vadd.f32 %v499_v15, %v498_v60  ;;  %v510_v60 = vsel %vm483_vm0, %v446_v62, 0.0  ;;  %v778_v15 = vpack.c.bf16 %v462_v41, %v461_v19  ;;  %v538_v19 = vsel %vm483_vm0, %v4998_v32, 0.0 }
  0x77   : > { %4277 = vmatprep.mubr.msk.bf16.mxu1 %vm483_vm0, %v775_v11  ;;  %v501_v11 = vsel %vm483_vm0, %v437_v47, 0.0  ;;  %v485_v47 = vsel %vm483_vm0, %v4918_v20, 0.0  ;;  %v493_v20 = vadd.f32 %v492_v48, %v491_v18  ;;  %v511_v62 = vadd.f32 %v510_v60, %v509_v23  ;;  %v469_v23 = vld [vmem:[%s4789_s29 + $0x190] sm:$0xff] }
  0x78   : > { %v502_v30 = vadd.f32 %v501_v11, %v500_v59  ;;  %v537_v11 = vadd.f32 %v536_v37, %v535_v33  ;;  %v467_v33 = vld [vmem:[%s4789_s29 + $0x180] sm:$0xff]  ;;  %v556_v18 = vadd.f32 %v555_v5, %v554_v9  ;;  %v518_v41 = vadd.f32 %v517_v39, %v516_v2 }
  0x79   : > { %v495_v10 = vadd.f32 %v494_v54, %v493_v20  ;;  %v543_v52 = vsel %vm483_vm0, %v467_v33, 0.0  ;;  %v550_v32 = vsel %vm483_vm0, %v468_v1, 0.0  ;;  %v557_v48 = vsel %vm483_vm0, %v469_v23, 0.0  ;;  %v5167_v39 = vld [vmem:[%s6485_s5] sm:$0xf] }
  0x7a   : > { %v504_v61 = vadd.f32 %v503_v35, %v502_v30  ;;  %v600_v30 = vmul.f32 0.25, %v511_v62  ;;  %v601_v54 = vmul.f32 0.25, %v518_v41  ;;  %v478_v62 = vld [vmem:[%s4789_s29 + $0x1d8] sm:$0xff]  ;;  %v6510_v5 = vpack.c.bf16 %v4851_v28, %v4848_v27 }
  0x7b   : > { %v497_v59 = vadd.f32 %v496_v43, %v495_v10  ;;  %v476_v10 = vld [vmem:[%s4789_s29 + $0x1c8] sm:$0xff]  ;;  %v566_v3 = vsel %vm483_vm0, %v478_v62, 0.0  ;;  %v6512_v27 = vpack.c.bf16 %v4863_v34, %v4854_v29  ;;  %v3983_v28 = vld [vmem:[%s6485_s5 + $0x18] sm:$0xf] }
  0x7c   : > { %v599_v58 = vmul.f32 0.25, %v504_v61  ;;  %v477_v61 = vld [vmem:[%s4789_s29 + $0x1d0] sm:$0xff]  ;;  %v2290_v49 = vsel %vm1358_vm1, %v3983_v28, 0 }
  0x7d   : > { %v598_v56 = vmul.f32 0.25, %v497_v59  ;;  %v552_v59 = vsel %vm483_vm0, %v476_v10, 0.0 }
  0x7e   : > { %4278 = vmatmul.mubr.msk.bf16.gmra.mxu1 %vm483_vm0, %v776_v17  ;;  %v1982_v17 = vsel %vm1358_vm1, %v3965_v36, 0  ;;  %v614_v36 = vpack.c.bf16 %v600_v30, %v599_v58  ;;  %v6509_v30 = vpack.c.bf16 %v4807_v7, %v4804_v6  ;;  %v3930_v6 = vld [vmem:[%s6485_s5 + $0x4] sm:$0xf] }
  0x7f   : > { %4281 = vmatprep.mubr.msk.bf16.mxu1 %vm483_vm0, %v777_v22  ;;  %v486_v22 = vadd.f32 %v485_v47, %v484_v42  ;;  %4378 = vmatpush3.bf16.msra.mxu1 %v1982_v17  ;;  %v781_v42 = vpack.c.bf16 %v468_v1, %v467_v33  ;;  %v542_v47 = vadd.f32 %v541_v38, %v540_v14  ;;  %v1360_v7 = vsel %vm1358_vm1, %v3930_v6, 0 }
  0x80   : > { %v525_v17 = vadd.f32 %v524_v40, %v523_v55  ;;  %v559_v55 = vsel %vm483_vm0, %v477_v61, 0.0  ;;  %4521 = vmatprep.subr.msk.bf16.mxu0 %vm1358_vm1, %v3930_v6  ;;  %4527 = vmatprep.subr.msk.bf16.mxu1 %vm1358_vm1, %v3983_v28 }
  0x81   : > { %v488_v46 = vadd.f32 %v487_v53, %v486_v22  ;;  %v470_v22 = vld [vmem:[%s4789_s29 + $0x198] sm:$0xff]  ;;  %v539_v53 = vadd.f32 %v538_v19, %v537_v11  ;;  %v544_v24 = vadd.f32 %v543_v52, %v542_v47 }
  0x82   : > { %v564_v20 = vsel %vm483_vm0, %v470_v22, 0.0  ;;  %v602_v35 = vmul.f32 0.25, %v525_v17  ;;  %v782_v21 = vpack.c.bf16 %v470_v22, %v469_v23 }
  0x83   : > { %v490_v44 = vadd.f32 %v489_v50, %v488_v46  ;;  %v604_v60 = vmul.f32 0.25, %v539_v53  ;;  %v558_v46 = vadd.f32 %v557_v48, %v556_v18  ;;  %v475_v50 = vld [vmem:[%s4789_s29 + $0x1c0] sm:$0xff]  ;;  %v565_v37 = vadd.f32 %v564_v20, %v563_v8  ;;  %s4074_s29 = sshll.u32 %s4749_s25, 10  ;;  %s4595_s25 = scalar_lea.vmem %s6434_s15, 1024 }
  0x84   : > { %v615_v43 = vpack.c.bf16 %v602_v35, %v601_v54  ;;  %v785_v4 = vpack.c.bf16 %v476_v10, %v475_v50  ;;  %v5195_v54 = vld [vmem:[%s6485_s5 + $0x20] sm:$0xf]  ;;  %s6432_s18 = scalar_lea.hbm %s6492_s12, %s4074_s29  ;;  %p4596_p11 = scmp.ne.s32.totalorder %s6434_s15, %s4595_s25 }
  0x85   : > { %v597_v57 = vmul.f32 0.25, %v490_v44  ;;  %v545_v44 = vsel %vm483_vm0, %v475_v50, 0.0  ;;  %v616_v2 = vpack.c.bf16 %v604_v60, %v603_v25  ;;  %v567_v58 = vadd.f32 %v566_v3, %v565_v37  ;;  %s4601_s29 = scalar_lea.vmem %s4600_s16, 2048 }
  0x86   : > { %4282 = vmatmul.mubr.msk.bf16.gmra.mxu1 %vm483_vm0, %v778_v15  ;;  %v551_v15 = vadd.f32 %v550_v32, %v549_v0  ;;  %p4597_p12 = pnand %p4596_p11, %p4766_p5  ;;  %p4603_p1 = scmp.lt.s32.totalorder %s4601_s29, %s4595_s25 }
  0x87   : > { %4285 = vmatprep.mubr.msk.bf16.mxu1 %vm483_vm0, %v779_v26  ;;  %v613_v26 = vpack.c.bf16 %v598_v56, %v597_v57  ;;  %v546_v57 = vadd.f32 %v545_v44, %v544_v24  ;;  %v560_v56 = vadd.f32 %v559_v55, %v558_v46  ;;  %v608_v38 = vmul.f32 0.25, %v567_v58 }
  0x88   : > { %v553_v11 = vadd.f32 %v552_v59, %v551_v15  ;;  %p4598_p13 = pneg %p4597_p12  ;;  %p4604_p2 = por %p4603_p1, %p4602_p0 }
  0x89   : > { %4223 = vmatprep.mubr.msk.bf16.mxu0 %vm483_vm0, %v613_v26  ;;  %v605_v14 = vmul.f32 0.25, %v546_v57  ;;  %v607_v9 = vmul.f32 0.25, %v560_v56  ;;  %v786_v26 = vpack.c.bf16 %v478_v62, %v477_v61 }
  0x8a   : > { %4224 = vmatmul.mubr.msk.bf16.vlgmr.msra.gmra.mxu0 %vm483_vm0, %v614_v36  ;;  %v606_v63 = vmul.f32 0.25, %v553_v11  ;;  %v6511_v36 = vpack.c.bf16 %v4821_v13, %v4818_v12  ;;  %p4605_p3 = pnand %p4604_p2, %p4598_p13 }
  0x8b   : > { %4227 = vmatprep.mubr.msk.bf16.mxu0 %vm483_vm0, %v615_v43  ;;  %v618_v1 = vpack.c.bf16 %v608_v38, %v607_v9  ;;  %4306 = vmatpush3.bf16.msra.mxu0 %v1360_v7 }
  0x8c   : > { %v617_v33 = vpack.c.bf16 %v606_v63, %v605_v14  ;;  %4522 = vmatprep.subr.msk.bf16.mxu0 %vm1358_vm1, %v5167_v39 }
  0x8e   : > { %4286 = vmatmul.mubr.msk.bf16.gmra.mxu1 %vm483_vm0, %v6508_v31 }
  0x8f   : > { %4289 = vmatprep.mubr.msk.bf16.mxu1 %vm483_vm0, %v781_v42 }
  0x92   : > { %4228 = vmatmul.mubr.msk.bf16.gmra.mxu0 %vm483_vm0, %v616_v2 }
  0x93   : > { %4231 = vmatprep.mubr.msk.bf16.mxu0 %vm483_vm0, %v617_v33 }
  0x96   : > { %4290 = vmatmul.mubr.msk.bf16.gmra.mxu1 %vm483_vm0, %v782_v21 }
  0x97   : > { %4293 = vmatprep.mubr.msk.bf16.mxu1 %vm483_vm0, %v6509_v30 }
  0x9a   : > { %4232 = vmatmul.mubr.msk.bf16.gmra.mxu0 %vm483_vm0, %v618_v1 }
  0x9e   : > { %4294 = vmatmul.mubr.msk.bf16.gmra.mxu1 %vm483_vm0, %v6510_v5 }
  0x9f   : > { %4297 = vmatprep.mubr.msk.bf16.mxu1 %vm483_vm0, %v785_v4 }
  0xa6   : > { %4298 = vmatmul.mubr.msk.bf16.gmra.mxu1 %vm483_vm0, %v786_v26 }
  0xa7   : > { %4301 = vmatprep.mubr.msk.bf16.mxu1 %vm483_vm0, %v6511_v36 }
  0xae   : > { %4302 = vmatmul.mubr.msk.bf16.gmra.mxu1 %vm483_vm0, %v6512_v27  ;;  %vm3418_vm0 = vcmask 786112  }
  0xee   : > { %v5171_v12 = vpop.f32.mrf.mxu1 }
  0xef   : > { %6513 = vst [vmem:[#allocation5_spill] sm:$0xff] %v5171_v12 }
  0xf0   : > { %v5173_v13 = vpop.f32.mrf.mxu1 }
  0xf1   : > { %6514 = vst [vmem:[#allocation6_spill] sm:$0xff] %v5173_v13 }
  0xf2   : > { %v5175_v29 = vpop.f32.mrf.mxu1 }
  0xf3   : > { %6515 = vst [vmem:[#allocation7_spill] sm:$0xff] %v5175_v29 }
  0xf4   : > { %v5177_v34 = vpop.f32.mrf.mxu1 }
  0xf5   : > { %6516 = vst [vmem:[#allocation8_spill] sm:$0xff] %v5177_v34 }
  0xf6   : > { %v4243_v40 = vpop.f32.mrf.mxu1 }
  0xf7   : > { %v943_v47 = vadd.f32 %v4243_v40, %v5182_v16 }
  0xf8   : > { %v934_v51 = vpop.f32.mrf.mxu1 }
  0xf9   : > { %v935_v19 = vadd.f32 %v5182_v16, %v934_v51  ;;  %v1191_v17 = vmax.f32 %v943_v47, 0.0 }
  0xfa   : > { %v4244_v45 = vpop.f32.mrf.mxu1 }
  0xfb   : > { %v946_v42 = vadd.f32 %v4244_v45, %v5182_v16  ;;  %v1189_v23 = vmax.f32 %v935_v19, 0.0 }
  0xfc   : > { %v937_v0 = vpop.f32.mrf.mxu1 }
  0xfd   : > { %v938_v18 = vadd.f32 %v5182_v16, %v937_v0  ;;  %v1192_v8 = vmax.f32 %v946_v42, 0.0 }
  0xfe   : > { %v4247_v52 = vpop.f32.mrf.mxu1 }
  0xff   : > { %v1190_v41 = vmax.f32 %v938_v18, 0.0  ;;  %v1948_v22 = vpack.c.bf16 %v1192_v8, %v1191_v17  ;;  %v959_v35 = vadd.f32 %v4247_v52, %v5182_v16 }
 0x100   : > { %v950_v31 = vpop.f32.mrf.mxu1 }
 0x101   : > { %v1947_v32 = vpack.c.bf16 %v1190_v41, %v1189_v23  ;;  %v951_v53 = vadd.f32 %v5182_v16, %v950_v31  ;;  %v1195_v10 = vmax.f32 %v959_v35, 0.0 }
 0x102   : > { %v4248_v48 = vpop.f32.mrf.mxu1 }
 0x103   : > { %v962_v20 = vadd.f32 %v4248_v48, %v5182_v16  ;;  %4379 = vmatprep.mubr.msk.bf16.mxu1 %vm1333_vm2, %v1947_v32  ;;  %v1193_v46 = vmax.f32 %v951_v53, 0.0 }
 0x104   : > { %v953_v24 = vpop.f32.mrf.mxu1  ;;  %4380 = vmatmul.mubr.msk.bf16.vlgmr.msra.gmra.mxu1 %vm1333_vm2, %v1948_v22 }
 0x105   : > { %v954_v25 = vadd.f32 %v5182_v16, %v953_v24  ;;  %4414 = vmatpush3.bf16.msra.mxu1 %v2290_v49  ;;  %v1196_v60 = vmax.f32 %v962_v20, 0.0 }
 0x106   : > { %v4251_v15 = vpop.f32.mrf.mxu1  ;;  %4529 = vmatprep.subr.msk.bf16.mxu1 %vm1358_vm1, %v5195_v54 }
 0x107   : > { %v1194_v21 = vmax.f32 %v954_v25, 0.0  ;;  %v975_v50 = vadd.f32 %v4251_v15, %v5182_v16  ;;  %v1950_v61 = vpack.c.bf16 %v1196_v60, %v1195_v10 }
 0x108   : > { %v966_v43 = vpop.f32.mrf.mxu1 }
 0x109   : > { %v1949_v37 = vpack.c.bf16 %v1194_v21, %v1193_v46  ;;  %v1199_v44 = vmax.f32 %v975_v50, 0.0  ;;  %v967_v59 = vadd.f32 %v5182_v16, %v966_v43  ;;  %v6494_v43 = vmov 0.0  }
 0x10a   : > { %v4252_v62 = vpop.f32.mrf.mxu1 }
 0x10b   : > { %v1197_v2 = vmax.f32 %v967_v59, 0.0  ;;  %v978_v55 = vadd.f32 %v4252_v62, %v5182_v16  ;;  %4383 = vmatprep.mubr.msk.bf16.mxu1 %vm1333_vm2, %v1949_v37  ;;  %v1751_v3 = vrot.slane %v1199_v44, 7 }
 0x10c   : > { %v969_v57 = vpop.f32.mrf.mxu1  ;;  %4384 = vmatmul.mubr.msk.bf16.gmra.mxu1 %vm1333_vm2, %v1950_v61 }
 0x10d   : > { %v1200_v11 = vmax.f32 %v978_v55, 0.0  ;;  %v970_v56 = vadd.f32 %v5182_v16, %v969_v57  ;;  %v1749_v30 = vrot.slane %v1197_v2, 7  ;;  %v5211_v38 = vsel %vm1298_vm3, 0.0, %v1751_v3 }
 0x10e   : > { %v4255_v58 = vpop.f32.mrf.mxu1  ;;  %v1484_v3 = vsel %vm1358_vm1, %v5167_v39, 0 }
 0x10f   : > { %v1752_v14 = vrot.slane %v1200_v11, 7  ;;  %v5208_v63 = vpack.c.bf16 %v1200_v11, %v1199_v44  ;;  %v1198_v9 = vmax.f32 %v970_v56, 0.0  ;;  %v991_v33 = vadd.f32 %v4255_v58, %v5182_v16 }
 0x110   : > { %v982_v1 = vpop.f32.mrf.mxu1  ;;  %v5223_v28 = vsel %vm1298_vm3, 0.0, %v1749_v30 }
 0x111   : > { %v5215_v4 = vsel %vm1298_vm3, 0.0, %v1752_v14  ;;  %v1750_v5 = vrot.slane %v1198_v9, 7  ;;  %v5217_v6 = vpack.c.bf16 %v1198_v9, %v1197_v2  ;;  %v983_v7 = vadd.f32 %v5182_v16, %v982_v1  ;;  %v5269_v14 = vld [vmem:[%s6485_s5 + $0x8] sm:$0xf] }
 0x112   : > { %v1203_v36 = vmax.f32 %v991_v33, 0.0  ;;  %v4256_v27 = vpop.f32.mrf.mxu1 }
 0x113   : > { %v5226_v40 = vsel %vm1298_vm3, 0.0, %v1750_v5  ;;  %v1201_v51 = vmax.f32 %v983_v7, 0.0  ;;  %v994_v45 = vadd.f32 %v4256_v27, %v5182_v16 }
 0x114   : > { %v1755_v42 = vrot.slane %v1203_v36, 7  ;;  %v985_v47 = vpop.f32.mrf.mxu1 }
 0x115   : > { %v1204_v0 = vmax.f32 %v994_v45, 0.0  ;;  %v986_v18 = vadd.f32 %v5182_v16, %v985_v47  ;;  %v1753_v52 = vrot.slane %v1201_v51, 7 }
 0x116   : > { %v4259_v8 = vpop.f32.mrf.mxu1  ;;  %v5235_v31 = vsel %vm1298_vm3, 0.0, %v1755_v42 }
 0x117   : > { %v1756_v23 = vrot.slane %v1204_v0, 7  ;;  %v5232_v41 = vpack.c.bf16 %v1204_v0, %v1203_v36  ;;  %v1202_v17 = vmax.f32 %v986_v18, 0.0  ;;  %v1007_v32 = vadd.f32 %v4259_v8, %v5182_v16 }
 0x118   : > { %v998_v22 = vpop.f32.mrf.mxu1  ;;  %v5247_v25 = vsel %vm1298_vm3, 0.0, %v1753_v52 }
 0x119   : > { %v5239_v48 = vsel %vm1298_vm3, 0.0, %v1756_v23  ;;  %v1754_v49 = vrot.slane %v1202_v17, 7  ;;  %v5241_v53 = vpack.c.bf16 %v1202_v17, %v1201_v51  ;;  %v999_v20 = vadd.f32 %v5182_v16, %v998_v22 }
 0x11a   : > { %v4260_v24 = vpop.f32.mrf.mxu1  ;;  %v1207_v10 = vmax.f32 %v1007_v32, 0.0 }
 0x11b   : > { %v5250_v60 = vsel %vm1298_vm3, 0.0, %v1754_v49  ;;  %v1205_v15 = vmax.f32 %v999_v20, 0.0  ;;  %v1010_v46 = vadd.f32 %v4260_v24, %v5182_v16 }
 0x11c   : > { %v1001_v50 = vpop.f32.mrf.mxu1 }
 0x11d   : > { %v1323_v37 = vpack.c.bf16 %v1205_v15, %v6494_v43  ;;  %v1208_v44 = vmax.f32 %v1010_v46, 0.0  ;;  %v1002_v59 = vadd.f32 %v5182_v16, %v1001_v50 }
 0x11e   : > { %v4263_v61 = vpop.f32.mrf.mxu1 }
 0x11f   : > { %v5257_v62 = vpack.c.bf16 %v1208_v44, %v1207_v10  ;;  %v1206_v2 = vmax.f32 %v1002_v59, 0.0  ;;  %4307 = vmatprep.mubr.msk.bf16.mxu0 %vm1333_vm2, %v1323_v37  ;;  %v1023_v56 = vadd.f32 %v4263_v61, %v5182_v16 }
 0x120   : > { %v1014_v55 = vpop.f32.mrf.mxu1 }
 0x121   : > { %v1324_v57 = vpack.c.bf16 %v1207_v10, %v1206_v2  ;;  %v5262_v11 = vpack.c.bf16 %v1206_v2, %v1205_v15  ;;  %v1015_v58 = vadd.f32 %v5182_v16, %v1014_v55  ;;  %v1211_v39 = vmax.f32 %v1023_v56, 0.0 }
 0x122   : > { %v4264_v30 = vpop.f32.mrf.mxu1 }
 0x123   : > { %v1209_v9 = vmax.f32 %v1015_v58, 0.0  ;;  %v1026_v33 = vadd.f32 %v4264_v30, %v5182_v16  ;;  %4308 = vmatmul.mubr.msk.bf16.vlgmr.msra.gmra.mxu0 %vm1333_vm2, %v1324_v57 }
 0x124   : > { %v1017_v1 = vpop.f32.mrf.mxu1  ;;  %4324 = vmatpush3.bf16.msra.mxu0 %v1484_v3 }
 0x125   : > { %v1325_v5 = vpack.c.bf16 %v1209_v9, %v1208_v44  ;;  %v1212_v7 = vmax.f32 %v1026_v33, 0.0  ;;  %v1018_v36 = vadd.f32 %v5182_v16, %v1017_v1  ;;  %4523 = vmatprep.subr.msk.bf16.mxu0 %vm1358_vm1, %v5269_v14 }
 0x126   : > { %v4267_v27 = vpop.f32.mrf.mxu1 }
 0x127   : > { %v5276_v51 = vpack.c.bf16 %v1212_v7, %v1211_v39  ;;  %v1210_v45 = vmax.f32 %v1018_v36, 0.0  ;;  %4311 = vmatprep.mubr.msk.bf16.mxu0 %vm1333_vm2, %v1325_v5  ;;  %v1039_v8 = vadd.f32 %v4267_v27, %v5182_v16 }
 0x128   : > { %v1030_v42 = vpop.f32.mrf.mxu1 }
 0x129   : > { %6517 = vst [vmem:[#allocation9_spill] sm:$0xff] %v5276_v51  ;;  %v1326_v47 = vpack.c.bf16 %v1211_v39, %v1210_v45  ;;  %v5279_v0 = vpack.c.bf16 %v1210_v45, %v1209_v9  ;;  %v5285_v22 = vmax.f32 %v1039_v8, 0.0  ;;  %v1031_v5 = vadd.f32 %v5182_v16, %v1030_v42 }
 0x12a   : > { %v4268_v18 = vpop.f32.mrf.mxu1 }
 0x12b   : > { %6518 = vst [vmem:[#allocation10_spill] sm:$0xff] %v5279_v0  ;;  %4312 = vmatmul.mubr.msk.bf16.gmra.mxu0 %vm1333_vm2, %v1326_v47  ;;  %v1042_v32 = vadd.f32 %v4268_v18, %v5182_v16 }
 0x12c   : > { %v1033_v52 = vpop.f32.mrf.mxu1 }
 0x12d   : > { %v1034_v23 = vadd.f32 %v5182_v16, %v1033_v52  ;;  %v5292_v50 = vmax.f32 %v1042_v32, 0.0  ;;  %v5311_v52 = vmax.f32 %v1031_v5, 0.0 }
 0x12e   : > { %v4271_v17 = vpop.f32.mrf.mxu1 }
 0x12f   : > { %v5287_v49 = vmax.f32 %v1034_v23, 0.0  ;;  %v1055_v37 = vadd.f32 %v4271_v17, %v5182_v16 }
 0x130   : > { %v1046_v20 = vpop.f32.mrf.mxu1 }
 0x131   : > { %v1047_v24 = vadd.f32 %v5182_v16, %v1046_v20  ;;  %v5300_v55 = vmax.f32 %v1055_v37, 0.0 }
 0x132   : > { %v4272_v46 = vpop.f32.mrf.mxu1 }
 0x133   : > { %v5294_v10 = vmax.f32 %v1047_v24, 0.0  ;;  %v1270_v24 = vrot.slane %v5287_v49, 7 }
 0x134   : > { %v1049_v44 = vpop.f32.mrf.mxu1 }
 0x135   : > { %v1050_v61 = vadd.f32 %v5182_v16, %v1049_v44 }
 0x136   : > { %v4275_v2 = vpop.f32.mrf.mxu1 }
 0x137   : > { %v5302_v3 = vmax.f32 %v1050_v61, 0.0  ;;  %v1071_v33 = vadd.f32 %v4275_v2, %v5182_v16  ;;  %v1269_v61 = vrot.slane %v5311_v52, 7 }
 0x138   : > { %v1062_v57 = vpop.f32.mrf.mxu1 }
 0x139   : > { %v1063_v30 = vadd.f32 %v5182_v16, %v1062_v57  ;;  %v1223_v47 = vmax.f32 %v1071_v33, 0.0  ;;  %v1271_v33 = vrot.slane %v5285_v22, 7 }
 0x13a   : > { %v4276_v58 = vpop.f32.mrf.mxu1 }
 0x13b   : > { %v1074_v9 = vadd.f32 %v4276_v58, %v5182_v16  ;;  %v1221_v27 = vmax.f32 %v1063_v30, 0.0 }
 0x13c   : > { %v1065_v1 = vpop.f32.mrf.mxu1 }
 0x13d   : > { %v1066_v39 = vadd.f32 %v5182_v16, %v1065_v1  ;;  %v1224_v7 = vmax.f32 %v1074_v9, 0.0  ;;  %v5324_v1 = vsel %vm1298_vm3, 0.0, %v1270_v24 }
 0x13e   : > { %v4279_v36 = vpop.f32.mrf.mxu1 }
 0x13f   : > { %v1222_v45 = vmax.f32 %v1066_v39, 0.0  ;;  %v1952_v23 = vpack.c.bf16 %v1224_v7, %v1223_v47  ;;  %v1087_v42 = vadd.f32 %v4279_v36, %v5182_v16  ;;  %v1272_v7 = vrot.slane %v5292_v50, 7 }
 0x140   : > { %v1078_v18 = vpop.f32.mrf.mxu1  ;;  %v5329_v47 = vsel %vm1298_vm3, 0.0, %v1269_v61 }
 0x141   : > { %v1951_v8 = vpack.c.bf16 %v1222_v45, %v1221_v27  ;;  %v1079_v32 = vadd.f32 %v5182_v16, %v1078_v18  ;;  %v1227_v39 = vmax.f32 %v1087_v42, 0.0  ;;  %v5332_v18 = vadd.f32 %v4272_v46, %v5182_v16 }
 0x142   : > { %v4280_v17 = vpop.f32.mrf.mxu1  ;;  %v2255_v24 = vpack.c.bf16 %v5324_v1, %v5329_v47  ;;  %v1273_v42 = vrot.slane %v5294_v10, 7  ;;  %v5342_v46 = vsel %vm1298_vm3, 0.0, %v1272_v7 }
 0x143   : > { %v1090_v20 = vadd.f32 %v4280_v17, %v5182_v16  ;;  %4387 = vmatprep.mubr.msk.bf16.mxu1 %vm1333_vm2, %v1951_v8  ;;  %v1225_v58 = vmax.f32 %v1079_v32, 0.0  ;;  %v1274_v8 = vrot.slane %v5302_v3, 7 }
 0x144   : > { %v1081_v37 = vpop.f32.mrf.mxu1  ;;  %4388 = vmatmul.mubr.msk.bf16.gmra.mxu1 %vm1333_vm2, %v1952_v23 }
 0x145   : > { %v1082_v44 = vadd.f32 %v5182_v16, %v1081_v37  ;;  %v1228_v2 = vmax.f32 %v1090_v20, 0.0 }
 0x146   : > { %v4283_v57 = vpop.f32.mrf.mxu1 }
 0x147   : > { %v1226_v30 = vmax.f32 %v1082_v44, 0.0  ;;  %v1103_v9 = vadd.f32 %v4283_v57, %v5182_v16  ;;  %v1954_v23 = vpack.c.bf16 %v1228_v2, %v1227_v39  ;;  %v5347_v57 = vsel %vm1298_vm3, 0.0, %v1271_v33 }
 0x148   : > { %v1094_v5 = vpop.f32.mrf.mxu1  ;;  %v2590_v39 = vsel %vm1358_vm1, %v5195_v54, 0  ;;  %v5360_v33 = vsel %vm1298_vm3, 0.0, %v1273_v42 }
 0x149   : > { %v1953_v36 = vpack.c.bf16 %v1226_v30, %v1225_v58  ;;  %v1231_v27 = vmax.f32 %v1103_v9, 0.0  ;;  %v1095_v45 = vadd.f32 %v5182_v16, %v1094_v5  ;;  %v6493_v58 = vmax.f32 %v5332_v18, 0.0 }
 0x14a   : > { %v4284_v17 = vpop.f32.mrf.mxu1  ;;  %v5351_v30 = vsel %vm1298_vm3, 0.0, %v1274_v8 }
 0x14b   : > { %v1229_v32 = vmax.f32 %v1095_v45, 0.0  ;;  %v1106_v20 = vadd.f32 %v4284_v17, %v5182_v16  ;;  %4391 = vmatprep.mubr.msk.bf16.mxu1 %vm1333_vm2, %v1953_v36  ;;  %v1759_v37 = vrot.slane %v1231_v27, 7 }
 0x14c   : > { %v1097_v44 = vpop.f32.mrf.mxu1  ;;  %4392 = vmatmul.mubr.msk.bf16.gmra.mxu1 %vm1333_vm2, %v1954_v23  ;;  %v2256_v23 = vpack.c.bf16 %v5342_v46, %v5347_v57 }
 0x14d   : > { %v1232_v61 = vmax.f32 %v1106_v20, 0.0  ;;  %v1098_v2 = vadd.f32 %v5182_v16, %v1097_v44  ;;  %4415 = vmatprep.mubr.msk.bf16.mxu1 %vm1333_vm2, %v2255_v24  ;;  %v1757_v5 = vrot.slane %v1229_v32, 7  ;;  %v5363_v17 = vsel %vm1298_vm3, 0.0, %v1759_v37 }
 0x14e   : > { %v4287_v9 = vpop.f32.mrf.mxu1 }
 0x14f   : > { %v1760_v7 = vrot.slane %v1232_v61, 7  ;;  %v5355_v36 = vpack.c.bf16 %v1232_v61, %v1231_v27  ;;  %v1230_v45 = vmax.f32 %v1098_v2, 0.0  ;;  %v1119_v8 = vadd.f32 %v4287_v9, %v5182_v16 }
 0x150   : > { %v1110_v20 = vpop.f32.mrf.mxu1  ;;  %v2249_v61 = vrot.slane %v6493_v58, 7  ;;  %v2257_v9 = vpack.c.bf16 %v5351_v30, %v5360_v33  ;;  %v5379_v35 = vsel %vm1298_vm3, 0.0, %v1757_v5 }
 0x151   : > { %v5367_v24 = vsel %vm1298_vm3, 0.0, %v1760_v7  ;;  %v1758_v54 = vrot.slane %v1230_v45, 7  ;;  %v5369_v44 = vpack.c.bf16 %v1230_v45, %v1229_v32  ;;  %v1111_v27 = vadd.f32 %v5182_v16, %v1110_v20 }
 0x152   : > { %v1235_v2 = vmax.f32 %v1119_v8, 0.0  ;;  %v4288_v37 = vpop.f32.mrf.mxu1  ;;  %v1275_v20 = vrot.slane %v5300_v55, 7  ;;  %v2253_v5 = vsel %vm1298_vm3, 0.0, %v2249_v61 }
 0x153   : > { %v5382_v7 = vsel %vm1298_vm3, 0.0, %v1758_v54  ;;  %v1233_v32 = vmax.f32 %v1111_v27, 0.0  ;;  %v1122_v45 = vadd.f32 %v4288_v37, %v5182_v16 }
 0x154   : > { %v1763_v42 = vrot.slane %v1235_v2, 7  ;;  %v1113_v8 = vpop.f32.mrf.mxu1  ;;  %4416 = vmatmul.mubr.msk.bf16.vlgmr.msra.gmra.mxu1 %vm1333_vm2, %v2256_v23  ;;  %v5396_v59 = vsel %vm1298_vm3, 0.0, %v1275_v20 }
 0x155   : > { %v1236_v26 = vmax.f32 %v1122_v45, 0.0  ;;  %v1114_v19 = vadd.f32 %v5182_v16, %v1113_v8  ;;  %4419 = vmatprep.mubr.msk.bf16.mxu1 %vm1333_vm2, %v2257_v9  ;;  %4450 = vmatpush3.bf16.msra.mxu1 %v2590_v39  ;;  %v1761_v27 = vrot.slane %v1233_v32, 7 }
 0x156   : > { %v4291_v54 = vpop.f32.mrf.mxu1  ;;  %4485 = vmatprep.subr.bf16.mxu1 %v6494_v43  ;;  %v5399_v23 = vsel %vm1298_vm3, 0.0, %v1763_v42 }
 0x157   : > { %v1764_v37 = vrot.slane %v1236_v26, 7  ;;  %v5393_v56 = vpack.c.bf16 %v1236_v26, %v1235_v2  ;;  %v1234_v21 = vmax.f32 %v1114_v19, 0.0  ;;  %v1135_v45 = vadd.f32 %v4291_v54, %v5182_v16 }
 0x158   : > { %v1126_v9 = vpop.f32.mrf.mxu1  ;;  %v2258_v26 = vpack.c.bf16 %v2253_v5, %v5396_v59  ;;  %v5412_v42 = vsel %vm1298_vm3, 0.0, %v1761_v27 }
 0x159   : > { %v5403_v39 = vsel %vm1298_vm3, 0.0, %v1764_v37  ;;  %v1762_v61 = vrot.slane %v1234_v21, 7  ;;  %v5405_v8 = vpack.c.bf16 %v1234_v21, %v1233_v32  ;;  %v1127_v15 = vadd.f32 %v5182_v16, %v1126_v9 }
 0x15a   : > { %v4292_v2 = vpop.f32.mrf.mxu1  ;;  %v1239_v5 = vmax.f32 %v1135_v45, 0.0 }
 0x15b   : > { %v5415_v20 = vsel %vm1298_vm3, 0.0, %v1762_v61  ;;  %v1237_v54 = vmax.f32 %v1127_v15, 0.0  ;;  %v1138_v37 = vadd.f32 %v4292_v2, %v5182_v16 }
 0x15c   : > { %v1129_v32 = vpop.f32.mrf.mxu1  ;;  %4420 = vmatmul.mubr.msk.bf16.gmra.mxu1 %vm1333_vm2, %v2258_v26 }
 0x15d   : > { %v1327_v9 = vpack.c.bf16 %v1237_v54, %v6494_v43  ;;  %v1240_v19 = vmax.f32 %v1138_v37, 0.0  ;;  %v1130_v58 = vadd.f32 %v5182_v16, %v1129_v32  ;;  %v1268_v32 = vrot.slane %v6494_v43, 7 }
 0x15e   : > { %v4295_v27 = vpop.f32.mrf.mxu1 }
 0x15f   : > { %v5423_v29 = vpack.c.bf16 %v1240_v19, %v1239_v5  ;;  %v1238_v61 = vmax.f32 %v1130_v58, 0.0  ;;  %4315 = vmatprep.mubr.msk.bf16.mxu0 %vm1333_vm2, %v1327_v9  ;;  %v1151_v21 = vadd.f32 %v4295_v27, %v5182_v16 }
 0x160   : > { %v1142_v15 = vpop.f32.mrf.mxu1 }
 0x161   : > { %6519 = vst [vmem:[#allocation11_spill] sm:$0xff] %v5423_v29  ;;  %v1328_v2 = vpack.c.bf16 %v1239_v5, %v1238_v61  ;;  %v5426_v34 = vpack.c.bf16 %v1238_v61, %v1237_v54  ;;  %v1143_v26 = vadd.f32 %v5182_v16, %v1142_v15  ;;  %v1243_v58 = vmax.f32 %v1151_v21, 0.0 }
 0x162   : > { %v4296_v45 = vpop.f32.mrf.mxu1 }
 0x163   : > { %6520 = vst [vmem:[#allocation12_spill] sm:$0xff] %v5426_v34  ;;  %v1241_v12 = vmax.f32 %v1143_v26, 0.0  ;;  %v1154_v37 = vadd.f32 %v4296_v45, %v5182_v16  ;;  %4316 = vmatmul.mubr.msk.bf16.gmra.mxu0 %vm1333_vm2, %v1328_v2  ;;  %v1299_v26 = vsel %vm1298_vm3, 0.0, %v1268_v32 }
 0x164   : > { %v1145_v13 = vpop.f32.mrf.mxu1 }
 0x165   : > { %v1329_v29 = vpack.c.bf16 %v1241_v12, %v1240_v19  ;;  %v1244_v9 = vmax.f32 %v1154_v37, 0.0  ;;  %v1146_v5 = vadd.f32 %v5182_v16, %v1145_v13  ;;  %v1314_v13 = vpack.c.bf16 %v5329_v47, %v1299_v26 }
 0x166   : > { %v4299_v54 = vpop.f32.mrf.mxu1 }
 0x167   : > { %v5434_v61 = vpack.c.bf16 %v1244_v9, %v1243_v58  ;;  %v1242_v27 = vmax.f32 %v1146_v5, 0.0  ;;  %v1167_v15 = vadd.f32 %v4299_v54, %v5182_v16  ;;  %4319 = vmatprep.mubr.msk.bf16.mxu0 %vm1333_vm2, %v1329_v29 }
 0x168   : > { %v1158_v45 = vpop.f32.mrf.mxu1 }
 0x169   : > { %6521 = vst [vmem:[#allocation13_spill] sm:$0xff] %v5434_v61  ;;  %v1330_v2 = vpack.c.bf16 %v1243_v58, %v1242_v27  ;;  %v5439_v34 = vpack.c.bf16 %v1242_v27, %v1241_v12  ;;  %v1159_v21 = vadd.f32 %v5182_v16, %v1158_v45  ;;  %v5442_v19 = vmax.f32 %v1167_v15, 0.0 }
 0x16a   : > { %v4300_v37 = vpop.f32.mrf.mxu1 }
 0x16b   : > { %6522 = vst [vmem:[#allocation14_spill] sm:$0xff] %v5439_v34  ;;  %v5445_v9 = vmax.f32 %v1159_v21, 0.0  ;;  %v1170_v5 = vadd.f32 %v4300_v37, %v5182_v16  ;;  %4320 = vmatmul.mubr.msk.bf16.gmra.mxu0 %vm1333_vm2, %v1330_v2  ;;  %v1278_v12 = vrot.slane %v5442_v19, 7  ;;  %v1315_v2 = vpack.c.bf16 %v5347_v57, %v5324_v1  ;;  %v3956_v1 = vld [vmem:[%s6485_s5 + $0xc] sm:$0xf] }
 0x16c   : > { %v1161_v29 = vpop.f32.mrf.mxu1  ;;  %4325 = vmatprep.mubr.msk.bf16.mxu0 %vm1333_vm2, %v1314_v13  ;;  %v1618_v13 = vsel %vm1358_vm1, %v5269_v14, 0 }
 0x16d   : > { %v5450_v32 = vmax.f32 %v1170_v5, 0.0  ;;  %v1162_v58 = vadd.f32 %v5182_v16, %v1161_v29  ;;  %v1276_v27 = vrot.slane %v5445_v9, 7  ;;  %v1316_v5 = vpack.c.bf16 %v5360_v33, %v5342_v46 }
 0x16e   : > { %v4303_v54 = vpop.f32.mrf.mxu1  ;;  %v1309_v29 = vsel %vm1298_vm3, 0.0, %v1278_v12 }
 0x16f   : > { %v1279_v47 = vrot.slane %v5450_v32, 7  ;;  %v1183_v15 = vadd.f32 %v4303_v54, %v5182_v16  ;;  %v5457_v45 = vmax.f32 %v1162_v58, 0.0  ;;  %v1307_v57 = vsel %vm1298_vm3, 0.0, %v1276_v27 }
 0x170   : > { %v1174_v21 = vpop.f32.mrf.mxu1 }
 0x171   : > { %v1175_v37 = vadd.f32 %v5182_v16, %v1174_v21  ;;  %v1310_v43 = vsel %vm1298_vm3, 0.0, %v1279_v47  ;;  %v1277_v54 = vrot.slane %v5457_v45, 7  ;;  %v5469_v58 = vmax.f32 %v1183_v15, 0.0 }
 0x172   : > { %v4304_v61 = vpop.f32.mrf.mxu1  ;;  %v2260_v47 = vpack.c.bf16 %v1310_v43, %v1309_v29 }
 0x173   : > { %v5475_v21 = vmax.f32 %v1175_v37, 0.0  ;;  %v1186_v14 = vadd.f32 %v4304_v61, %v5182_v16  ;;  %4326 = vmatmul.mubr.msk.bf16.vlgmr.msra.gmra.mxu0 %vm1333_vm2, %v1315_v2  ;;  %v1308_v46 = vsel %vm1298_vm3, 0.0, %v1277_v54  ;;  %v1282_v15 = vrot.slane %v5469_v58, 7 }
 0x174   : > { %4342 = vmatpush3.bf16.msra.mxu0 %v1618_v13  ;;  %v1177_v33 = vpop.f32.mrf.mxu1  ;;  %4329 = vmatprep.mubr.msk.bf16.mxu0 %vm1333_vm2, %v1316_v5  ;;  %v2259_v34 = vpack.c.bf16 %v1308_v46, %v1307_v57  ;;  %v1318_v2 = vpack.c.bf16 %v1307_v57, %v1299_v26  ;;  %v1317_v13 = vpack.c.bf16 %v5396_v59, %v5351_v30 }
 0x175   : > { %v1252_v12 = vmax.f32 %v1186_v14, 0.0  ;;  %4524 = vmatprep.subr.msk.bf16.mxu0 %vm1358_vm1, %v3956_v1  ;;  %v1280_v27 = vrot.slane %v5475_v21, 7  ;;  %v1178_v37 = vadd.f32 %v5182_v16, %v1177_v33  ;;  %v1313_v54 = vsel %vm1298_vm3, 0.0, %v1282_v15 }
 0x176   : > { %4423 = vmatprep.mubr.msk.bf16.mxu1 %vm1333_vm2, %v2259_v34  ;;  %v2555_v59 = vpack.c.bf16 %v5287_v49, %v5311_v52  ;;  %v1319_v30 = vpack.c.bf16 %v1309_v29, %v1308_v46  ;;  %v2557_v33 = vpack.c.bf16 %v5302_v3, %v5294_v10  ;;  %v6523_v15 = vmov 0.0  }
 0x177   : > { %v2250_v61 = vrot.slane %v1252_v12, 7  ;;  %v1250_v51 = vmax.f32 %v1178_v37, 0.0  ;;  %4424 = vmatmul.mubr.msk.bf16.gmra.mxu1 %vm1333_vm2, %v2260_v47  ;;  %v1311_v5 = vsel %vm1298_vm3, 0.0, %v1280_v27  ;;  %v1583_v27 = vpack.c.bf16 %v5311_v52, %v6523_v15  ;;  %v3974_v52 = vld [vmem:[%s6485_s5 + $0x14] sm:$0xf] }
 0x178   : > { %v1320_v57 = vpack.c.bf16 %v1311_v5, %v1310_v43  ;;  %v6524_v43 = vmax.f32 %v5332_v18, 0.0  ;;  %v2559_v46 = vpack.c.bf16 %v5457_v45, %v5445_v9  ;;  %v1832_v37 = vsel %vm1358_vm1, %v3956_v1, 0 }
 0x179   : > { %v2254_v14 = vsel %vm1298_vm3, 0.0, %v2250_v61  ;;  %v1281_v0 = vrot.slane %v1250_v51, 7  ;;  %v6525_v61 = vpack.c.bf16 %v5285_v22, %v5287_v49  ;;  %v6526_v18 = vpack.c.bf16 %v5294_v10, %v5292_v50 }
 0x17a   : > { %v2262_v34 = vpack.c.bf16 %v2254_v14, %v1313_v54  ;;  %v2558_v29 = vpack.c.bf16 %v6524_v43, %v5300_v55  ;;  %v2560_v1 = vpack.c.bf16 %v5450_v32, %v5442_v19  ;;  %v6527_v49 = vpack.c.bf16 %v5300_v55, %v5302_v3 }
 0x17b   : > { %4330 = vmatmul.mubr.msk.bf16.gmra.mxu0 %vm1333_vm2, %v1317_v13  ;;  %v1312_v16 = vsel %vm1298_vm3, 0.0, %v1281_v0  ;;  %v2556_v0 = vpack.c.bf16 %v5292_v50, %v5285_v22  ;;  %v1587_v22 = vpack.c.bf16 %v5445_v9, %v6523_v15  ;;  %v2562_v50 = vpack.c.bf16 %v1252_v12, %v5469_v58  ;;  %v3992_v9 = vld [vmem:[%s6485_s5 + $0x1c] sm:$0xf] }
 0x17c   : > { %4333 = vmatprep.mubr.msk.bf16.mxu0 %vm1333_vm2, %v1318_v2  ;;  %v2261_v26 = vpack.c.bf16 %v1312_v16, %v1311_v5  ;;  %v1321_v47 = vpack.c.bf16 %v1313_v54, %v1312_v16  ;;  %v2561_v2 = vpack.c.bf16 %v1250_v51, %v5475_v21  ;;  %v1588_v10 = vpack.c.bf16 %v5442_v19, %v5457_v45 }
 0x17d   : > { %v1589_v13 = vpack.c.bf16 %v5475_v21, %v5450_v32  ;;  %v1590_v55 = vpack.c.bf16 %v5469_v58, %v1250_v51  ;;  %v6528_v3 = vpack.c.bf16 %v5226_v40, %v5223_v28  ;;  %v2132_v19 = vsel %vm1358_vm1, %v3974_v52, 0 }
 0x17e   : > { %4427 = vmatprep.mubr.msk.bf16.mxu1 %vm1333_vm2, %v2261_v26  ;;  %v6529_v32 = vpack.c.bf16 %v5215_v4, %v5211_v38  ;;  %v6530_v51 = vpack.c.bf16 %v5250_v60, %v5247_v25  ;;  %v6531_v28 = vpack.c.bf16 %v5239_v48, %v5235_v31  ;;  %v6532_v40 = vpack.c.bf16 %v5382_v7, %v5379_v35  ;;  %v5598_v35 = vpop.f32.mrf.mxu0  ;;  %v6547_v7 = vld [vmem:[#allocation9_spill] sm:$0xff] }
 0x17f   : > { %4428 = vmatmul.mubr.msk.bf16.gmra.mxu1 %vm1333_vm2, %v2262_v34  ;;  %v6533_v38 = vpack.c.bf16 %v5367_v24, %v5363_v17  ;;  %v6534_v4 = vpack.c.bf16 %v5415_v20, %v5412_v42  ;;  %v6535_v31 = vpack.c.bf16 %v5403_v39, %v5399_v23  ;;  %v2440_v48 = vsel %vm1358_vm1, %v3992_v9, 0  ;;  %6536 = vst [vmem:[#allocation15_spill] sm:$0xff] %v5598_v35  ;;  %v6551_v39 = vld [vmem:[#allocation11_spill] sm:$0xff]  ;;  %v6553_v20 = vld [vmem:[#allocation13_spill] sm:$0xff] }
 0x180   : > { %4451 = vmatprep.mubr.msk.bf16.mxu1 %vm1333_vm2, %v2555_v59  ;;  %v5600_v25 = vpop.f32.mrf.mxu0  ;;  %v2752_v59 = vld [vmem:[%s6487_s7] sm:$0xf] }
 0x181   : > { %6537 = vst [vmem:[#allocation16_spill] sm:$0xff] %v5600_v25 }
 0x183   : > { %4334 = vmatmul.mubr.msk.bf16.gmra.mxu0 %vm1333_vm2, %v1319_v30 }
 0x184   : > { %4337 = vmatprep.mubr.msk.bf16.mxu0 %vm1333_vm2, %v1320_v57  ;;  %v2785_v57 = vsel %vm1358_vm1, %v2752_v59, 0 }
 0x187   : > { %4452 = vmatmul.mubr.msk.bf16.vlgmr.msra.gmra.mxu1 %vm1333_vm2, %v2556_v0 }
 0x188   : > { %4455 = vmatprep.mubr.msk.bf16.mxu1 %vm1333_vm2, %v2557_v33 }
 0x18b   : > { %4338 = vmatmul.mubr.msk.bf16.gmra.mxu0 %vm1333_vm2, %v1321_v47 }
 0x18c   : > { %4343 = vmatprep.mubr.msk.bf16.mxu0 %vm1333_vm2, %v1583_v27 }
 0x18f   : > { %4456 = vmatmul.mubr.msk.bf16.gmra.mxu1 %vm1333_vm2, %v2558_v29 }
 0x190   : > { %4459 = vmatprep.mubr.msk.bf16.mxu1 %vm1333_vm2, %v2559_v46 }
 0x193   : > { %4344 = vmatmul.mubr.msk.bf16.vlgmr.msra.gmra.mxu0 %vm1333_vm2, %v6525_v61 }
 0x194   : > { %4360 = vmatpush3.bf16.msra.mxu0 %v1832_v37  ;;  %4347 = vmatprep.mubr.msk.bf16.mxu0 %vm1333_vm2, %v6526_v18 }
 0x195   : > { %4526 = vmatprep.subr.msk.bf16.mxu0 %vm1358_vm1, %v3974_v52 }
 0x197   : > { %4460 = vmatmul.mubr.msk.bf16.gmra.mxu1 %vm1333_vm2, %v2560_v1 }
 0x198   : > { %4463 = vmatprep.mubr.msk.bf16.mxu1 %vm1333_vm2, %v2561_v2 }
 0x19b   : > { %4348 = vmatmul.mubr.msk.bf16.gmra.mxu0 %vm1333_vm2, %v6527_v49 }
 0x19c   : > { %4351 = vmatprep.mubr.msk.bf16.mxu0 %vm1333_vm2, %v1587_v22 }
 0x19f   : > { %4464 = vmatmul.mubr.msk.bf16.gmra.mxu1 %vm1333_vm2, %v2562_v50 }
 0x1a3   : > { %4352 = vmatmul.mubr.msk.bf16.gmra.mxu0 %vm1333_vm2, %v1588_v10 }
 0x1a4   : > { %4355 = vmatprep.mubr.msk.bf16.mxu0 %vm1333_vm2, %v1589_v13 }
 0x1ab   : > { %4356 = vmatmul.mubr.msk.bf16.gmra.mxu0 %vm1333_vm2, %v1590_v55 }
 0x1ac   : > { %4361 = vmatprep.mubr.msk.bf16.mxu0 %vm1333_vm2, %v6528_v3 }
 0x1b3   : > { %4362 = vmatmul.mubr.msk.bf16.vlgmr.msra.gmra.mxu0 %vm1333_vm2, %v6529_v32 }
 0x1b4   : > { %4396 = vmatpush3.bf16.msra.mxu0 %v2132_v19  ;;  %4365 = vmatprep.mubr.msk.bf16.mxu0 %vm1333_vm2, %v6530_v51 }
 0x1b5   : > { %4528 = vmatprep.subr.msk.bf16.mxu0 %vm1358_vm1, %v3992_v9 }
 0x1bb   : > { %4366 = vmatmul.mubr.msk.bf16.gmra.mxu0 %vm1333_vm2, %v6531_v28 }
 0x1bc   : > { %4369 = vmatprep.mubr.msk.bf16.mxu0 %vm1333_vm2, %v6532_v40 }
 0x1c3   : > { %4370 = vmatmul.mubr.msk.bf16.gmra.mxu0 %vm1333_vm2, %v6533_v38 }
 0x1c4   : > { %4373 = vmatprep.mubr.msk.bf16.mxu0 %vm1333_vm2, %v6534_v4  ;;  %v5658_v5 = vpop.f32.mrf.mxu1 }
 0x1c6   : > { %v5662_v14 = vpop.f32.mrf.mxu1 }
 0x1c8   : > { %v5664_v34 = vpop.f32.mrf.mxu1 }
 0x1ca   : > { %v5671_v0 = vpop.f32.mrf.mxu1 }
 0x1cb   : > { %4374 = vmatmul.mubr.msk.bf16.gmra.mxu0 %vm1333_vm2, %v6535_v31 }
 0x1cc   : > { %4397 = vmatprep.mubr.msk.bf16.mxu0 %vm1333_vm2, %v5217_v6  ;;  %v5606_v6 = vpop.f32.mrf.mxu0  ;;  %v5674_v27 = vpop.f32.mrf.mxu1 }
 0x1cd   : > { %6538 = vst [vmem:[#allocation17_spill] sm:$0xff] %v5606_v6 }
 0x1ce   : > { %v5608_v60 = vpop.f32.mrf.mxu0  ;;  %v5676_v46 = vpop.f32.mrf.mxu1 }
 0x1cf   : > { %6539 = vst [vmem:[#allocation18_spill] sm:$0xff] %v5608_v60 }
 0x1d0   : > { %v5678_v61 = vpop.f32.mrf.mxu1 }
 0x1d2   : > { %v5680_v2 = vpop.f32.mrf.mxu1 }
 0x1d3   : > { %4398 = vmatmul.mubr.msk.bf16.vlgmr.msra.gmra.mxu0 %vm1333_vm2, %v5208_v63  ;;  %v5614_v63 = vpop.f32.mrf.mxu0 }
 0x1d4   : > { %4432 = vmatpush3.bf16.msra.mxu0 %v2440_v48  ;;  %4401 = vmatprep.mubr.msk.bf16.mxu0 %vm1333_vm2, %v5241_v53  ;;  %6540 = vst [vmem:[#allocation19_spill] sm:$0xff] %v5614_v63 }
 0x1d5   : > { %v5616_v53 = vpop.f32.mrf.mxu0  ;;  %4530 = vmatprep.subr.msk.bf16.mxu0 %vm1358_vm1, %v2752_v59  ;;  %vm3321_vm1 = vcmask 392512  }
 0x1d6   : > { %6541 = vst [vmem:[#allocation20_spill] sm:$0xff] %v5616_v53 }
 0x1db   : > { %4402 = vmatmul.mubr.msk.bf16.gmra.mxu0 %vm1333_vm2, %v5232_v41  ;;  %v5622_v41 = vpop.f32.mrf.mxu0 }
 0x1dc   : > { %4405 = vmatprep.mubr.msk.bf16.mxu0 %vm1333_vm2, %v5369_v44  ;;  %6542 = vst [vmem:[#allocation21_spill] sm:$0xff] %v5622_v41 }
 0x1dd   : > { %v5624_v17 = vpop.f32.mrf.mxu0 }
 0x1de   : > { %6543 = vst [vmem:[#allocation22_spill] sm:$0xff] %v5624_v17 }
 0x1df   : > { %v5630_v24 = vpop.f32.mrf.mxu0 }
 0x1e1   : > { %v5632_v44 = vpop.f32.mrf.mxu0 }
 0x1e2   : > { %6546 = vst [vmem:[#allocation23_spill] sm:$0xff] %v5632_v44 }
 0x1e3   : > { %4406 = vmatmul.mubr.msk.bf16.gmra.mxu0 %vm1333_vm2, %v5355_v36  ;;  %v6544_v36 = vld [vmem:[#allocation10_spill] sm:$0xff] }
 0x1e4   : > { %4409 = vmatprep.mubr.msk.bf16.mxu0 %vm1333_vm2, %v5405_v8  ;;  %6545 = vst [vmem:[#allocation10_spill] sm:$0xff] %v5630_v24 }
 0x1eb   : > { %4410 = vmatmul.mubr.msk.bf16.gmra.mxu0 %vm1333_vm2, %v5393_v56  ;;  %v6548_v56 = vld [vmem:[#allocation12_spill] sm:$0xff] }
 0x1ec   : > { %4433 = vmatprep.mubr.msk.bf16.mxu0 %vm1333_vm2, %v5262_v11  ;;  %v5638_v11 = vpop.f32.mrf.mxu0 }
 0x1ed   : > { %6549 = vst [vmem:[#allocation9_spill] sm:$0xff] %v5638_v11 }
 0x1ee   : > { %v5640_v23 = vpop.f32.mrf.mxu0 }
 0x1ef   : > { %6550 = vst [vmem:[#allocation12_spill] sm:$0xff] %v5640_v23 }
 0x1f0   : > { %v4309_v8 = vpop.f32.mrf.mxu0 }
 0x1f2   : > { %v5646_v42 = vpop.f32.mrf.mxu0 }
 0x1f3   : > { %4434 = vmatmul.mubr.msk.bf16.vlgmr.msra.gmra.mxu0 %vm1333_vm2, %v5257_v62  ;;  %v6552_v62 = vld [vmem:[#allocation14_spill] sm:$0xff] }
 0x1f4   : > { %4437 = vmatprep.mubr.msk.bf16.mxu0 %vm1333_vm2, %v6544_v36  ;;  %v5650_v45 = vpop.f32.mrf.mxu0  ;;  %4468 = vmatpush3.bf16.msra.mxu0 %v2785_v57 }
 0x1f5   : > { %4499 = vmatprep.subr.bf16.mxu0 %v6523_v15 }
 0x1f6   : > { %v5652_v58 = vpop.f32.mrf.mxu0 }
 0x1f8   : > { %v5654_v21 = vpop.f32.mrf.mxu0 }
 0x1fa   : > { %v5656_v12 = vpop.f32.mrf.mxu0 }
 0x1fb   : > { %4438 = vmatmul.mubr.msk.bf16.gmra.mxu0 %vm1333_vm2, %v6547_v7 }
 0x1fc   : > { %4441 = vmatprep.mubr.msk.bf16.mxu0 %vm1333_vm2, %v6548_v56  ;;  %v5660_v54 = vpop.f32.mrf.mxu0 }
 0x1fe   : > { %v1415_v16 = vpop.f32.mrf.mxu0 }
 0x203   : > { %4442 = vmatmul.mubr.msk.bf16.gmra.mxu0 %vm1333_vm2, %v6551_v39 }
 0x204   : > { %4445 = vmatprep.mubr.msk.bf16.mxu0 %vm1333_vm2, %v6552_v62  ;;  %v5682_v49 = vpop.f32.mrf.mxu1 }
 0x206   : > { %v5684_v13 = vpop.f32.mrf.mxu1 }
 0x208   : > { %v5686_v19 = vpop.f32.mrf.mxu1 }
 0x20a   : > { %v5688_v40 = vpop.f32.mrf.mxu1 }
 0x20b   : > { %4446 = vmatmul.mubr.msk.bf16.gmra.mxu0 %vm1333_vm2, %v6553_v20  ;;  %6554 = vst [vmem:[#allocation11_spill] sm:$0xff] %v5688_v40 }
 0x20c   : > { %v5690_v36 = vpop.f32.mrf.mxu1 }
 0x20e   : > { %v5692_v20 = vpop.f32.mrf.mxu1 }
 0x20f   : > { %6555 = vst [vmem:[#allocation14_spill] sm:$0xff] %v5692_v20 }
 0x223   : > { %v4317_v26 = vpop.f32.mrf.mxu0 }
 0x225   : > { %v1428_v30 = vpop.f32.mrf.mxu0 }
 0x227   : > { %v4318_v33 = vpop.f32.mrf.mxu0 }
 0x229   : > { %v1431_v47 = vpop.f32.mrf.mxu0 }
 0x22b   : > { %v4321_v43 = vpop.f32.mrf.mxu0 }
 0x22d   : > { %v1444_v29 = vpop.f32.mrf.mxu0 }
 0x22f   : > { %v4322_v37 = vpop.f32.mrf.mxu0 }
 0x231   : > { %v1447_v52 = vpop.f32.mrf.mxu0 }
 0x233   : > { %v4327_v18 = vpop.f32.mrf.mxu0 }
 0x235   : > { %v1520_v1 = vpop.f32.mrf.mxu0 }
 0x237   : > { %v4328_v22 = vpop.f32.mrf.mxu0 }
 0x239   : > { %v1523_v50 = vpop.f32.mrf.mxu0 }
 0x23b   : > { %v4331_v10 = vpop.f32.mrf.mxu0 }
 0x23d   : > { %v1536_v55 = vpop.f32.mrf.mxu0 }
 0x23f   : > { %v4332_v3 = vpop.f32.mrf.mxu0 }
 0x241   : > { %v1539_v9 = vpop.f32.mrf.mxu0 }
 0x242   : > { %v1540_v32 = vadd.f32 %v1539_v9, %v1415_v16  ;;  %v5694_v9 = vpop.f32.mrf.mxu1 }
 0x243   : > { %v4335_v51 = vpop.f32.mrf.mxu0  ;;  %6556 = vst [vmem:[#allocation13_spill] sm:$0xff] %v5694_v9 }
 0x244   : > { %v1561_v28 = vadd.f32 %v4335_v51, %v4317_v26  ;;  %v1529_v51 = vadd.f32 %v4327_v18, %v4309_v8 }
 0x245   : > { %v1552_v38 = vpop.f32.mrf.mxu0 }
 0x246   : > { %v1553_v4 = vadd.f32 %v1552_v38, %v1428_v30 }
 0x247   : > { %v4336_v31 = vpop.f32.mrf.mxu0 }
 0x248   : > { %v1564_v48 = vadd.f32 %v4336_v31, %v4318_v33  ;;  %v1521_v33 = vadd.f32 %v1520_v1, %v5646_v42  ;;  %v5699_v31 = vpop.f32.mrf.mxu1  ;;  %v1537_v1 = vadd.f32 %v1536_v55, %v5656_v12 }
 0x249   : > { %v1555_v7 = vpop.f32.mrf.mxu0  ;;  %6557 = vst [vmem:[#allocation24_spill] sm:$0xff] %v5699_v31 }
 0x24a   : > { %v1556_v56 = vadd.f32 %v1555_v7, %v1431_v47 }
 0x24b   : > { %v4339_v39 = vpop.f32.mrf.mxu0 }
 0x24c   : > { %v1577_v62 = vadd.f32 %v4339_v39, %v4321_v43  ;;  %v1532_v43 = vadd.f32 %v4328_v22, %v5650_v45  ;;  %v5707_v39 = vpop.f32.mrf.mxu1 }
 0x24d   : > { %v1568_v59 = vpop.f32.mrf.mxu0 }
 0x24e   : > { %v1569_v57 = vadd.f32 %v1568_v59, %v1444_v29  ;;  %v5715_v45 = vpop.f32.mrf.mxu1 }
 0x24f   : > { %v4340_v11 = vpop.f32.mrf.mxu0 }
 0x250   : > { %v1580_v16 = vadd.f32 %v4340_v11, %v4322_v37  ;;  %v1524_v11 = vadd.f32 %v1523_v50, %v5652_v58 }
 0x251   : > { %v1571_v26 = vpop.f32.mrf.mxu0 }
 0x252   : > { %v1572_v23 = vadd.f32 %v1571_v26, %v1447_v52  ;;  %v1545_v52 = vadd.f32 %v4331_v10, %v5654_v21  ;;  %v1548_v26 = vadd.f32 %v4332_v3, %v5660_v54 }
 0x253   : > { %v4345_v30 = vpop.f32.mrf.mxu0 }
 0x254   : > { %v5697_v38 = vadd.f32 %v4345_v30, %v1529_v51  ;;  %v5722_v30 = vpop.f32.mrf.mxu1 }
 0x255   : > { %v1654_v47 = vpop.f32.mrf.mxu0 }
 0x256   : > { %v5702_v7 = vadd.f32 %v1654_v47, %v1521_v33  ;;  %v5726_v12 = vpop.f32.mrf.mxu1 }
 0x257   : > { %v4346_v29 = vpop.f32.mrf.mxu0 }
 0x258   : > { %v5705_v37 = vadd.f32 %v4346_v29, %v1532_v43  ;;  %v5732_v54 = vpop.f32.mrf.mxu1 }
 0x259   : > { %v1657_v8 = vpop.f32.mrf.mxu0 }
 0x25a   : > { %v5710_v42 = vadd.f32 %v1657_v8, %v1524_v11 }
 0x25b   : > { %v4349_v18 = vpop.f32.mrf.mxu0 }
 0x25c   : > { %v5713_v59 = vadd.f32 %v4349_v18, %v1545_v52 }
 0x25d   : > { %v1670_v22 = vpop.f32.mrf.mxu0 }
 0x25e   : > { %v5718_v58 = vadd.f32 %v1670_v22, %v1537_v1  ;;  %v5736_v1 = vpop.f32.mrf.mxu1 }
 0x25f   : > { %v4350_v50 = vpop.f32.mrf.mxu0 }
 0x260   : > { %v5720_v51 = vadd.f32 %v4350_v50, %v1548_v26 }
 0x261   : > { %v1673_v21 = vpop.f32.mrf.mxu0 }
 0x262   : > { %v5724_v10 = vadd.f32 %v1673_v21, %v1540_v32 }
 0x263   : > { %v4353_v33 = vpop.f32.mrf.mxu0 }
 0x264   : > { %v1727_v47 = vadd.f32 %v4353_v33, %v1561_v28 }
 0x265   : > { %v1686_v55 = vpop.f32.mrf.mxu0 }
 0x266   : > { %v5728_v43 = vadd.f32 %v1686_v55, %v1553_v4  ;;  %v5742_v4 = vpop.f32.mrf.mxu1 }
 0x267   : > { %v4354_v29 = vpop.f32.mrf.mxu0  ;;  %6560 = vst [vmem:[#allocation27_spill] sm:$0xff] %v5742_v4 }
 0x268   : > { %v5730_v11 = vadd.f32 %v4354_v29, %v1564_v48  ;;  %v5746_v33 = vpop.f32.mrf.mxu1 }
 0x269   : > { %v1689_v3 = vpop.f32.mrf.mxu0  ;;  %6562 = vst [vmem:[#allocation29_spill] sm:$0xff] %v5746_v33 }
 0x26a   : > { %v5734_v8 = vadd.f32 %v1689_v3, %v1556_v56  ;;  %v5748_v55 = vpop.f32.mrf.mxu1 }
 0x26b   : > { %v4357_v52 = vpop.f32.mrf.mxu0  ;;  %6563 = vst [vmem:[#allocation30_spill] sm:$0xff] %v5748_v55 }
 0x26c   : > { %v1731_v18 = vadd.f32 %v4357_v52, %v1577_v62  ;;  %v5750_v3 = vpop.f32.mrf.mxu1 }
 0x26d   : > { %v1702_v32 = vpop.f32.mrf.mxu0  ;;  %6564 = vst [vmem:[#allocation31_spill] sm:$0xff] %v5750_v3 }
 0x26e   : > { %v5738_v22 = vadd.f32 %v1702_v32, %v1569_v57  ;;  %v5752_v32 = vpop.f32.mrf.mxu1 }
 0x26f   : > { %v4358_v28 = vpop.f32.mrf.mxu0  ;;  %6565 = vst [vmem:[#allocation32_spill] sm:$0xff] %v5752_v32 }
 0x270   : > { %6558 = vst [vmem:[#allocation25_spill] sm:$0xff] %v5738_v22  ;;  %v5740_v26 = vadd.f32 %v4358_v28, %v1580_v16  ;;  %v5754_v24 = vpop.f32.mrf.mxu1 }
 0x271   : > { %v1705_v50 = vpop.f32.mrf.mxu0  ;;  %6566 = vst [vmem:[#allocation33_spill] sm:$0xff] %v5754_v24 }
 0x272   : > { %6559 = vst [vmem:[#allocation26_spill] sm:$0xff] %v5740_v26  ;;  %v5744_v48 = vadd.f32 %v1705_v50, %v1572_v23  ;;  %v5761_v17 = vpop.f32.mrf.mxu1 }
 0x273   : > { %v4363_v21 = vpop.f32.mrf.mxu0  ;;  %6567 = vst [vmem:[#allocation34_spill] sm:$0xff] %v5761_v17 }
 0x274   : > { %6561 = vst [vmem:[#allocation28_spill] sm:$0xff] %v5744_v48  ;;  %v5767_v53 = vpop.f32.mrf.mxu1  ;;  %v1933_v48 = vadd.f32 %v4363_v21, %v5697_v38 }
 0x275   : > { %v1868_v56 = vpop.f32.mrf.mxu0  ;;  %6568 = vst [vmem:[#allocation35_spill] sm:$0xff] %v5767_v53 }
 0x276   : > { %v1931_v26 = vadd.f32 %v1868_v56, %v5702_v7  ;;  %v2083_v22 = vadd.f32 %v5658_v5, %v1933_v48 }
 0x277   : > { %v4364_v62 = vpop.f32.mrf.mxu0 }
 0x279   : > { %v1871_v29 = vpop.f32.mrf.mxu0 }
 0x27a   : > { %v1932_v4 = vadd.f32 %v1871_v29, %v5710_v42 }
 0x27b   : > { %v4367_v57 = vpop.f32.mrf.mxu0 }
 0x27c   : > { %v1937_v7 = vadd.f32 %v4367_v57, %v5713_v59  ;;  %v2082_v48 = vadd.f32 %v5671_v0, %v1932_v4 }
 0x27d   : > { %v1884_v52 = vpop.f32.mrf.mxu0 }
 0x27f   : > { %v4368_v16 = vpop.f32.mrf.mxu0 }
 0x281   : > { %v1887_v28 = vpop.f32.mrf.mxu0 }
 0x283   : > { %v4371_v23 = vpop.f32.mrf.mxu0 }
 0x284   : > { %v1941_v50 = vadd.f32 %v4371_v23, %v1727_v47  ;;  %v5774_v47 = vpop.f32.mrf.mxu1 }
 0x285   : > { %v5756_v41 = vpop.f32.mrf.mxu0  ;;  %6571 = vst [vmem:[#allocation38_spill] sm:$0xff] %v5774_v47 }
 0x286   : > { %v5759_v44 = vadd.f32 %v5682_v49, %v1941_v50  ;;  %v5780_v50 = vpop.f32.mrf.mxu1 }
 0x287   : > { %v5763_v63 = vpop.f32.mrf.mxu0  ;;  %6574 = vst [vmem:[#allocation41_spill] sm:$0xff] %v5780_v50 }
 0x288   : > { %v4453_v31 = vpop.f32.mrf.mxu1 }
 0x289   : > { %v5765_v6 = vpop.f32.mrf.mxu0 }
 0x28a   : > { %v2626_v32 = vpop.f32.mrf.mxu1 }
 0x28b   : > { %v4375_v35 = vpop.f32.mrf.mxu0 }
 0x28c   : > { %v1945_v60 = vadd.f32 %v4375_v35, %v1731_v18  ;;  %v4454_v20 = vpop.f32.mrf.mxu1 }
 0x28d   : > { %v5769_v25 = vpop.f32.mrf.mxu0 }
 0x28e   : > { %6569 = vst [vmem:[#allocation36_spill] sm:$0xff] %v5769_v25  ;;  %v5772_v15 = vadd.f32 %v5690_v36, %v1945_v60  ;;  %v5782_v36 = vpop.f32.mrf.mxu1  ;;  %v1934_v25 = vadd.f32 %v4364_v62, %v5705_v37  ;;  %v1935_v37 = vadd.f32 %v1884_v52, %v5718_v58 }
 0x28f   : > { %v5776_v23 = vpop.f32.mrf.mxu0 }
 0x290   : > { %6570 = vst [vmem:[#allocation37_spill] sm:$0xff] %v5772_v15  ;;  %6572 = vst [vmem:[#allocation39_spill] sm:$0xff] %v5776_v23  ;;  %v2085_v59 = vadd.f32 %v5676_v46, %v1935_v37  ;;  %v1939_v46 = vadd.f32 %v5756_v41, %v5728_v43 }
 0x291   : > { %v5778_v49 = vpop.f32.mrf.mxu0 }
 0x292   : > { %6573 = vst [vmem:[#allocation40_spill] sm:$0xff] %v5778_v49  ;;  %v5788_v49 = vpop.f32.mrf.mxu1 }
 0x293   : > { %v4399_v17 = vpop.f32.mrf.mxu0  ;;  %6575 = vst [vmem:[#allocation42_spill] sm:$0xff] %v5788_v49 }
 0x294   : > { %v5796_v55 = vpop.f32.mrf.mxu1  ;;  %v2233_v49 = vadd.f32 %v4399_v17, %v2083_v22 }
 0x295   : > { %v2168_v24 = vpop.f32.mrf.mxu0 }
 0x296   : > { %v5806_v38 = vpop.f32.mrf.mxu1  ;;  %v2391_v17 = vadd.f32 %v5707_v39, %v2233_v49 }
 0x297   : > { %v4400_v9 = vpop.f32.mrf.mxu0 }
 0x298   : > { %v5817_v42 = vpop.f32.mrf.mxu1 }
 0x299   : > { %v2171_v53 = vpop.f32.mrf.mxu0 }
 0x29a   : > { %v2232_v22 = vadd.f32 %v2171_v53, %v2082_v48  ;;  %v5825_v4 = vpop.f32.mrf.mxu1 }
 0x29b   : > { %v4403_v35 = vpop.f32.mrf.mxu0 }
 0x29d   : > { %v2184_v18 = vpop.f32.mrf.mxu0 }
 0x29e   : > { %v2235_v53 = vadd.f32 %v2184_v18, %v2085_v59 }
 0x29f   : > { %v4404_v3 = vpop.f32.mrf.mxu0 }
 0x2a0   : > { %v2393_v41 = vadd.f32 %v5736_v1, %v2235_v53 }
 0x2a1   : > { %v2187_v60 = vpop.f32.mrf.mxu0 }
 0x2a3   : > { %v5784_v47 = vpop.f32.mrf.mxu0 }
 0x2a5   : > { %v5786_v15 = vpop.f32.mrf.mxu0 }
 0x2a7   : > { %v5790_v50 = vpop.f32.mrf.mxu0 }
 0x2a8   : > { %6576 = vst [vmem:[#allocation43_spill] sm:$0xff] %v5790_v50  ;;  %v2081_v50 = vadd.f32 %v5662_v14, %v1931_v26  ;;  %v2087_v26 = vadd.f32 %v5674_v27, %v1937_v7  ;;  %v5830_v27 = vld [vmem:[%s6486_s6] ss:$0 sm:$0xff] }
 0x2a9   : > { %v5793_v23 = vpop.f32.mrf.mxu0 }
 0x2aa   : > { %v2231_v56 = vadd.f32 %v2168_v24, %v2081_v50 }
 0x2ab   : > { %v5798_v40 = vpop.f32.mrf.mxu0 }
 0x2ac   : > { %6577 = vst [vmem:[#allocation44_spill] sm:$0xff] %v5798_v40  ;;  %v2084_v40 = vadd.f32 %v5664_v34, %v1934_v25  ;;  %v2389_v24 = vadd.f32 %v5715_v45, %v2231_v56  ;;  %v1938_v25 = vadd.f32 %v4368_v16, %v5720_v51  ;;  %v1936_v34 = vadd.f32 %v1887_v28, %v5724_v10 }
 0x2ad   : > { %v5802_v33 = vpop.f32.mrf.mxu0  ;;  %v2390_v10 = vadd.f32 %v5726_v12, %v2232_v22  ;;  %v6579_v22 = vld [vmem:[#allocation27_spill] sm:$0xff] }
 0x2ae   : > { %v2234_v5 = vadd.f32 %v4400_v9, %v2084_v40  ;;  %v2237_v9 = vadd.f32 %v4403_v35, %v2087_v26  ;;  %v2086_v52 = vadd.f32 %v5680_v2, %v1936_v34  ;;  %v5841_v35 = vpop.f32.mrf.mxu1  ;;  %v6580_v26 = vld [vmem:[#allocation29_spill] sm:$0xff] }
 0x2af   : > { %v5808_v21 = vpop.f32.mrf.mxu0  ;;  %v6583_v59 = vld [vmem:[#allocation43_spill] sm:$0xff] }
 0x2b0   : > { %v2392_v39 = vadd.f32 %v5722_v30, %v2234_v5  ;;  %v2088_v30 = vadd.f32 %v5678_v61, %v1938_v25  ;;  %v2236_v18 = vadd.f32 %v2187_v60, %v2086_v52  ;;  %v4462_v48 = vpop.f32.mrf.mxu1  ;;  %v6582_v25 = vld [vmem:[#allocation36_spill] sm:$0xff] }
 0x2b1   : > { %v5813_v62 = vpop.f32.mrf.mxu0  ;;  %v6589_v52 = vld [vmem:[#allocation40_spill] sm:$0xff] }
 0x2b2   : > { %v2238_v12 = vadd.f32 %v4404_v3, %v2088_v30  ;;  %v6588_v30 = vld [vmem:[#allocation28_spill] sm:$0xff] }
 0x2b3   : > { %v4435_v14 = vpop.f32.mrf.mxu0 }
 0x2b4   : > { %v2541_v29 = vadd.f32 %v4435_v14, %v2391_v17  ;;  %v6578_v17 = vld [vmem:[#allocation42_spill] sm:$0xff] }
 0x2b5   : > { %v2476_v40 = vpop.f32.mrf.mxu0 }
 0x2b6   : > { %v2691_v0 = vadd.f32 %v4453_v31, %v2541_v29  ;;  %v2539_v58 = vadd.f32 %v2476_v40, %v2389_v24  ;;  %v1942_v31 = vadd.f32 %v5763_v63, %v5730_v11  ;;  %v2241_v11 = vadd.f32 %v5784_v47, %v5759_v44  ;;  %v6581_v24 = vld [vmem:[#allocation25_spill] sm:$0xff] }
 0x2b7   : > { %v4436_v45 = vpop.f32.mrf.mxu0  ;;  %v2394_v44 = vadd.f32 %v6580_v26, %v2236_v18  ;;  %v1943_v34 = vadd.f32 %v6582_v25, %v6581_v24  ;;  %v6590_v18 = vld [vmem:[#allocation31_spill] sm:$0xff] }
 0x2b8   : > { %v2689_v51 = vadd.f32 %v2626_v32, %v2539_v58  ;;  %v2542_v57 = vadd.f32 %v4436_v45, %v2392_v39  ;;  %v2714_v28 = vadd.f32 %v5830_v27, %v2691_v0  ;;  %v2395_v32 = vadd.f32 %v5732_v54, %v2237_v9  ;;  %v6585_v45 = vld [vmem:[#allocation30_spill] sm:$0xff] }
 0x2b9   : > { %v2479_v16 = vpop.f32.mrf.mxu0  ;;  %v2089_v54 = vadd.f32 %v5684_v13, %v1939_v46  ;;  %v2092_v3 = vadd.f32 %v5686_v19, %v1942_v31  ;;  %v6587_v46 = vld [vmem:[#allocation39_spill] sm:$0xff] }
 0x2ba   : > { %v2692_v49 = vadd.f32 %v4454_v20, %v2542_v57  ;;  %v2540_v50 = vadd.f32 %v2479_v16, %v2390_v10  ;;  %v2712_v63 = vadd.f32 %v5830_v27, %v2689_v51  ;;  %v1940_v20 = vadd.f32 %v5765_v6, %v5734_v8  ;;  %v2661_v57 = vpop.f32.mrf.mxu1  ;;  %v6586_v10 = vld [vmem:[#allocation26_spill] sm:$0xff] }
 0x2bb   : > { %v4439_v7 = vpop.f32.mrf.mxu0  ;;  %v2730_v56 = vmax.f32 %v2714_v28, 0.0  ;;  %v2396_v6 = vadd.f32 %v6579_v22, %v2238_v12  ;;  %v2242_v40 = vadd.f32 %v6583_v59, %v2092_v3  ;;  %v2399_v51 = vadd.f32 %v6585_v45, %v2241_v11  ;;  %v6593_v11 = vld [vmem:[#allocation37_spill] sm:$0xff] }
 0x2bc   : > { %v2715_v61 = vadd.f32 %v5830_v27, %v2692_v49  ;;  %v2690_v2 = vadd.f32 %v5782_v36, %v2540_v50  ;;  %v2545_v43 = vadd.f32 %v4439_v7, %v2395_v32  ;;  %v2239_v36 = vadd.f32 %v5786_v15, %v2089_v54  ;;  %v6584_v15 = vld [vmem:[#allocation11_spill] sm:$0xff]  ;;  %v6594_v54 = vld [vmem:[#allocation44_spill] sm:$0xff] }
 0x2bd   : > { %v2492_v60 = vpop.f32.mrf.mxu0  ;;  %v2728_v47 = vmax.f32 %v2712_v63, 0.0  ;;  %v2090_v58 = vadd.f32 %v6584_v15, %v1940_v20  ;;  %v1946_v31 = vadd.f32 %v6587_v46, %v6586_v10  ;;  %v6591_v63 = vld [vmem:[#allocation14_spill] sm:$0xff]  ;;  %v2245_v3 = vadd.f32 %v6594_v54, %v6593_v11 }
 0x2be   : > { %v2731_v1 = vmax.f32 %v2715_v61, 0.0  ;;  %v2713_v37 = vadd.f32 %v5830_v27, %v2690_v2  ;;  %v2543_v5 = vadd.f32 %v2492_v60, %v2393_v41  ;;  %v2695_v14 = vadd.f32 %v6578_v17, %v2545_v43 }
 0x2bf   : > { %v4440_v8 = vpop.f32.mrf.mxu0  ;;  %v2397_v7 = vadd.f32 %v6590_v18, %v2239_v36  ;;  %v2240_v41 = vadd.f32 %v5793_v23, %v2090_v58  ;;  %v2093_v61 = vadd.f32 %v6591_v63, %v1943_v34 }
 0x2c0   : > { %v2745_v13 = vpack.c.bf16 %v2731_v1, %v2730_v56  ;;  %v2729_v29 = vmax.f32 %v2713_v37, 0.0  ;;  %v2693_v19 = vadd.f32 %v5796_v55, %v2543_v5  ;;  %v2546_v9 = vadd.f32 %v4440_v8, %v2396_v6  ;;  %v4465_v1 = vpop.f32.mrf.mxu1  ;;  %v6595_v37 = vld [vmem:[#allocation13_spill] sm:$0xff]  ;;  %v6596_v5 = vld [vmem:[#allocation24_spill] sm:$0xff] }
 0x2c1   : > { %v2495_v0 = vpop.f32.mrf.mxu0  ;;  %v1944_v55 = vadd.f32 %v6589_v52, %v6588_v30  ;;  %v2718_v16 = vadd.f32 %v5830_v27, %v2695_v14  ;;  %v2096_v23 = vadd.f32 %v6595_v37, %v1946_v31  ;;  %v2243_v6 = vadd.f32 %v5802_v33, %v2093_v61 }
 0x2c2   : > { %v2744_v39 = vpack.c.bf16 %v2729_v29, %v2728_v47  ;;  %v2544_v53 = vadd.f32 %v2495_v0, %v2394_v44  ;;  %v2696_v28 = vadd.f32 %v5806_v38, %v2546_v9  ;;  %v2716_v50 = vadd.f32 %v5830_v27, %v2693_v19  ;;  %v6592_v38 = vld [vmem:[#allocation32_spill] sm:$0xff]  ;;  %v2674_v0 = vpop.f32.mrf.mxu1 }
 0x2c3   : > { %v4443_v49 = vpop.f32.mrf.mxu0  ;;  %v2400_v20 = vadd.f32 %v6592_v38, %v2242_v40  ;;  %v2094_v36 = vadd.f32 %v6596_v5, %v1944_v55  ;;  %v2734_v17 = vmax.f32 %v2718_v16, 0.0  ;;  %v2246_v47 = vadd.f32 %v5808_v21, %v2096_v23  ;;  %v6598_v40 = vld [vmem:[#allocation34_spill] sm:$0xff] }
 0x2c4   : > { %v2694_v32 = vadd.f32 %v5817_v42, %v2544_v53  ;;  %v2549_v12 = vadd.f32 %v4443_v49, %v2399_v51  ;;  %4469 = vmatprep.mubr.msk.bf16.mxu0 %vm1333_vm2, %v2744_v39  ;;  %v2719_v2 = vadd.f32 %v5830_v27, %v2696_v28  ;;  %v2732_v8 = vmax.f32 %v2716_v50, 0.0  ;;  %v4577_v5 = vld [vmem:[%s6489_s9 + $0x8] sm:$0xff]  }
 0x2c5   : > { %v2508_v43 = vpop.f32.mrf.mxu0  ;;  %4470 = vmatmul.mubr.msk.bf16.vlgmr.msra.gmra.mxu0 %vm1333_vm2, %v2745_v13  ;;  %v2403_v9 = vadd.f32 %v6598_v40, %v2245_v3  ;;  %v2244_v58 = vadd.f32 %v5813_v62, %v2094_v36  ;;  %v4466_v62 = vpop.f32.mrf.mxu1  ;;  %4486 = vmatpush3.bf16.msra.mxu1 %v4577_v5  ;;  %v6602_v36 = vmov 0.0  }
 0x2c6   : > { %v2717_v42 = vadd.f32 %v5830_v27, %v2694_v32  ;;  %v2699_v60 = vadd.f32 %v5825_v4, %v2549_v12  ;;  %v2547_v56 = vadd.f32 %v2508_v43, %v2397_v7  ;;  %v2735_v14 = vmax.f32 %v2719_v2, 0.0  ;;  %v6597_v4 = vld [vmem:[#allocation33_spill] sm:$0xff]  ;;  %4487 = vmatprep.subr.bf16.mxu1 %v6602_v36  ;;  %4489 = vmatprep.mubr.msk.bf16.mxu1 %vm4658_vm4, %v6602_v36 }
 0x2c7   : > { %v4444_v22 = vpop.f32.mrf.mxu0  ;;  %v2398_v19 = vadd.f32 %v6597_v4, %v2240_v41  ;;  %v6601_v12 = vld [vmem:[#allocation41_spill] sm:$0xff]  ;;  %v2677_v43 = vpop.f32.mrf.mxu1 }
 0x2c8   : > { %v2733_v26 = vmax.f32 %v2717_v42, 0.0  ;;  %v2550_v44 = vadd.f32 %v4444_v22, %v2400_v20  ;;  %v2747_v13 = vpack.c.bf16 %v2735_v14, %v2734_v17  ;;  %v2697_v29 = vadd.f32 %v5841_v35, %v2547_v56  ;;  %v6599_v35 = vld [vmem:[#allocation35_spill] sm:$0xff]  ;;  %v5923_v22 = vld [vmem:[%s6488_s8] ss:$0 sm:$0xff] }
 0x2c9   : > { %v2511_v24 = vpop.f32.mrf.mxu0  ;;  %v2722_v34 = vadd.f32 %v5830_v27, %v2699_v60  ;;  %v2401_v53 = vadd.f32 %v6599_v35, %v2243_v6  ;;  %v2402_v18 = vadd.f32 %v6601_v12, %v2244_v58 }
 0x2ca   : > { %v2746_v25 = vpack.c.bf16 %v2733_v26, %v2732_v8  ;;  %v2700_v59 = vadd.f32 %v4462_v48, %v2550_v44  ;;  %v2548_v15 = vadd.f32 %v2511_v24, %v2398_v19  ;;  %v2720_v45 = vadd.f32 %v5830_v27, %v2697_v29  ;;  %v6600_v48 = vld [vmem:[#allocation38_spill] sm:$0xff] }
 0x2cb   : > { %v4447_v33 = vpop.f32.mrf.mxu0  ;;  %v2404_v46 = vadd.f32 %v6600_v48, %v2246_v47  ;;  %v2738_v31 = vmax.f32 %v2722_v34, 0.0 }
 0x2cc   : > { %v2723_v39 = vadd.f32 %v5830_v27, %v2700_v59  ;;  %v2553_v21 = vadd.f32 %v4447_v33, %v2403_v9  ;;  %4473 = vmatprep.mubr.msk.bf16.mxu0 %vm1333_vm2, %v2746_v25  ;;  %v2698_v51 = vadd.f32 %v2661_v57, %v2548_v15  ;;  %v2736_v7 = vmax.f32 %v2720_v45, 0.0 }
 0x2cd   : > { %v2524_v10 = vpop.f32.mrf.mxu0  ;;  %4474 = vmatmul.mubr.msk.bf16.gmra.mxu0 %vm1333_vm2, %v2747_v13 }
 0x2ce   : > { %v2739_v30 = vmax.f32 %v2723_v39, 0.0  ;;  %v2703_v52 = vadd.f32 %v4465_v1, %v2553_v21  ;;  %v2551_v55 = vadd.f32 %v2524_v10, %v2401_v53  ;;  %v2721_v16 = vadd.f32 %v5830_v27, %v2698_v51 }
 0x2cf   : > { %v4448_v28 = vpop.f32.mrf.mxu0 }
 0x2d0   : > { %v2749_v49 = vpack.c.bf16 %v2739_v30, %v2738_v31  ;;  %v2701_v50 = vadd.f32 %v2674_v0, %v2551_v55  ;;  %v2554_v32 = vadd.f32 %v4448_v28, %v2404_v46  ;;  %v2737_v57 = vmax.f32 %v2721_v16, 0.0 }
 0x2d1   : > { %v2527_v41 = vpop.f32.mrf.mxu0  ;;  %v2726_v63 = vadd.f32 %v5830_v27, %v2703_v52 }
 0x2d2   : > { %v2704_v61 = vadd.f32 %v4466_v62, %v2554_v32  ;;  %v2552_v2 = vadd.f32 %v2527_v41, %v2402_v18  ;;  %v2748_v38 = vpack.c.bf16 %v2737_v57, %v2736_v7  ;;  %v2724_v20 = vadd.f32 %v5830_v27, %v2701_v50 }
 0x2d3   : > { %v2742_v3 = vmax.f32 %v2726_v63, 0.0 }
 0x2d4   : > { %v2727_v11 = vadd.f32 %v5830_v27, %v2704_v61  ;;  %v2702_v54 = vadd.f32 %v2677_v43, %v2552_v2  ;;  %4477 = vmatprep.mubr.msk.bf16.mxu0 %vm1333_vm2, %v2748_v38  ;;  %v2740_v56 = vmax.f32 %v2724_v20, 0.0 }
 0x2d5   : > { %4478 = vmatmul.mubr.msk.bf16.gmra.mxu0 %vm1333_vm2, %v2749_v49 }
 0x2d6   : > { %v2743_v42 = vmax.f32 %v2727_v11, 0.0  ;;  %v2725_v60 = vadd.f32 %v5830_v27, %v2702_v54  ;;  %v4578_v27 = vld [vmem:[%s6489_s9] sm:$0xff]  }
 0x2d7   : > { %4488 = vmatpush3.bf16.msra.mxu1 %v4578_v27 }
 0x2d8   : > { %v2751_v1 = vpack.c.bf16 %v2743_v42, %v2742_v3  ;;  %v2741_v37 = vmax.f32 %v2725_v60, 0.0  ;;  %4493 = vmatprep.subr.bf16.mxu1 %v6602_v36 }
 0x2da   : > { %v2750_v23 = vpack.c.bf16 %v2741_v37, %v2740_v56 }
 0x2dc   : > { %4481 = vmatprep.mubr.msk.bf16.mxu0 %vm1333_vm2, %v2750_v23 }
 0x2dd   : > { %4482 = vmatmul.mubr.msk.bf16.gmra.mxu0 %vm1333_vm2, %v2751_v1  ;;  %vm3425_vm2 = vcmask 851712  }
 0x2de   : > { %4515 = vmatprep.mubr.msk.bf16.mxu0 %vm4658_vm4, %v6602_v36 }
 0x385   : > { %v4471_v17 = vpop.f32.mrf.mxu0 }
 0x386   : > { %v5929_v44 = vadd.f32 %v4471_v17, %v5923_v22 }
 0x387   : > { %v2821_v14 = vpop.f32.mrf.mxu0 }
 0x388   : > { %v5926_v8 = vadd.f32 %v5923_v22, %v2821_v14  ;;  %v2888_v34 = vsel %vm2884_vm5, %v5929_v44, 0.0  ;;  %v2932_v52 = vsel %vm2884_vm5, %v5929_v44, -inf }
 0x389   : > { %v4472_v6 = vpop.f32.mrf.mxu0 }
 0x38a   : > { %v2885_v29 = vsel %vm2884_vm5, %v5926_v8, 0.0  ;;  %v5937_v4 = vadd.f32 %v4472_v6, %v5923_v22  ;;  %v2930_v35 = vsel %vm2884_vm5, %v5926_v8, -inf }
 0x38b   : > { %v2824_v26 = vpop.f32.mrf.mxu0  ;;  %v2933_v28 = vmax.f32 %v2930_v35, %v2932_v52 }
 0x38c   : > { %v5932_v47 = vadd.f32 %v5923_v22, %v2824_v26  ;;  %v2890_v0 = vsel %vm2884_vm5, %v5937_v4, 0.0  ;;  %v2934_v45 = vsel %vm2884_vm5, %v5937_v4, -inf }
 0x38d   : > { %v4475_v13 = vpop.f32.mrf.mxu0 }
 0x38e   : > { %v2886_v19 = vsel %vm2884_vm5, %v5932_v47, 0.0  ;;  %v2931_v58 = vsel %vm2884_vm5, %v5932_v47, -inf  ;;  %v5960_v51 = vadd.f32 %v4475_v13, %v5923_v22 }
 0x38f   : > { %v2887_v24 = vadd.f32 %v2886_v19, %v2885_v29  ;;  %v2837_v25 = vpop.f32.mrf.mxu0  ;;  %v2935_v31 = vmax.f32 %v2931_v58, %v2934_v45 }
 0x390   : > { %v5944_v59 = vadd.f32 %v5923_v22, %v2837_v25  ;;  %v2896_v50 = vsel %vm2884_vm5, %v5960_v51, 0.0  ;;  %v2940_v61 = vsel %vm2884_vm5, %v5960_v51, -inf }
 0x391   : > { %v2889_v40 = vadd.f32 %v2888_v34, %v2887_v24  ;;  %v4476_v9 = vpop.f32.mrf.mxu0 }
 0x392   : > { %v2892_v39 = vsel %vm2884_vm5, %v5944_v59, 0.0  ;;  %v2936_v55 = vsel %vm2884_vm5, %v5944_v59, -inf  ;;  %v5971_v62 = vadd.f32 %v4476_v9, %v5923_v22 }
 0x393   : > { %v2891_v15 = vadd.f32 %v2890_v0, %v2889_v40  ;;  %v2840_v33 = vpop.f32.mrf.mxu0  ;;  %v2937_v12 = vmax.f32 %v2933_v28, %v2936_v55 }
 0x394   : > { %v5953_v21 = vadd.f32 %v5923_v22, %v2840_v33  ;;  %v2942_v7 = vsel %vm2884_vm5, %v5971_v62, -inf  ;;  %v2898_v2 = vsel %vm2884_vm5, %v5971_v62, 0.0 }
 0x395   : > { %v2893_v53 = vadd.f32 %v2892_v39, %v2891_v15  ;;  %v4479_v46 = vpop.f32.mrf.mxu0  ;;  %v2941_v11 = vmax.f32 %v2937_v12, %v2940_v61 }
 0x396   : > { %v2894_v10 = vsel %vm2884_vm5, %v5953_v21, 0.0  ;;  %v2938_v48 = vsel %vm2884_vm5, %v5953_v21, -inf  ;;  %v5985_v43 = vadd.f32 %v4479_v46, %v5923_v22 }
 0x397   : > { %v2895_v30 = vadd.f32 %v2894_v10, %v2893_v53  ;;  %v2853_v16 = vpop.f32.mrf.mxu0  ;;  %v2939_v49 = vmax.f32 %v2935_v31, %v2938_v48 }
 0x398   : > { %v5978_v57 = vadd.f32 %v5923_v22, %v2853_v16  ;;  %v2909_v23 = vsel %vm2884_vm5, %v5985_v43, 0.0  ;;  %v2953_v26 = vsel %vm2884_vm5, %v5985_v43, -inf }
 0x399   : > { %v4480_v32 = vpop.f32.mrf.mxu0  ;;  %v2897_v18 = vadd.f32 %v2896_v50, %v2895_v30  ;;  %v2943_v63 = vmax.f32 %v2939_v49, %v2942_v7 }
 0x39a   : > { %v2906_v3 = vsel %vm2884_vm5, %v5978_v57, 0.0  ;;  %v5993_v42 = vadd.f32 %v4480_v32, %v5923_v22  ;;  %v2951_v5 = vsel %vm2884_vm5, %v5978_v57, -inf }
 0x39b   : > { %v2856_v41 = vpop.f32.mrf.mxu0  ;;  %v2899_v54 = vadd.f32 %v2898_v2, %v2897_v18  ;;  %v2944_v1 = vmax.f32 %v2941_v11, %v2943_v63  ;;  %v2954_v34 = vmax.f32 %v2951_v5, %v2953_v26 }
 0x39c   : > { %v5988_v38 = vadd.f32 %v5923_v22, %v2856_v41  ;;  %v2911_v13 = vsel %vm2884_vm5, %v5993_v42, 0.0  ;;  %v2955_v40 = vsel %vm2884_vm5, %v5993_v42, -inf }
 0x39d   : > { %v4483_v20 = vpop.f32.mrf.mxu0  ;;  %v2900_v14 = vrot.slane %v2899_v54, 4  ;;  %v2945_v25 = vrot.slane %v2944_v1, 4 }
 0x39e   : > { %v2907_v60 = vsel %vm2884_vm5, %v5988_v38, 0.0  ;;  %v2952_v29 = vsel %vm2884_vm5, %v5988_v38, -inf  ;;  %v6015_v0 = vadd.f32 %v4483_v20, %v5923_v22 }
 0x39f   : > { %v2869_v56 = vpop.f32.mrf.mxu0  ;;  %v2908_v37 = vadd.f32 %v2907_v60, %v2906_v3  ;;  %v2901_v39 = vadd.f32 %v2900_v14, %v2899_v54  ;;  %v2956_v35 = vmax.f32 %v2952_v29, %v2955_v40  ;;  %v2946_v30 = vmax.f32 %v2944_v1, %v2945_v25 }
 0x3a0   : > { %v6002_v27 = vadd.f32 %v5923_v22, %v2869_v56  ;;  %v2917_v52 = vsel %vm2884_vm5, %v6015_v0, 0.0 }
 0x3a1   : > { %v4484_v17 = vpop.f32.mrf.mxu0  ;;  %v2910_v6 = vadd.f32 %v2909_v23, %v2908_v37  ;;  %v2902_v16 = vrot.slane %v2901_v39, 2  ;;  %v2947_v41 = vrot.slane %v2946_v30, 2 }
 0x3a2   : > { %v2957_v19 = vsel %vm2884_vm5, %v6002_v27, -inf  ;;  %v2913_v15 = vsel %vm2884_vm5, %v6002_v27, 0.0  ;;  %v6020_v33 = vadd.f32 %v4484_v17, %v5923_v22 }
 0x3a3   : > { %v2872_v24 = vpop.f32.mrf.mxu0  ;;  %v2912_v9 = vadd.f32 %v2911_v13, %v2910_v6  ;;  %v2958_v45 = vmax.f32 %v2954_v34, %v2957_v19  ;;  %v2903_v7 = vadd.f32 %v2902_v16, %v2901_v39  ;;  %v2948_v54 = vmax.f32 %v2946_v30, %v2947_v41  ;;  %v3046_v19 = vld [vmem:[%s6490_s10] sm:$0x1] }
 0x3a4   : > { %v6023_v58 = vadd.f32 %v5923_v22, %v2872_v24  ;;  %v2961_v22 = vsel %vm2884_vm5, %v6015_v0, -inf  ;;  %v2963_v55 = vsel %vm2884_vm5, %v6020_v33, -inf  ;;  %v2919_v32 = vsel %vm2884_vm5, %v6020_v33, 0.0 }
 0x3a5   : > { %v2914_v53 = vadd.f32 %v2913_v15, %v2912_v9  ;;  %v2962_v28 = vmax.f32 %v2958_v45, %v2961_v22  ;;  %v2904_v11 = vrot.slane %v2903_v7, 1  ;;  %v2949_v23 = vrot.slane %v2948_v54, 1 }
 0x3a6   : > { %v2915_v10 = vsel %vm2884_vm5, %v6023_v58, 0.0  ;;  %v2959_v48 = vsel %vm2884_vm5, %v6023_v58, -inf  ;;  %v3052_v9 = vsel %vm1298_vm3, %v3046_v19, 0  ;;  %vm3432_vm3 = vcmask 917312  }
 0x3a7   : > { %v2916_v46 = vadd.f32 %v2915_v10, %v2914_v53  ;;  %v2960_v31 = vmax.f32 %v2956_v35, %v2959_v48  ;;  %v2905_v37 = vadd.f32 %v2904_v11, %v2903_v7  ;;  %v2950_v13 = vmax.f32 %v2948_v54, %v2949_v23 }
 0x3a9   : > { %v2918_v49 = vadd.f32 %v2917_v52, %v2916_v46  ;;  %v2964_v50 = vmax.f32 %v2960_v31, %v2963_v55  ;;  %v2928_v26 = vmul.f32 0.015625, %v2905_v37 }
 0x3ab   : > { %v2920_v12 = vadd.f32 %v2919_v32, %v2918_v49  ;;  %v2965_v18 = vmax.f32 %v2962_v28, %v2964_v50  ;;  %v4659_v49 = vmov 1966171168   ;;  %v3108_v32 = vlaneseq }
 0x3ac   : > { %v3106_v50 = vunpack.c.l.s4 %v4659_v49  ;;  %v4582_v49 = vld [vmem:[%s6491_s11 + $0x20] sm:$0xff]  }
 0x3ad   : > { %v2921_v63 = vrot.slane %v2920_v12, 4  ;;  %v2966_v61 = vrot.slane %v2965_v18, 4 }
 0x3af   : > { %v2922_v2 = vadd.f32 %v2921_v63, %v2920_v12  ;;  %v2967_v20 = vmax.f32 %v2965_v18, %v2966_v61  ;;  %v3107_v12 = vunpack.c.0.s8 %v3106_v50  ;;  %v6046_v18 = vshrl.u32 %v3108_v32, 7 }
 0x3b1   : > { %v2923_v3 = vrot.slane %v2922_v2, 2  ;;  %v2968_v60 = vrot.slane %v2967_v20, 2  ;;  %v3110_v7 = vsub.s32 %v3107_v12, %v6046_v18  ;;  %v6050_v61 = vsub.s32 0, %v6046_v18 }
 0x3b3   : > { %v2924_v56 = vadd.f32 %v2923_v3, %v2922_v2  ;;  %v2969_v1 = vmax.f32 %v2967_v20, %v2968_v60 }
 0x3b5   : > { %v2925_v5 = vrot.slane %v2924_v56, 1  ;;  %v2970_v17 = vrot.slane %v2969_v1, 1 }
 0x3b7   : > { %v2926_v14 = vadd.f32 %v2925_v5, %v2924_v56  ;;  %v2971_v6 = vmax.f32 %v2969_v1, %v2970_v17 }
 0x3b9   : > { %v2929_v29 = vmul.f32 0.015625, %v2926_v14  ;;  %v2980_v25 = vsel %vm2979_vm7, %v2971_v6, %v2950_v13  ;;  %vm3335_vm7 = vcmask 523712  }
 0x3bb   : > { %v2975_v24 = vsel %vm2974_vm6, %v2929_v29, %v2928_v26 }
 0x3bc   : > { %v2983_v34 = vsel %vm2982_vm8, %v2975_v24, %v2980_v25  ;;  %vm3446_vm8 = vcmask 1048512  }
 0x3bd   : > { %v2984_v40 = vpack.c.bf16 %v2983_v34, %v2983_v34 }
 0x3bf   : > { %4490 = vmatmul.mubr.msk.bf16.vlgmr.msra.gmra.mxu1 %vm2884_vm5, %v2984_v40 }
 0x3c0   : > { %4494 = vmatpush3.bf16.msra.mxu1 %v3052_v9  ;;  %4495 = vmatprep.mubr.msk.bf16.mxu1 %vm4658_vm4, %v6602_v36  ;;  %vm3328_vm4 = vcmask 458112  }
 0x47f   : > { %v3038_v15 = vpop.f32.mrf.mxu1 }
 0x480   : > { %v3044_v39 = vmax.f32 %v3038_v15, 0.0 }
 0x481   : > { %v4491_v35 = vpop.f32.mrf.mxu1 }
 0x482   : > { %v3045_v53 = vpack.c.bf16 %v3044_v39, %v3044_v39 }
 0x483   : > { %v3041_v45 = vpop.f32.mrf.mxu1 }
 0x484   : > { %4496 = vmatmul.mubr.msk.bf16.vlgmr.msra.gmra.mxu1 %vm3047_vm9, %v3045_v53  ;;  %vm3489_vm9 = vcmask 523264  }
 0x485   : > { %v4492_v10 = vpop.f32.mrf.mxu1 }
 0x544   : > { %v3088_v48 = vpop.f32.mrf.mxu1 }
 0x545   : > { %v3095_v46 = vrot.slane %v3088_v48, 2 }
 0x546   : > { %v4497_v31 = vpop.f32.mrf.mxu1 }
 0x547   : > { %v3097_v30 = vadd.f32 %v3095_v46, %v3088_v48  ;;  %v4579_v31 = vld [vmem:[%s6491_s11 + $0x38] sm:$0xff]  }
 0x548   : > { %v3091_v52 = vpop.f32.mrf.mxu1  ;;  %4500 = vmatpush3.bf16.msra.mxu0 %v4579_v31 }
 0x549   : > { %v4024_v22 = vmul.f32 -1.442695, %v3097_v30  ;;  %4501 = vmatprep.subr.bf16.mxu0 %v6602_v36 }
 0x54a   : > { %v4498_v55 = vpop.f32.mrf.mxu1 }
 0x54b   : > { %4587 = vpow2.f32 %v4024_v22  ;;  %v4581_v55 = vld [vmem:[%s6491_s11 + $0x28] sm:$0xff]  }
 0x558   : > { %v4588_v16 = vpop.eup %4587 }
 0x559   : > { %v3101_v28 = vadd.f32 1.0, %v4588_v16 }
 0x55b   : > { %4589 = vrcp.f32 %v3101_v28 }
 0x568   : > { %v4590_v41 = vpop.eup %4589 }
 0x569   : > { %v3111_v63 = vrot.slane %v4590_v41, %v3110_v7  ;;  %v4584_v41 = vld [vmem:[%s6491_s11 + $0x10] sm:$0xff]  }
 0x56b   : > { %v3112_v2 = vcombine.high %v3111_v63, %v3111_v63  ;;  %v3119_v20 = vrot.slane %v3111_v63, %v3110_v7  ;;  %v4585_v63 = vld [vmem:[%s6491_s11 + $0x8] sm:$0xff]  }
 0x56d   : > { %v3126_v11 = vrot.slane %v3112_v2, %v3110_v7  ;;  %v3130_v54 = vrot.slane %v3119_v20, %v6050_v61  ;;  %v4583_v7 = vld [vmem:[%s6491_s11 + $0x18] sm:$0xff]   ;;  %v4586_v2 = vld [vmem:[%s6491_s11] sm:$0xff]  }
 0x56f   : > { %v3134_v3 = vrot.slane %v3126_v11, %v6050_v61  ;;  %v6055_v60 = vmul.f32 %v3130_v54, %v5932_v47  ;;  %v6058_v56 = vmul.f32 %v3130_v54, %v5926_v8  ;;  %v6072_v8 = vmul.f32 %v3130_v54, %v5929_v44 }
 0x570   : > { %v6082_v6 = vmul.f32 %v3130_v54, %v5937_v4  ;;  %v6099_v29 = vmul.f32 %v3130_v54, %v5944_v59  ;;  %v6113_v34 = vmul.f32 %v3130_v54, %v5953_v21  ;;  %v6127_v39 = vmul.f32 %v3130_v54, %v5960_v51 }
 0x571   : > { %v3221_v1 = vsel %vm2884_vm5, %v6055_v60, -inf  ;;  %v3153_v37 = vsel %vm2884_vm5, %v6058_v56, 0.0  ;;  %v6065_v23 = vmul.f32 %v3134_v3, %v5978_v57  ;;  %v3156_v5 = vsel %vm2884_vm5, %v6055_v60, 0.0 }
 0x572   : > { %3222 = vmax.xlane.f32.xlu1 %v3221_v1  ;;  %3154 = vadd.xlane.f32.xlu0 %v3153_v37  ;;  %v6075_v17 = vmul.f32 %v3134_v3, %v5988_v38  ;;  %v3159_v57 = vsel %vm2884_vm5, %v6072_v8, 0.0  ;;  %v6085_v26 = vmul.f32 %v3134_v3, %v5985_v43  ;;  %v3162_v44 = vsel %vm2884_vm5, %v6082_v6, 0.0 }
 0x573   : > { %v3177_v47 = vsel %vm2884_vm5, %v6065_v23, 0.0  ;;  %v6092_v13 = vmul.f32 %v3134_v3, %v5993_v42  ;;  %v3218_v4 = vsel %vm2884_vm5, %v6058_v56, -inf  ;;  %v3165_v19 = vsel %vm2884_vm5, %v6099_v29, 0.0 }
 0x574   : > { %v3180_v14 = vsel %vm2884_vm5, %v6075_v17, 0.0  ;;  %v3183_v38 = vsel %vm2884_vm5, %v6085_v26, 0.0  ;;  %v3245_v42 = vsel %vm2884_vm5, %v6075_v17, -inf  ;;  %v6106_v24 = vmul.f32 %v3134_v3, %v6002_v27 }
 0x575   : > { %6603 = vst [vmem:[#allocation42_spill] sm:$0xff] %v6092_v13  ;;  %v3186_v43 = vsel %vm2884_vm5, %v6092_v13, 0.0  ;;  %v3224_v25 = vsel %vm2884_vm5, %v6072_v8, -inf  ;;  %v3168_v40 = vsel %vm2884_vm5, %v6113_v34, 0.0  ;;  %v3248_v27 = vsel %vm2884_vm5, %v6085_v26, -inf }
 0x576   : > { %3157 = vadd.xlane.f32.xlu0 %v3156_v5  ;;  %3178 = vadd.xlane.f32.xlu1 %v3177_v47  ;;  %6604 = vst [vmem:[#allocation27_spill] sm:$0xff] %v6106_v24  ;;  %v3189_v59 = vsel %vm2884_vm5, %v6106_v24, 0.0  ;;  %v6120_v9 = vmul.f32 %v3134_v3, %v6023_v58  ;;  %v3227_v15 = vsel %vm2884_vm5, %v6082_v6, -inf  ;;  %v3171_v35 = vsel %vm2884_vm5, %v6127_v39, 0.0 }
 0x577   : > { %v3251_v58 = vsel %vm2884_vm5, %v6092_v13, -inf  ;;  %v6134_v53 = vmul.f32 %v3134_v3, %v6015_v0  ;;  %v3230_v45 = vsel %vm2884_vm5, %v6099_v29, -inf  ;;  %v6141_v10 = vmul.f32 %v3130_v54, %v5971_v62 }
 0x578   : > { %6605 = vst [vmem:[#allocation29_spill] sm:$0xff] %v6120_v9  ;;  %v3192_v21 = vsel %vm2884_vm5, %v6120_v9, 0.0  ;;  %v3254_v0 = vsel %vm2884_vm5, %v6106_v24, -inf  ;;  %v6148_v46 = vmul.f32 %v3134_v3, %v6020_v33  ;;  %v3233_v62 = vsel %vm2884_vm5, %v6113_v34, -inf  ;;  %v4580_v33 = vld [vmem:[%s6491_s11 + $0x30] sm:$0xff]  }
 0x579   : > { %6606 = vst [vmem:[#allocation25_spill] sm:$0xff] %v6134_v53  ;;  %v3195_v51 = vsel %vm2884_vm5, %v6134_v53, 0.0  ;;  %v3174_v48 = vsel %vm2884_vm5, %v6141_v10, 0.0  ;;  %v3242_v52 = vsel %vm2884_vm5, %v6065_v23, -inf  ;;  %v3257_v22 = vsel %vm2884_vm5, %v6120_v9, -inf  ;;  %4502 = vmatpush3.bf16.msra.mxu0 %v4580_v33 }
 0x57a   : > { %3160 = vadd.xlane.f32.xlu0 %v3159_v57  ;;  %3181 = vadd.xlane.f32.xlu1 %v3180_v14  ;;  %6607 = vst [vmem:[#allocation36_spill] sm:$0xff] %v6148_v46  ;;  %v3198_v30 = vsel %vm2884_vm5, %v6148_v46, 0.0  ;;  %v3236_v16 = vsel %vm2884_vm5, %v6127_v39, -inf  ;;  %v3260_v28 = vsel %vm2884_vm5, %v6134_v53, -inf  ;;  %v3239_v50 = vsel %vm2884_vm5, %v6141_v10, -inf }
 0x57b   : > { %4503 = vmatprep.subr.bf16.mxu0 %v6602_v36  ;;  %v3263_v12 = vsel %vm2884_vm5, %v6148_v46, -inf  ;;  %vm3439_vm5 = vcmask 982912  }
 0x57d   : > { %4504 = vmatpush3.bf16.msra.mxu0 %v4581_v55 }
 0x57e   : > { %3163 = vadd.xlane.f32.xlu0 %v3162_v44  ;;  %3184 = vadd.xlane.f32.xlu1 %v3183_v38 }
 0x57f   : > { %4505 = vmatprep.subr.bf16.mxu0 %v6602_v36 }
 0x581   : > { %4506 = vmatpush3.bf16.msra.mxu0 %v4582_v49 }
 0x582   : > { %3219 = vmax.xlane.f32.xlu0 %v3218_v4  ;;  %3187 = vadd.xlane.f32.xlu1 %v3186_v43 }
 0x583   : > { %4507 = vmatprep.subr.bf16.mxu0 %v6602_v36 }
 0x585   : > { %4508 = vmatpush3.bf16.msra.mxu0 %v4583_v7 }
 0x586   : > { %3166 = vadd.xlane.f32.xlu0 %v3165_v19  ;;  %3246 = vmax.xlane.f32.xlu1 %v3245_v42  ;;  %v3283_v42 = vand.u32 127, %v3108_v32 }
 0x587   : > { %4509 = vmatprep.subr.bf16.mxu0 %v6602_v36 }
 0x588   : > { %v3316_v31 = vadd.s32 4294967256, %v3283_v42  ;;  %v6222_v32 = vsub.s32 %v3283_v42, %v6046_v18  ;;  %v3434_v13 = vadd.s32 4294967184, %v3283_v42 }
 0x589   : > { %4510 = vmatpush3.bf16.msra.mxu0 %v4584_v41  ;;  %v3420_v41 = vadd.s32 4294967200, %v3283_v42 }
 0x58a   : > { %3225 = vmax.xlane.f32.xlu0 %v3224_v25  ;;  %3190 = vadd.xlane.f32.xlu1 %v3189_v59  ;;  %v6243_v7 = vsub.s32 %v3316_v31, %v6046_v18 }
 0x58b   : > { %4511 = vmatprep.subr.bf16.mxu0 %v6602_v36  ;;  %v6254_v24 = vsub.s32 %v3420_v41, %v6046_v18 }
 0x58d   : > { %4512 = vmatpush3.bf16.msra.mxu0 %v4585_v63  ;;  %v3330_v63 = vadd.s32 4294967240, %v3283_v42 }
 0x58e   : > { %3169 = vadd.xlane.f32.xlu0 %v3168_v40  ;;  %3249 = vmax.xlane.f32.xlu1 %v3248_v27  ;;  %v3399_v40 = vadd.s32 4294967224, %v3283_v42  ;;  %v3288_v27 = vadd.s32 4294967288, %v3283_v42 }
 0x58f   : > { %4513 = vmatprep.subr.bf16.mxu0 %v6602_v36 }
 0x591   : > { %4514 = vmatpush3.bf16.msra.mxu0 %v4586_v2 }
 0x592   : > { %3228 = vmax.xlane.f32.xlu0 %v3227_v15  ;;  %3193 = vadd.xlane.f32.xlu1 %v3192_v21  ;;  %v3295_v15 = vadd.s32 4294967280, %v3283_v42  ;;  %v3302_v21 = vadd.s32 4294967272, %v3283_v42 }
 0x594   : > { %v6226_v33 = vsub.s32 %v3295_v15, %v6046_v18  ;;  %v3427_v15 = vadd.s32 4294967192, %v3283_v42 }
 0x596   : > { %3172 = vadd.xlane.f32.xlu0 %v3171_v35  ;;  %3252 = vmax.xlane.f32.xlu1 %v3251_v58  ;;  %v3394_v35 = vadd.s32 4294967232, %v3283_v42  ;;  %v3309_v58 = vadd.s32 4294967264, %v3283_v42 }
 0x598   : > { %v6232_v55 = vsub.s32 %v3394_v35, %v6046_v18 }
 0x59a   : > { %3231 = vmax.xlane.f32.xlu0 %v3230_v45  ;;  %3196 = vadd.xlane.f32.xlu1 %v3195_v51  ;;  %v3406_v45 = vadd.s32 4294967216, %v3283_v42 }
 0x59e   : > { %3175 = vadd.xlane.f32.xlu0 %v3174_v48  ;;  %3255 = vmax.xlane.f32.xlu1 %v3254_v0  ;;  %v6219_v0 = vsub.s32 %v3399_v40, %v6046_v18 }
 0x5a2   : > { %3234 = vmax.xlane.f32.xlu0 %v3233_v62  ;;  %3199 = vadd.xlane.f32.xlu1 %v3198_v30  ;;  %v3291_v62 = vsub.s32 %v3288_v27, %v6046_v18  ;;  %v3413_v30 = vadd.s32 4294967208, %v3283_v42 }
 0x5a4   : > { %v6246_v27 = vsub.s32 %v3413_v30, %v6046_v18  ;;  %v6257_v30 = vsub.s32 %v3330_v63, %v6046_v18 }
 0x5a6   : > { %3243 = vmax.xlane.f32.xlu0 %v3242_v52  ;;  %3258 = vmax.xlane.f32.xlu1 %v3257_v22  ;;  %v6229_v52 = vsub.s32 %v3302_v21, %v6046_v18  ;;  %v3323_v22 = vadd.s32 4294967248, %v3283_v42 }
 0x5aa   : > { %3237 = vmax.xlane.f32.xlu0 %v3236_v16  ;;  %3261 = vmax.xlane.f32.xlu1 %v3260_v28  ;;  %v6235_v16 = vsub.s32 %v3309_v58, %v6046_v18  ;;  %v6238_v28 = vsub.s32 %v3406_v45, %v6046_v18  ;;  %v6249_v45 = vsub.s32 %v3323_v22, %v6046_v18 }
 0x5ae   : > { %3240 = vmax.xlane.f32.xlu0 %v3239_v50  ;;  %3264 = vmax.xlane.f32.xlu1 %v3263_v12 }
 0x5fb   : > { %v6197_v20 = vpop.xlane.xlu1 %3222  ;;  %v3155_v11 = vpop.xlane.xlu0 %3154 }
 0x5fc   : > { %v3202_v21 = vmul.f32 0.03125, %v3155_v11 }
 0x5ff   : > { %v3158_v54 = vpop.xlane.xlu0 %3157  ;;  %v3179_v3 = vpop.xlane.xlu1 %3178 }
 0x600   : > { %v3203_v12 = vmul.f32 0.03125, %v3158_v54  ;;  %v3210_v54 = vmul.f32 0.03125, %v3179_v3  ;;  %v3441_v3 = vadd.s32 4294967176, %v3283_v42  ;;  %v6274_v42 = vsub.s32 %v3434_v13, %v6046_v18 }
 0x602   : > { %v3444_v13 = vsub.s32 %v3441_v3, %v6046_v18 }
 0x603   : > { %v3161_v1 = vpop.xlane.xlu0 %3160  ;;  %v3182_v37 = vpop.xlane.xlu1 %3181 }
 0x604   : > { %v3204_v2 = vmul.f32 0.03125, %v3161_v1  ;;  %v3211_v40 = vmul.f32 0.03125, %v3182_v37  ;;  %v3292_v1 = vrot.slane %v3203_v12, %v3291_v62  ;;  %v3340_v12 = vrot.slane %v3210_v54, %v6222_v32 }
 0x606   : > { %v3299_v11 = vrot.slane %v3204_v2, %v6226_v33 }
 0x607   : > { %v3164_v5 = vpop.xlane.xlu0 %3163  ;;  %v3185_v47 = vpop.xlane.xlu1 %3184 }
 0x608   : > { %v3205_v35 = vmul.f32 0.03125, %v3164_v5  ;;  %v3212_v58 = vmul.f32 0.03125, %v3185_v47  ;;  %v3344_v5 = vrot.slane %v3211_v40, %v3291_v62  ;;  %v6261_v47 = vsub.s32 %v3427_v15, %v6046_v18 }
 0x609   : > { %v3403_v40 = vrot.slane %v6197_v20, %v6219_v0 }
 0x60a   : > { %v3349_v22 = vrot.slane %v3212_v58, %v6226_v33 }
 0x60b   : > { %v6199_v57 = vpop.xlane.xlu0 %3219  ;;  %v3188_v14 = vpop.xlane.xlu1 %3187 }
 0x60c   : > { %v3213_v46 = vmul.f32 0.03125, %v3188_v14  ;;  %v3287_v14 = vrot.slane %v3202_v21, %v6222_v32 }
 0x60e   : > { %v3354_v41 = vrot.slane %v3213_v46, %v6229_v52  ;;  %v3294_v33 = vsel %vm3293_vm10, %v3292_v1, %v3287_v14  ;;  %v3345_v46 = vsel %vm3293_vm10, %v3344_v5, %v3340_v12 }
 0x60f   : > { %v3167_v44 = vpop.xlane.xlu0 %3166  ;;  %v6201_v38 = vpop.xlane.xlu1 %3246  ;;  %v3350_v15 = vsel %vm3300_vm11, %v3349_v22, %v3345_v46 }
 0x610   : > { %v3206_v9 = vmul.f32 0.03125, %v3167_v44  ;;  %v3306_v44 = vrot.slane %v3205_v35, %v6229_v52 }
 0x612   : > { %v3313_v63 = vrot.slane %v3206_v9, %v6235_v16  ;;  %v3301_v9 = vsel %vm3300_vm11, %v3299_v11, %v3294_v33 }
 0x613   : > { %v6203_v36 = vpop.xlane.xlu0 %3225  ;;  %v3191_v4 = vpop.xlane.xlu1 %3190  ;;  %v3308_v20 = vsel %vm3307_vm12, %v3306_v44, %v3301_v9 }
 0x614   : > { %v3214_v37 = vmul.f32 0.03125, %v3191_v4  ;;  %v3398_v4 = vrot.slane %v6199_v57, %v6232_v55  ;;  %v3410_v57 = vrot.slane %v6203_v36, %v6238_v28  ;;  %v3315_v35 = vsel %vm3314_vm14, %v3313_v63, %v3308_v20 }
 0x616   : > { %v3359_v32 = vrot.slane %v3214_v37, %v6235_v16  ;;  %v3405_v21 = vsel %vm3404_vm13, %v3403_v40, %v3398_v4  ;;  %v3355_v16 = vsel %vm3307_vm12, %v3354_v41, %v3350_v15 }
 0x617   : > { %v6205_v43 = vpop.xlane.xlu0 %3169  ;;  %v6207_v19 = vpop.xlane.xlu1 %3249  ;;  %v3412_v37 = vsel %vm3411_vm15, %v3410_v57, %v3405_v21 }
 0x618   : > { %v3207_v52 = vmul.f32 0.03125, %v6205_v43  ;;  %v3455_v43 = vrot.slane %v6201_v38, %v6219_v0  ;;  %v3360_v11 = vsel %vm3314_vm14, %v3359_v32, %v3355_v16  ;;  %v3460_v14 = vrot.slane %v6207_v19, %v6238_v28 }
 0x61a   : > { %v3320_v3 = vrot.slane %v3207_v52, %v6243_v7 }
 0x61b   : > { %v6210_v25 = vpop.xlane.xlu0 %3228  ;;  %v6212_v59 = vpop.xlane.xlu1 %3193 }
 0x61c   : > { %v3215_v36 = vmul.f32 0.03125, %v6212_v59  ;;  %v3417_v44 = vrot.slane %v6210_v25, %v6246_v27  ;;  %v3322_v33 = vsel %vm3321_vm1, %v3320_v3, %v3315_v35 }
 0x61e   : > { %v3364_v0 = vrot.slane %v3215_v36, %v6243_v7 }
 0x61f   : > { %v6214_v51 = vpop.xlane.xlu0 %3172  ;;  %v6216_v48 = vpop.xlane.xlu1 %3252 }
 0x620   : > { %v3208_v38 = vmul.f32 0.03125, %v6214_v51 }
 0x623   : > { %v6240_v49 = vpop.xlane.xlu0 %3231  ;;  %v3197_v50 = vpop.xlane.xlu1 %3196 }
 0x624   : > { %v3216_v58 = vmul.f32 0.03125, %v3197_v50  ;;  %v3465_v50 = vrot.slane %v6216_v48, %v6246_v27 }
 0x626   : > { %v3369_v12 = vrot.slane %v3216_v58, %v6249_v45 }
 0x627   : > { %v3176_v31 = vpop.xlane.xlu0 %3175  ;;  %v6251_v53 = vpop.xlane.xlu1 %3255 }
 0x628   : > { %v3209_v22 = vmul.f32 0.03125, %v3176_v31  ;;  %v3470_v19 = vrot.slane %v6251_v53, %v6254_v24  ;;  %v3419_v53 = vsel %vm3418_vm0, %v3417_v44, %v3412_v37 }
 0x62b   : > { %v6271_v62 = vpop.xlane.xlu0 %3234  ;;  %v3200_v2 = vpop.xlane.xlu1 %3199 }
 0x62c   : > { %v3217_v5 = vmul.f32 0.03125, %v3200_v2  ;;  %v3431_v7 = vrot.slane %v6271_v62, %v6261_v47  ;;  %v3365_v2 = vsel %vm3321_vm1, %v3364_v0, %v3360_v11  ;;  %v3334_v62 = vrot.slane %v3209_v22, %v6257_v30  ;;  %v6608_v22 = vld [vmem:[#allocation16_spill] sm:$0xff] }
 0x62e   : > { %v3374_v48 = vrot.slane %v3217_v5, %v6257_v30 }
 0x62f   : > { %v3244_v54 = vpop.xlane.xlu0 %3243  ;;  %v3259_v1 = vpop.xlane.xlu1 %3258 }
 0x630   : > { %v3451_v59 = vrot.slane %v3244_v54, %v6232_v55  ;;  %v3424_v55 = vrot.slane %v6240_v49, %v6254_v24  ;;  %v3475_v31 = vrot.slane %v3259_v1, %v6261_v47  ;;  %v3327_v49 = vrot.slane %v3208_v38, %v6249_v45 }
 0x631   : > { %v3370_v45 = vsel %vm3328_vm4, %v3369_v12, %v3365_v2  ;;  %v3639_v38 = vsub.s32 1, %v6046_v18 }
 0x632   : > { %v3456_v4 = vsel %vm3404_vm13, %v3455_v43, %v3451_v59  ;;  %v3426_v47 = vsel %vm3425_vm2, %v3424_v55, %v3419_v53  ;;  %v3329_v20 = vsel %vm3328_vm4, %v3327_v49, %v3322_v33  ;;  %v6609_v55 = vld [vmem:[#allocation18_spill] sm:$0xff]  ;;  %v6612_v33 = vld [vmem:[#allocation17_spill] sm:$0xff] }
 0x633   : > { %v3461_v25 = vsel %vm3411_vm15, %v3460_v14, %v3456_v4  ;;  %v3238_v28 = vpop.xlane.xlu0 %3237  ;;  %v3262_v51 = vpop.xlane.xlu1 %3261  ;;  %v3433_v9 = vsel %vm3432_vm3, %v3431_v7, %v3426_v47  ;;  %v3336_v21 = vsel %vm3335_vm7, %v3334_v62, %v3329_v20  ;;  %v6610_v7 = vld [vmem:[#allocation15_spill] sm:$0xff] }
 0x634   : > { %v3466_v27 = vsel %vm3418_vm0, %v3465_v50, %v3461_v25  ;;  %v3438_v63 = vrot.slane %v3238_v28, %v6274_v42  ;;  %v3480_v24 = vrot.slane %v3262_v51, %v6274_v42  ;;  %v3375_v42 = vsel %vm3335_vm7, %v3374_v48, %v3370_v45  ;;  %v6613_v45 = vld [vmem:[#allocation19_spill] sm:$0xff] }
 0x635   : > { %v3471_v41 = vsel %vm3425_vm2, %v3470_v19, %v3466_v27  ;;  %v3376_v35 = vsel %vm2974_vm6, %v3375_v42, %v3336_v21  ;;  %v6611_v27 = vld [vmem:[#allocation20_spill] sm:$0xff]  ;;  %v6614_v21 = vld [vmem:[#allocation22_spill] sm:$0xff] }
 0x636   : > { %v3476_v40 = vsel %vm3432_vm3, %v3475_v31, %v3471_v41  ;;  %v3440_v30 = vsel %vm3439_vm5, %v3438_v63, %v3433_v9 }
 0x637   : > { %v3241_v57 = vpop.xlane.xlu0 %3240  ;;  %v3265_v32 = vpop.xlane.xlu1 %3264  ;;  %v3481_v15 = vsel %vm3439_vm5, %v3480_v24, %v3476_v40 }
 0x638   : > { %v3445_v46 = vrot.slane %v3241_v57, %v3444_v13  ;;  %v3485_v52 = vrot.slane %v3265_v32, %v3444_v13 }
 0x63a   : > { %v3447_v36 = vsel %vm3446_vm8, %v3445_v46, %v3440_v30  ;;  %v3486_v16 = vsel %vm3446_vm8, %v3485_v52, %v3481_v15 }
 0x63b   : > { %v3487_v43 = vsel %vm2974_vm6, %v3486_v16, %v3447_v36  ;;  %vm3784_vm6 = vcmask 257024   ;;  %v6615_v16 = vld [vmem:[#allocation23_spill] sm:$0xff] }
 0x63c   : > { %v3490_v58 = vsel %vm3489_vm9, %v3376_v35, %v3487_v43 }
 0x63d   : > { %v3491_v54 = vpack.c.bf16 %v3490_v58, %v3490_v58 }
 0x63f   : > { %4516 = vmatmul.mubr.bf16.vlgmr.msra.gmra.mxu0 %v3491_v54 }
 0x6ff   : > { %v3590_v1 = vpop.f32.mrf.mxu0 }
 0x700   : > { %v4033_v13 = vmul.f32 -1.442695, %v3590_v1 }
 0x701   : > { %v4517_v37 = vpop.f32.mrf.mxu0 }
 0x702   : > { %4591 = vpow2.f32 %v4033_v13 }
 0x703   : > { %v3593_v11 = vpop.f32.mrf.mxu0 }
 0x705   : > { %v4518_v5 = vpop.f32.mrf.mxu0 }
 0x70f   : > { %v4592_v59 = vpop.eup %4591 }
 0x710   : > { %v3599_v3 = vadd.f32 1.0, %v4592_v59  ;;  %v6616_v59 = vld [vmem:[#allocation21_spill] sm:$0xff] }
 0x712   : > { %4593 = vrcp.f32 %v3599_v3 }
 0x71f   : > { %v4594_v14 = vpop.eup %4593 }
 0x720   : > { %v3605_v44 = vrot.slane %v4594_v14, %v6050_v61  ;;  %v3640_v0 = vrot.slane %v4594_v14, %v3639_v38  ;;  %v6342_v61 = vld [vmem:[%s6482_s2] ss:$0 sm:$0xff]  ;;  %v6617_v14 = vld [vmem:[#allocation10_spill] sm:$0xff] }
 0x721   : > { %v695_v4 = vadd.f32 %v6342_v61, %v6608_v22  ;;  %v698_v12 = vadd.f32 %v6342_v61, %v6609_v55  ;;  %v703_v48 = vadd.f32 %v6610_v7, %v6342_v61  ;;  %v711_v31 = vadd.f32 %v6342_v61, %v6611_v27 }
 0x722   : > { %3611 = vbcast.lane.b32.xlu1 %v3605_v44, 264  ;;  %3607 = vbcast.lane.b32.xlu0 %v3605_v44, 256  ;;  %v706_v47 = vadd.f32 %v6612_v33, %v6342_v61  ;;  %v719_v57 = vadd.f32 %v6613_v45, %v6342_v61  ;;  %v714_v36 = vadd.f32 %v6342_v61, %v6614_v21  ;;  %v6623_v45 = vld [vmem:[#allocation42_spill] sm:$0xff] }
 0x723   : > { %v727_v35 = vadd.f32 %v6342_v61, %v6615_v16  ;;  %v722_v3 = vadd.f32 %v6616_v59, %v6342_v61 }
 0x726   : > { %3615 = vbcast.lane.b32.xlu1 %v3605_v44, 272  ;;  %3623 = vbcast.lane.b32.xlu0 %v3605_v44, 288 }
 0x72a   : > { %3619 = vbcast.lane.b32.xlu1 %v3605_v44, 280  ;;  %3631 = vbcast.lane.b32.xlu0 %v3605_v44, 304 }
 0x72e   : > { %3627 = vbcast.lane.b32.xlu1 %v3605_v44, 296  ;;  %3642 = vbcast.lane.b32.xlu0 %v3640_v0, 256 }
 0x732   : > { %3635 = vbcast.lane.b32.xlu1 %v3605_v44, 312  ;;  %3650 = vbcast.lane.b32.xlu0 %v3640_v0, 272  ;;  %v735_v44 = vadd.f32 %v6617_v14, %v6342_v61 }
 0x736   : > { %3646 = vbcast.lane.b32.xlu1 %v3640_v0, 264  ;;  %3658 = vbcast.lane.b32.xlu0 %v3640_v0, 288 }
 0x73a   : > { %3654 = vbcast.lane.b32.xlu1 %v3640_v0, 280  ;;  %3666 = vbcast.lane.b32.xlu0 %v3640_v0, 304 }
 0x73e   : > { %3662 = vbcast.lane.b32.xlu1 %v3640_v0, 296 }
 0x742   : > { %3670 = vbcast.lane.b32.xlu1 %v3640_v0, 312 }
 0x794   : > { %v3612_v18 = vpop.permute.xlu1 %3611  ;;  %v3608_v50 = vpop.permute.xlu0 %3607 }
 0x795   : > { %v3673_v19 = vmul.f32 %v3612_v18, %v6055_v60  ;;  %v3672_v25 = vmul.f32 %v3608_v50, %v6058_v56 }
 0x797   : > { %v3689_v28 = vadd.f32 %v3673_v19, %v698_v12  ;;  %v3688_v51 = vadd.f32 %v3672_v25, %v695_v4  ;;  %v6618_v19 = vld [vmem:[#allocation6_spill] sm:$0xff] }
 0x798   : > { %v3616_v49 = vpop.permute.xlu1 %3615  ;;  %v3624_v41 = vpop.permute.xlu0 %3623  ;;  %v743_v25 = vadd.f32 %v6342_v61, %v6618_v19 }
 0x799   : > { %v3705_v63 = vmax.f32 %v3689_v28, 0.0  ;;  %v3704_v24 = vmax.f32 %v3688_v51, 0.0  ;;  %v3674_v53 = vmul.f32 %v3616_v49, %v6072_v8  ;;  %v3676_v60 = vmul.f32 %v3624_v41, %v6099_v29  ;;  %v6619_v28 = vld [vmem:[#allocation12_spill] sm:$0xff] }
 0x79a   : > { %v730_v51 = vadd.f32 %v6342_v61, %v6619_v28 }
 0x79b   : > { %v4058_v56 = vpack.c.bf16 %v3705_v63, %v3705_v63  ;;  %v4057_v2 = vpack.c.bf16 %v3704_v24, %v3704_v24  ;;  %v3690_v62 = vadd.f32 %v3674_v53, %v703_v48  ;;  %v3692_v40 = vadd.f32 %v3676_v60, %v711_v31  ;;  %v6620_v31 = vld [vmem:[#allocation27_spill] sm:$0xff]  ;;  %v6621_v60 = vld [vmem:[#allocation5_spill] sm:$0xff] }
 0x79c   : > { %v3620_v32 = vpop.permute.xlu1 %3619  ;;  %v3632_v9 = vpop.permute.xlu0 %3631 }
 0x79d   : > { %3786 = vst.msk [vmem:[%s6363_s28 + $0x4] sm:$0xf] %vm3784_vm6, %v4058_v56  ;;  %3785 = vst.msk [vmem:[%s6363_s28] sm:$0xf] %vm3784_vm6, %v4057_v2  ;;  %v3706_v8 = vmax.f32 %v3690_v62, 0.0  ;;  %v3708_v29 = vmax.f32 %v3692_v40, 0.0  ;;  %v3675_v42 = vmul.f32 %v3620_v32, %v6082_v6  ;;  %v3678_v46 = vmul.f32 %v3632_v9, %v6127_v39 }
 0x79e   : > { %v751_v56 = vadd.f32 %v6621_v60, %v6342_v61  ;;  %v6622_v2 = vld [vmem:[#allocation9_spill] sm:$0xff] }
 0x79f   : > { %v4059_v52 = vpack.c.bf16 %v3706_v8, %v3706_v8  ;;  %v4061_v20 = vpack.c.bf16 %v3708_v29, %v3708_v29  ;;  %v3691_v30 = vadd.f32 %v3675_v42, %v706_v47  ;;  %v3694_v15 = vadd.f32 %v3678_v46, %v719_v57  ;;  %v6624_v32 = vld [vmem:[#allocation25_spill] sm:$0xff] }
 0x7a0   : > { %v3628_v43 = vpop.permute.xlu1 %3627  ;;  %v3643_v58 = vpop.permute.xlu0 %3642  ;;  %v738_v62 = vadd.f32 %v6622_v2, %v6342_v61 }
 0x7a1   : > { %3787 = vst.msk [vmem:[%s6363_s28 + $0x8] sm:$0xf] %vm3784_vm6, %v4059_v52  ;;  %3789 = vst.msk [vmem:[%s6363_s28 + $0x10] sm:$0xf] %vm3784_vm6, %v4061_v20  ;;  %v3707_v6 = vmax.f32 %v3691_v30, 0.0  ;;  %v3710_v39 = vmax.f32 %v3694_v15, 0.0  ;;  %v3677_v54 = vmul.f32 %v3628_v43, %v6113_v34  ;;  %v3680_v1 = vmul.f32 %v3643_v58, %v6065_v23 }
 0x7a2   : > { %v6625_v20 = vld [vmem:[#allocation8_spill] sm:$0xff] }
 0x7a3   : > { %v4060_v13 = vpack.c.bf16 %v3707_v6, %v3707_v6  ;;  %v4063_v37 = vpack.c.bf16 %v3710_v39, %v3710_v39  ;;  %v3693_v11 = vadd.f32 %v3677_v54, %v714_v36  ;;  %v3696_v5 = vadd.f32 %v3680_v1, %v727_v35  ;;  %v6626_v36 = vld [vmem:[#allocation29_spill] sm:$0xff]  ;;  %v6627_v39 = vld [vmem:[#allocation7_spill] sm:$0xff] }
 0x7a4   : > { %v3636_v38 = vpop.permute.xlu1 %3635  ;;  %v3651_v0 = vpop.permute.xlu0 %3650  ;;  %v746_v30 = vadd.f32 %v6342_v61, %v6625_v20  ;;  %v754_v54 = vadd.f32 %v6627_v39, %v6342_v61 }
 0x7a5   : > { %3788 = vst.msk [vmem:[%s6363_s28 + $0xc] sm:$0xf] %vm3784_vm6, %v4060_v13  ;;  %3791 = vst.msk [vmem:[%s6363_s28 + $0x18] sm:$0xf] %vm3784_vm6, %v4063_v37  ;;  %v3709_v34 = vmax.f32 %v3693_v11, 0.0  ;;  %v3712_v23 = vmax.f32 %v3696_v5, 0.0  ;;  %v3679_v18 = vmul.f32 %v3636_v38, %v6141_v10  ;;  %v3682_v50 = vmul.f32 %v3651_v0, %v6085_v26 }
 0x7a6   : > { %v6628_v13 = vld [vmem:[#allocation36_spill] sm:$0xff] }
 0x7a7   : > { %v4062_v22 = vpack.c.bf16 %v3709_v34, %v3709_v34  ;;  %v4065_v4 = vpack.c.bf16 %v3712_v23, %v3712_v23  ;;  %v3695_v55 = vadd.f32 %v3679_v18, %v722_v3  ;;  %v3698_v12 = vadd.f32 %v3682_v50, %v735_v44 }
 0x7a8   : > { %v3647_v7 = vpop.permute.xlu1 %3646  ;;  %v3659_v48 = vpop.permute.xlu0 %3658 }
 0x7a9   : > { %3790 = vst.msk [vmem:[%s6363_s28 + $0x14] sm:$0xf] %vm3784_vm6, %v4062_v22  ;;  %3793 = vst.msk [vmem:[%s6363_s28 + $0x20] sm:$0xf] %vm3784_vm6, %v4065_v4  ;;  %v3711_v10 = vmax.f32 %v3695_v55, 0.0  ;;  %v3714_v26 = vmax.f32 %v3698_v12, 0.0  ;;  %v3681_v27 = vmul.f32 %v3647_v7, %v6075_v17  ;;  %v3684_v49 = vmul.f32 %v3659_v48, %v6620_v31 }
 0x7ab   : > { %v4064_v41 = vpack.c.bf16 %v3711_v10, %v3711_v10  ;;  %v4067_v63 = vpack.c.bf16 %v3714_v26, %v3714_v26  ;;  %v3697_v24 = vadd.f32 %v3681_v27, %v730_v51  ;;  %v3700_v53 = vadd.f32 %v3684_v49, %v743_v25 }
 0x7ac   : > { %v3655_v40 = vpop.permute.xlu1 %3654  ;;  %v3667_v33 = vpop.permute.xlu0 %3666 }
 0x7ad   : > { %3792 = vst.msk [vmem:[%s6363_s28 + $0x1c] sm:$0xf] %vm3784_vm6, %v4064_v41  ;;  %3795 = vst.msk [vmem:[%s6363_s28 + $0x28] sm:$0xf] %vm3784_vm6, %v4067_v63  ;;  %v3713_v17 = vmax.f32 %v3697_v24, 0.0  ;;  %v3716_v47 = vmax.f32 %v3700_v53, 0.0  ;;  %v3683_v57 = vmul.f32 %v3655_v40, %v6623_v45  ;;  %v3686_v9 = vmul.f32 %v3667_v33, %v6624_v32 }
 0x7af   : > { %v4066_v8 = vpack.c.bf16 %v3713_v17, %v3713_v17  ;;  %v4069_v29 = vpack.c.bf16 %v3716_v47, %v3716_v47  ;;  %v3699_v42 = vadd.f32 %v3683_v57, %v738_v62  ;;  %v3702_v46 = vadd.f32 %v3686_v9, %v751_v56 }
 0x7b0   : > { %v3663_v52 = vpop.permute.xlu1 %3662 }
 0x7b1   : > { %3794 = vst.msk [vmem:[%s6363_s28 + $0x24] sm:$0xf] %vm3784_vm6, %v4066_v8  ;;  %3797 = vst.msk [vmem:[%s6363_s28 + $0x30] sm:$0xf] %vm3784_vm6, %v4069_v29  ;;  %v3715_v15 = vmax.f32 %v3699_v42, 0.0  ;;  %v3718_v21 = vmax.f32 %v3702_v46, 0.0  ;;  %v3685_v16 = vmul.f32 %v3663_v52, %v6626_v36 }
 0x7b3   : > { %v4068_v35 = vpack.c.bf16 %v3715_v15, %v3715_v15  ;;  %v4071_v43 = vpack.c.bf16 %v3718_v21, %v3718_v21  ;;  %v3701_v58 = vadd.f32 %v3685_v16, %v746_v30 }
 0x7b4   : > { %v3671_v6 = vpop.permute.xlu1 %3670 }
 0x7b5   : > { %3796 = vst.msk [vmem:[%s6363_s28 + $0x2c] sm:$0xf] %vm3784_vm6, %v4068_v35  ;;  %3799 = vst.msk [vmem:[%s6363_s28 + $0x38] sm:$0xf] %vm3784_vm6, %v4071_v43  ;;  %v3717_v1 = vmax.f32 %v3701_v58, 0.0  ;;  %v3687_v37 = vmul.f32 %v3671_v6, %v6628_v13 }
 0x7b7   : > { %v4070_v11 = vpack.c.bf16 %v3717_v1, %v3717_v1  ;;  %v3703_v5 = vadd.f32 %v3687_v37, %v754_v54 }
 0x7b9   : > { %3798 = vst.msk [vmem:[%s6363_s28 + $0x34] sm:$0xf] %vm3784_vm6, %v4070_v11  ;;  %v3719_v59 = vmax.f32 %v3703_v5, 0.0 }
 0x7bb   : > { %v4072_v61 = vpack.c.bf16 %v3719_v59, %v3719_v59 }
 0x7bd   : > { %3800 = vst.msk [vmem:[%s6363_s28 + $0x3c] sm:$0xf] %vm3784_vm6, %v4072_v61 }
 0x7be   : > { %4608 = shalt.err (!%p4605_p3)
}
 0x7bf   : > { %s4609_s20 = scalar_lea.hbm %s6432_s18, 1024  ;;  %s4613_s26 = scalar_lea.hbm %s6492_s12, 2048 }
 0x7c0   : > { %p4610_p4 = scmp.ne.s32.totalorder %s6432_s18, %s4609_s20  ;;  %p4614_p9 = scmp.lt.s32.totalorder %s6432_s18, %s6492_s12 }
 0x7c1   : > { %p4615_p10 = scmp.lt.s32.totalorder %s4613_s26, %s4609_s20 }
 0x7c2   : > { %p4611_p7 = pnand %p4610_p4, %p4766_p5 }
 0x7c3   : > { %p4616_p11 = por %p4615_p10, %p4614_p9 }
 0x7c4   : > { %p4612_p8 = pneg %p4611_p7 }
 0x7c6   : > { %p4617_p12 = pnand %p4616_p11, %p4612_p8 }
 0x7c8   : > { %4620 = shalt.err (!%p4617_p12)
}
 0x7c9   : > { %s4661_s25 = smov 64   ;;  %s4662_s16 = smov 4  }
 0x7ca   : > { %4531 = dma.vmem_to_hbm [thread:$0]  (%p4766_p5), %s6434_s15, 1024, %s6432_s18, %s6440_s19, %s4661_s25, %s4661_s25, %s4662_s16  }
 0x7cb PF: > { %p4537_p13 = scmp.ge.s32.totalorder %s4655_s24, 2  ;;  %s3831_s29 = sand.u32 1, %s4643_s21  }
 0x7cc   : > { %s3832_s0 = scalar_lea.sflag [#allocation3], %s3831_s29 }
 0x7cd   : > { %p4534_p0 = pnand %p4537_p13, %p4770_p6 }
 0x7cf   : > { %p4535_p1 = pneg %p4534_p0 }
 0x7d1   : > { %4638 = dma.done.wait (%p4535_p1), %s3832_s0, 1024  }
 0x7d2   : > { %4640 = vsyncadd (%p4535_p1), %s3832_s0, 4294966272  ;;  %p22_p2 = scmp.ge.s32.totalorder %s4753_s27, 4   ;;  %s6629_s21 = smov %s4647_s22 }
 0x7d3   : > { %s6630_s22 = smov %s4651_s23  ;;  %s6631_s23 = smov %s4764_s30 }
 0x7d4   : > { %s6632_s24 = smov %s4753_s27  ;;  %24 = sbr.rel (!%p22_p2) target bundleno = 6 (0x6), region = 111 }
 0x7d9   :  { %3837 = vsyncpa [#allocation3], 1 }
 0x7da   :  { %3839 = vsyncpa [#allocation3 + $0x1], 1 }

</bundles_post_ra>
